<compile_context>
chip_gen: v6e
topology: v6e:2x2x1
jax: 0.10.0
libtpu: 0.0.40
codegen_flags: <defaults>
</compile_context>

<pallas_src>
import math

import numpy as np
import jax
import jax.numpy as jnp
from jax import lax
from jax.experimental import pallas as pl
from jax.experimental.pallas import tpu as pltpu

D_MODEL = 32
NHEAD = 4
DIM_FF = 64
NUM_LAYERS = 2
DH = D_MODEL // NHEAD
EPS = 1e-5
NEG_INF = -1e9


# ---------------------------------------------------------------------------
# in-kernel helpers (pure value ops; everything stays in VMEM / vregs)
# ---------------------------------------------------------------------------
def _layer_norm(x, g, b):
    mean = jnp.mean(x, axis=-1, keepdims=True)
    c = x - mean
    var = jnp.mean(c * c, axis=-1, keepdims=True)
    return c * lax.rsqrt(var + EPS) * g + b


def _fold_heads(m):
    # (R, NHEAD*DH) -> (NHEAD*R, DH); rows ordered (head, original-row)
    return jnp.concatenate([m[:, h * DH:(h + 1) * DH] for h in range(NHEAD)], axis=0)


def _unfold_heads(m, rows):
    # (NHEAD*rows, DH) -> (rows, NHEAD*DH); restores head-major lane layout for out-proj
    return jnp.concatenate([m[h * rows:(h + 1) * rows, :] for h in range(NHEAD)], axis=-1)


def _attention(q, k, v, bias, wo, bo):
    """Block-diagonal multi-head attention over all batches/heads at once.

    q: (B*Lq, D); k, v: (B*Tk, D); bias: (NHEAD*B*Lq, NHEAD*B*Tk) additive
    (-1e9 on off-(head,batch) blocks and padded keys).  Returns (B*Lq, D).
    """
    blq = q.shape[0]
    scale = 1.0 / math.sqrt(DH)
    qh = _fold_heads(q * scale)                                     # (H*B*Lq, DH)
    kh = _fold_heads(k)                                             # (H*B*Tk, DH)
    vh = _fold_heads(v)                                             # (H*B*Tk, DH)

    s = lax.dot_general(qh, kh, (((1,), (1,)), ((), ())),
                        preferred_element_type=jnp.float32) + bias  # (H*B*Lq, H*B*Tk)
    s = s - jnp.max(s, axis=-1, keepdims=True)
    e = jnp.exp(s)
    p = e / jnp.sum(e, axis=-1, keepdims=True)                      # exact division
    ah = jnp.dot(p, vh, preferred_element_type=jnp.float32)         # (H*B*Lq, DH)
    o = _unfold_heads(ah, blq)                                      # (B*Lq, D)
    return jnp.dot(o, wo, preferred_element_type=jnp.float32) + bo


# ---------------------------------------------------------------------------
# Fused kernel: input LN -> NUM_LAYERS x (self-attn, cross-attn, FFN) -> final LN
# ---------------------------------------------------------------------------
def _make_kernel(B):
    def kernel(x_ref, mem_ref, tmask_ref, mmask_ref,
               bd_self_ref, bd_cross_ref,
               wqkv_s_ref, bqkv_s_ref, wo_s_ref, bo_s_ref,
               wq_c_ref, bq_c_ref, wkv_c_ref, bkv_c_ref, wo_c_ref, bo_c_ref,
               w1_ref, b1_ref, w2_ref, b2_ref,
               lng_ref, lnb_ref,
               out_ref):
        D = D_MODEL
        x = x_ref[...]                       # (B*Lp, D) residual stream
        mem = mem_ref[...]                   # (B*Sp, D)

        # key-padding bias built in-kernel from the int masks; columns ordered (h, b, t)
        def key_bias(mask):                  # mask: (B, T) int32, nonzero == pad
            row = jnp.concatenate([mask[b:b + 1, :] for b in range(B)], axis=1)
            row = jnp.concatenate([row] * NHEAD, axis=1)            # (1, H*B*T)
            return jnp.where(row != 0, jnp.float32(NEG_INF), jnp.float32(0.0))

        self_bias = bd_self_ref[...] + key_bias(tmask_ref[...])     # (H*B*Lp, H*B*Lp)
        cross_bias = bd_cross_ref[...] + key_bias(mmask_ref[...])   # (H*B*Lp, H*B*Sp)

        # small parameter slabs loaded once, sliced as values
        bqkv_s = bqkv_s_ref[...]; bo_s = bo_s_ref[...]
        bq_c = bq_c_ref[...]; bkv_c = bkv_c_ref[...]; bo_c = bo_c_ref[...]
        b1 = b1_ref[...]; b2 = b2_ref[...]
        lng = lng_ref[...]; lnb = lnb_ref[...]

        def ln(i, y):
            return _layer_norm(y, lng[i:i + 1, :], lnb[i:i + 1, :])

        # ---- input LayerNorm ----
        x = ln(0, x)

        ln_i = 1
        for layer in range(NUM_LAYERS):
            # ---- self-attention: one fused QKV projection, block-diag attention ----
            qkv = jnp.dot(x, wqkv_s_ref[layer],
                          preferred_element_type=jnp.float32) + bqkv_s[layer:layer + 1, :]
            sa = _attention(qkv[:, :D], qkv[:, D:2 * D], qkv[:, 2 * D:],
                            self_bias, wo_s_ref[layer], bo_s[layer:layer + 1, :])
            x = ln(ln_i, x + sa); ln_i += 1

            # ---- cross-attention: Q proj + one fused KV projection of memory ----
            q = jnp.dot(x, wq_c_ref[layer],
                        preferred_element_type=jnp.float32) + bq_c[layer:layer + 1, :]
            kv = jnp.dot(mem, wkv_c_ref[layer],
                         preferred_element_type=jnp.float32) + bkv_c[layer:layer + 1, :]
            ca = _attention(q, kv[:, :D], kv[:, D:],
                            cross_bias, wo_c_ref[layer], bo_c[layer:layer + 1, :])
            x = ln(ln_i, x + ca); ln_i += 1

            # ---- feed-forward (relu) + add & norm ----
            h = jnp.dot(x, w1_ref[layer],
                        preferred_element_type=jnp.float32) + b1[layer:layer + 1, :]
            h = jnp.maximum(h, 0.0)
            ff = jnp.dot(h, w2_ref[layer],
                         preferred_element_type=jnp.float32) + b2[layer:layer + 1, :]
            x = ln(ln_i, x + ff); ln_i += 1

        # ---- final decoder LayerNorm ----
        out_ref[...] = ln(ln_i, x)

    return kernel


# ---------------------------------------------------------------------------
# Wrapper: one pallas_call for the whole forward
# ---------------------------------------------------------------------------
def _block_diag_bias(Lq, Tk, B):
    """Compile-time constant: 0 on matching (head,batch) blocks, -1e9 elsewhere."""
    eye = np.kron(np.eye(NHEAD * B, dtype=np.float32), np.ones((Lq, Tk), np.float32))
    return jnp.asarray(np.where(eye > 0.0, 0.0, NEG_INF).astype(np.float32))


def _pad_rows(x_btd, mask_bt, mult=8):
    """Pad the sequence axis of (B, T, D) / (B, T) up to a multiple of `mult`.
    Extra positions are marked as padding so they are masked out of attention."""
    T = x_btd.shape[1]
    Tp = ((T + mult - 1) // mult) * mult
    if Tp != T:
        x_btd = jnp.pad(x_btd, ((0, 0), (0, Tp - T), (0, 0)))
        mask_bt = jnp.pad(mask_bt, ((0, 0), (0, Tp - T)), constant_values=True)
    return x_btd, mask_bt, Tp


def transformer_node_decoder(padded_tgt, padded_memory, tgt_mask, memory_mask, params):
    """padded_tgt: (L, B, D); padded_memory: (S, B, D); masks: (B, T) bool, True == pad."""
    L, B, D = padded_tgt.shape

    # single layout change at entry/exit ((T,B,D) <-> (B,T,D) 2-D slabs)
    x_bld = jnp.transpose(padded_tgt, (1, 0, 2))
    mem_bsd = jnp.transpose(padded_memory, (1, 0, 2))

    x_bld, tmask, Lp = _pad_rows(x_bld, tgt_mask)
    mem_bsd, mmask, Sp = _pad_rows(mem_bsd, memory_mask)

    x2d = x_bld.reshape(B * Lp, D)
    mem2d = mem_bsd.reshape(B * Sp, D)
    tmask = tmask.astype(jnp.int32)      # bias is built inside the kernel
    mmask = mmask.astype(jnp.int32)

    bd_self = _block_diag_bias(Lp, Lp, B)
    bd_cross = _block_diag_bias(Lp, Sp, B)

    flat = (params["wqkv_s"], params["bqkv_s"], params["wo_s"], params["bo_s"],
            params["wq_c"], params["bq_c"], params["wkv_c"], params["bkv_c"],
            params["wo_c"], params["bo_c"],
            params["w1"], params["b1"], params["w2"], params["b2"],
            params["ln_g"], params["ln_b"])
    n_in = 6 + len(flat)

    vmem = pl.BlockSpec(memory_space=pltpu.MemorySpace.VMEM)
    out2d = pl.pallas_call(
        _make_kernel(B),
        out_shape=jax.ShapeDtypeStruct((B * Lp, D), jnp.float32),
        in_specs=[vmem] * n_in,
        out_specs=vmem,
    )(x2d, mem2d, tmask, mmask, bd_self, bd_cross, *flat)

    out = out2d.reshape(B, Lp, D)[:, :L, :]
    return jnp.transpose(out, (1, 0, 2))


# ---------------------------------------------------------------------------
# Deterministic synthetic parameters (stacked; derived from PyTorch-layout tensors)
# ---------------------------------------------------------------------------
def init_params(key):
    keys = iter(jax.random.split(key, 256))

    def w(shape, scale=0.1):
        return (scale * jax.random.normal(next(keys), shape)).astype(jnp.float32)

    p = {k: [] for k in ("wqkv_s", "bqkv_s", "wo_s", "bo_s",
                         "wq_c", "bq_c", "wkv_c", "bkv_c", "wo_c", "bo_c",
                         "w1", "b1", "w2", "b2", "ln_g", "ln_b")}

    def add_ln():
        p["ln_g"].append(jnp.ones((D_MODEL,), jnp.float32) + w((D_MODEL,), 0.02))
        p["ln_b"].append(w((D_MODEL,), 0.02))

    def attn_weights():
        in_w = w((3 * D_MODEL, D_MODEL))       # PyTorch in_proj_weight (3D, D)
        in_b = w((3 * D_MODEL,), 0.02)         # in_proj_bias (3D,)
        out_w = w((D_MODEL, D_MODEL))          # out_proj.weight (D, D)
        out_b = w((D_MODEL,), 0.02)
        return in_w, in_b, out_w, out_b

    add_ln()                                   # norm_input
    for _ in range(NUM_LAYERS):
        # self-attention: fused (D, 3D) projection = in_proj_weight.T
        in_w, in_b, out_w, out_b = attn_weights()
        p["wqkv_s"].append(in_w.T);             p["bqkv_s"].append(in_b)
        p["wo_s"].append(out_w.T);              p["bo_s"].append(out_b)
        # cross-attention: separate Q (D,D) + fused K/V (D, 2D)
        in_w, in_b, out_w, out_b = attn_weights()
        p["wq_c"].append(in_w[:D_MODEL].T);     p["bq_c"].append(in_b[:D_MODEL])
        p["wkv_c"].append(in_w[D_MODEL:].T);    p["bkv_c"].append(in_b[D_MODEL:])
        p["wo_c"].append(out_w.T);              p["bo_c"].append(out_b)
        # feed-forward
        p["w1"].append(w((DIM_FF, D_MODEL)).T); p["b1"].append(w((DIM_FF,), 0.02))
        p["w2"].append(w((D_MODEL, DIM_FF)).T); p["b2"].append(w((D_MODEL,), 0.02))
        add_ln(); add_ln(); add_ln()            # norm1, norm2, norm3
    add_ln()                                    # final decoder LayerNorm

    return {k: jnp.stack(v, axis=0) for k, v in p.items()}


if __name__ == "__main__":
    key = jax.random.PRNGKey(0)
    k_tgt, k_mem, k_par = jax.random.split(key, 3)

    L, B, S = 8, 2, 6  # N_max, batch, memory length
    padded_tgt = jax.random.normal(k_tgt, (L, B, D_MODEL), jnp.float32)
    padded_memory = jax.random.normal(k_mem, (S, B, D_MODEL), jnp.float32)

    # key-padding masks: True == padding (PyTorch convention)
    tgt_lens = jnp.array([8, 5])
    mem_lens = jnp.array([6, 4])
    tgt_mask = jnp.arange(L)[None, :] >= tgt_lens[:, None]        # (B, L)
    memory_mask = jnp.arange(S)[None, :] >= mem_lens[:, None]     # (B, S)

    params = init_params(k_par)

    fwd = jax.jit(transformer_node_decoder)
    out = fwd(padded_tgt, padded_memory, tgt_mask, memory_mask, params)
    out = jax.block_until_ready(out)

    assert out.shape == (L, B, D_MODEL)
    assert bool(jnp.all(jnp.isfinite(out)))
    print("KERNEL_OK")
</pallas_src>

<mosaic_0001>
module attributes {stable_mosaic.version = 11 : i64} {
  func.func @kernel(%arg0: memref<16x32xf32, #tpu.memory_space<vmem>>, %arg1: memref<16x32xf32, #tpu.memory_space<vmem>>, %arg2: memref<2x8xi32, #tpu.memory_space<vmem>>, %arg3: memref<2x8xi32, #tpu.memory_space<vmem>>, %arg4: memref<64x64xf32, #tpu.memory_space<vmem>>, %arg5: memref<64x64xf32, #tpu.memory_space<vmem>>, %arg6: memref<2x32x96xf32, #tpu.memory_space<vmem>>, %arg7: memref<2x96xf32, #tpu.memory_space<vmem>>, %arg8: memref<2x32x32xf32, #tpu.memory_space<vmem>>, %arg9: memref<2x32xf32, #tpu.memory_space<vmem>>, %arg10: memref<2x32x32xf32, #tpu.memory_space<vmem>>, %arg11: memref<2x32xf32, #tpu.memory_space<vmem>>, %arg12: memref<2x32x64xf32, #tpu.memory_space<vmem>>, %arg13: memref<2x64xf32, #tpu.memory_space<vmem>>, %arg14: memref<2x32x32xf32, #tpu.memory_space<vmem>>, %arg15: memref<2x32xf32, #tpu.memory_space<vmem>>, %arg16: memref<2x32x64xf32, #tpu.memory_space<vmem>>, %arg17: memref<2x64xf32, #tpu.memory_space<vmem>>, %arg18: memref<2x64x32xf32, #tpu.memory_space<vmem>>, %arg19: memref<2x32xf32, #tpu.memory_space<vmem>>, %arg20: memref<8x32xf32, #tpu.memory_space<vmem>>, %arg21: memref<8x32xf32, #tpu.memory_space<vmem>>, %arg22: memref<16x32xf32, #tpu.memory_space<vmem>>) attributes {dimension_semantics = [], scalar_prefetch = 0 : i64, scratch_operands = 0 : i64, tpu.core_type = #tpu.core_type<tc>} {
    %c0 = arith.constant 0 : index
    %c0_0 = arith.constant 0 : index
    %0 = vector.load %arg0[%c0, %c0_0] : memref<16x32xf32, #tpu.memory_space<vmem>>, vector<16x32xf32>
    %c0_1 = arith.constant 0 : index
    %c0_2 = arith.constant 0 : index
    %1 = vector.load %arg1[%c0_1, %c0_2] : memref<16x32xf32, #tpu.memory_space<vmem>>, vector<16x32xf32>
    %c0_3 = arith.constant 0 : index
    %c0_4 = arith.constant 0 : index
    %2 = vector.load %arg4[%c0_3, %c0_4] : memref<64x64xf32, #tpu.memory_space<vmem>>, vector<64x64xf32>
    %c0_5 = arith.constant 0 : index
    %c0_6 = arith.constant 0 : index
    %3 = vector.load %arg2[%c0_5, %c0_6] : memref<2x8xi32, #tpu.memory_space<vmem>>, vector<2x8xi32>
    %4 = vector.extract_strided_slice %3 {offsets = [0, 0], sizes = [1, 8], strides = [1, 1]} : vector<2x8xi32> to vector<1x8xi32>
    %5 = vector.extract_strided_slice %3 {offsets = [1, 0], sizes = [1, 8], strides = [1, 1]} : vector<2x8xi32> to vector<1x8xi32>
    %6 = tpu.concatenate %4, %5 in 1 : vector<1x8xi32>, vector<1x8xi32> -> vector<1x16xi32>
    %7 = tpu.concatenate %6, %6, %6, %6 in 1 : vector<1x16xi32>, vector<1x16xi32>, vector<1x16xi32>, vector<1x16xi32> -> vector<1x64xi32>
    %c0_i32 = arith.constant 0 : i32
    %8 = vector.broadcast %c0_i32 : i32 to vector<1x64xi32>
    %9 = arith.cmpi ne, %7, %8 : vector<1x64xi32>
    %cst = arith.constant -1.000000e+09 : f32
    %cst_7 = arith.constant 0.000000e+00 : f32
    %10 = vector.broadcast %cst : f32 to vector<1x64xf32>
    %11 = vector.broadcast %cst_7 : f32 to vector<1x64xf32>
    %12 = arith.select %9, %10, %11 : vector<1x64xi1>, vector<1x64xf32>
    %13 = vector.broadcast %12 : vector<1x64xf32> to vector<64x64xf32>
    %14 = arith.addf %2, %13 : vector<64x64xf32>
    %c0_8 = arith.constant 0 : index
    %c0_9 = arith.constant 0 : index
    %15 = vector.load %arg5[%c0_8, %c0_9] : memref<64x64xf32, #tpu.memory_space<vmem>>, vector<64x64xf32>
    %c0_10 = arith.constant 0 : index
    %c0_11 = arith.constant 0 : index
    %16 = vector.load %arg3[%c0_10, %c0_11] : memref<2x8xi32, #tpu.memory_space<vmem>>, vector<2x8xi32>
    %17 = vector.extract_strided_slice %16 {offsets = [0, 0], sizes = [1, 8], strides = [1, 1]} : vector<2x8xi32> to vector<1x8xi32>
    %18 = vector.extract_strided_slice %16 {offsets = [1, 0], sizes = [1, 8], strides = [1, 1]} : vector<2x8xi32> to vector<1x8xi32>
    %19 = tpu.concatenate %17, %18 in 1 : vector<1x8xi32>, vector<1x8xi32> -> vector<1x16xi32>
    %20 = tpu.concatenate %19, %19, %19, %19 in 1 : vector<1x16xi32>, vector<1x16xi32>, vector<1x16xi32>, vector<1x16xi32> -> vector<1x64xi32>
    %c0_i32_12 = arith.constant 0 : i32
    %21 = vector.broadcast %c0_i32_12 : i32 to vector<1x64xi32>
    %22 = arith.cmpi ne, %20, %21 : vector<1x64xi32>
    %cst_13 = arith.constant -1.000000e+09 : f32
    %cst_14 = arith.constant 0.000000e+00 : f32
    %23 = vector.broadcast %cst_13 : f32 to vector<1x64xf32>
    %24 = vector.broadcast %cst_14 : f32 to vector<1x64xf32>
    %25 = arith.select %22, %23, %24 : vector<1x64xi1>, vector<1x64xf32>
    %26 = vector.broadcast %25 : vector<1x64xf32> to vector<64x64xf32>
    %27 = arith.addf %15, %26 : vector<64x64xf32>
    %c0_15 = arith.constant 0 : index
    %c0_16 = arith.constant 0 : index
    %28 = vector.load %arg7[%c0_15, %c0_16] : memref<2x96xf32, #tpu.memory_space<vmem>>, vector<2x96xf32>
    %c0_17 = arith.constant 0 : index
    %c0_18 = arith.constant 0 : index
    %29 = vector.load %arg9[%c0_17, %c0_18] : memref<2x32xf32, #tpu.memory_space<vmem>>, vector<2x32xf32>
    %c0_19 = arith.constant 0 : index
    %c0_20 = arith.constant 0 : index
    %30 = vector.load %arg11[%c0_19, %c0_20] : memref<2x32xf32, #tpu.memory_space<vmem>>, vector<2x32xf32>
    %c0_21 = arith.constant 0 : index
    %c0_22 = arith.constant 0 : index
    %31 = vector.load %arg13[%c0_21, %c0_22] : memref<2x64xf32, #tpu.memory_space<vmem>>, vector<2x64xf32>
    %c0_23 = arith.constant 0 : index
    %c0_24 = arith.constant 0 : index
    %32 = vector.load %arg15[%c0_23, %c0_24] : memref<2x32xf32, #tpu.memory_space<vmem>>, vector<2x32xf32>
    %c0_25 = arith.constant 0 : index
    %c0_26 = arith.constant 0 : index
    %33 = vector.load %arg17[%c0_25, %c0_26] : memref<2x64xf32, #tpu.memory_space<vmem>>, vector<2x64xf32>
    %c0_27 = arith.constant 0 : index
    %c0_28 = arith.constant 0 : index
    %34 = vector.load %arg19[%c0_27, %c0_28] : memref<2x32xf32, #tpu.memory_space<vmem>>, vector<2x32xf32>
    %c0_29 = arith.constant 0 : index
    %c0_30 = arith.constant 0 : index
    %35 = vector.load %arg20[%c0_29, %c0_30] : memref<8x32xf32, #tpu.memory_space<vmem>>, vector<8x32xf32>
    %c0_31 = arith.constant 0 : index
    %c0_32 = arith.constant 0 : index
    %36 = vector.load %arg21[%c0_31, %c0_32] : memref<8x32xf32, #tpu.memory_space<vmem>>, vector<8x32xf32>
    %37 = vector.extract_strided_slice %35 {offsets = [0, 0], sizes = [1, 32], strides = [1, 1]} : vector<8x32xf32> to vector<1x32xf32>
    %38 = vector.extract_strided_slice %36 {offsets = [0, 0], sizes = [1, 32], strides = [1, 1]} : vector<8x32xf32> to vector<1x32xf32>
    %cst_33 = arith.constant dense<0.000000e+00> : vector<16xf32>
    %39 = vector.multi_reduction <add>, %0, %cst_33 [1] : vector<16x32xf32> to vector<16xf32>
    %40 = vector.shape_cast %39 : vector<16xf32> to vector<16x1xf32>
    %cst_34 = arith.constant 3.200000e+01 : f32
    %41 = vector.broadcast %cst_34 : f32 to vector<16x1xf32>
    %42 = arith.divf %40, %41 : vector<16x1xf32>
    %43 = vector.broadcast %42 : vector<16x1xf32> to vector<16x32xf32>
    %44 = arith.subf %0, %43 : vector<16x32xf32>
    %45 = arith.mulf %44, %44 : vector<16x32xf32>
    %cst_35 = arith.constant dense<0.000000e+00> : vector<16xf32>
    %46 = vector.multi_reduction <add>, %45, %cst_35 [1] : vector<16x32xf32> to vector<16xf32>
    %47 = vector.shape_cast %46 : vector<16xf32> to vector<16x1xf32>
    %cst_36 = arith.constant 3.200000e+01 : f32
    %48 = vector.broadcast %cst_36 : f32 to vector<16x1xf32>
    %49 = arith.divf %47, %48 : vector<16x1xf32>
    %cst_37 = arith.constant 9.99999974E-6 : f32
    %50 = vector.broadcast %cst_37 : f32 to vector<16x1xf32>
    %51 = arith.addf %49, %50 : vector<16x1xf32>
    %52 = math.rsqrt %51 : vector<16x1xf32>
    %53 = vector.broadcast %52 : vector<16x1xf32> to vector<16x32xf32>
    %54 = arith.mulf %44, %53 : vector<16x32xf32>
    %55 = vector.broadcast %37 : vector<1x32xf32> to vector<16x32xf32>
    %56 = arith.mulf %54, %55 : vector<16x32xf32>
    %57 = vector.broadcast %38 : vector<1x32xf32> to vector<16x32xf32>
    %58 = arith.addf %56, %57 : vector<16x32xf32>
    %c0_38 = arith.constant 0 : index
    %c0_39 = arith.constant 0 : index
    %c0_40 = arith.constant 0 : index
    %59 = vector.load %arg6[%c0_38, %c0_39, %c0_40] : memref<2x32x96xf32, #tpu.memory_space<vmem>>, vector<1x32x96xf32>
    %60 = vector.shape_cast %59 : vector<1x32x96xf32> to vector<32x96xf32>
    %cst_41 = arith.constant dense<0.000000e+00> : vector<16x96xf32>
    %61 = tpu.matmul %58, %60, %cst_41 {dimension_numbers = #tpu.dot_dimension_numbers<[1], [0], [0], [1], [0, 0, 1, 1], [], []>} : vector<16x32xf32>, vector<32x96xf32>, vector<16x96xf32> -> vector<16x96xf32>
    %62 = vector.extract_strided_slice %28 {offsets = [0, 0], sizes = [1, 96], strides = [1, 1]} : vector<2x96xf32> to vector<1x96xf32>
    %63 = vector.broadcast %62 : vector<1x96xf32> to vector<16x96xf32>
    %64 = arith.addf %61, %63 : vector<16x96xf32>
    %65 = vector.extract_strided_slice %64 {offsets = [0, 0], sizes = [16, 32], strides = [1, 1]} : vector<16x96xf32> to vector<16x32xf32>
    %66 = vector.extract_strided_slice %64 {offsets = [0, 32], sizes = [16, 32], strides = [1, 1]} : vector<16x96xf32> to vector<16x32xf32>
    %67 = vector.extract_strided_slice %64 {offsets = [0, 64], sizes = [16, 32], strides = [1, 1]} : vector<16x96xf32> to vector<16x32xf32>
    %c0_42 = arith.constant 0 : index
    %c0_43 = arith.constant 0 : index
    %c0_44 = arith.constant 0 : index
    %68 = vector.load %arg8[%c0_42, %c0_43, %c0_44] : memref<2x32x32xf32, #tpu.memory_space<vmem>>, vector<1x32x32xf32>
    %69 = vector.shape_cast %68 : vector<1x32x32xf32> to vector<32x32xf32>
    %70 = vector.extract_strided_slice %29 {offsets = [0, 0], sizes = [1, 32], strides = [1, 1]} : vector<2x32xf32> to vector<1x32xf32>
    %cst_45 = arith.constant 0.353553385 : f32
    %71 = vector.broadcast %cst_45 : f32 to vector<16x32xf32>
    %72 = arith.mulf %65, %71 : vector<16x32xf32>
    %73 = vector.extract_strided_slice %72 {offsets = [0, 0], sizes = [16, 8], strides = [1, 1]} : vector<16x32xf32> to vector<16x8xf32>
    %74 = vector.extract_strided_slice %72 {offsets = [0, 8], sizes = [16, 8], strides = [1, 1]} : vector<16x32xf32> to vector<16x8xf32>
    %75 = vector.extract_strided_slice %72 {offsets = [0, 16], sizes = [16, 8], strides = [1, 1]} : vector<16x32xf32> to vector<16x8xf32>
    %76 = vector.extract_strided_slice %72 {offsets = [0, 24], sizes = [16, 8], strides = [1, 1]} : vector<16x32xf32> to vector<16x8xf32>
    %77 = tpu.concatenate %73, %74, %75, %76 in 0 : vector<16x8xf32>, vector<16x8xf32>, vector<16x8xf32>, vector<16x8xf32> -> vector<64x8xf32>
    %78 = vector.extract_strided_slice %66 {offsets = [0, 0], sizes = [16, 8], strides = [1, 1]} : vector<16x32xf32> to vector<16x8xf32>
    %79 = vector.extract_strided_slice %66 {offsets = [0, 8], sizes = [16, 8], strides = [1, 1]} : vector<16x32xf32> to vector<16x8xf32>
    %80 = vector.extract_strided_slice %66 {offsets = [0, 16], sizes = [16, 8], strides = [1, 1]} : vector<16x32xf32> to vector<16x8xf32>
    %81 = vector.extract_strided_slice %66 {offsets = [0, 24], sizes = [16, 8], strides = [1, 1]} : vector<16x32xf32> to vector<16x8xf32>
    %82 = tpu.concatenate %78, %79, %80, %81 in 0 : vector<16x8xf32>, vector<16x8xf32>, vector<16x8xf32>, vector<16x8xf32> -> vector<64x8xf32>
    %83 = vector.extract_strided_slice %67 {offsets = [0, 0], sizes = [16, 8], strides = [1, 1]} : vector<16x32xf32> to vector<16x8xf32>
    %84 = vector.extract_strided_slice %67 {offsets = [0, 8], sizes = [16, 8], strides = [1, 1]} : vector<16x32xf32> to vector<16x8xf32>
    %85 = vector.extract_strided_slice %67 {offsets = [0, 16], sizes = [16, 8], strides = [1, 1]} : vector<16x32xf32> to vector<16x8xf32>
    %86 = vector.extract_strided_slice %67 {offsets = [0, 24], sizes = [16, 8], strides = [1, 1]} : vector<16x32xf32> to vector<16x8xf32>
    %87 = tpu.concatenate %83, %84, %85, %86 in 0 : vector<16x8xf32>, vector<16x8xf32>, vector<16x8xf32>, vector<16x8xf32> -> vector<64x8xf32>
    %cst_46 = arith.constant dense<0.000000e+00> : vector<64x64xf32>
    %88 = tpu.matmul %77, %82, %cst_46 {dimension_numbers = #tpu.dot_dimension_numbers<[1], [1], [0], [0], [0, 0, 1, 0], [], []>} : vector<64x8xf32>, vector<64x8xf32>, vector<64x64xf32> -> vector<64x64xf32>
    %89 = arith.addf %88, %14 : vector<64x64xf32>
    %cst_47 = arith.constant dense<0xFF800000> : vector<64xf32>
    %90 = vector.multi_reduction <maximumf>, %89, %cst_47 [1] : vector<64x64xf32> to vector<64xf32>
    %91 = vector.shape_cast %90 : vector<64xf32> to vector<64x1xf32>
    %92 = vector.broadcast %91 : vector<64x1xf32> to vector<64x64xf32>
    %93 = arith.subf %89, %92 : vector<64x64xf32>
    %94 = math.exp %93 : vector<64x64xf32>
    %cst_48 = arith.constant dense<0.000000e+00> : vector<64xf32>
    %95 = vector.multi_reduction <add>, %94, %cst_48 [1] : vector<64x64xf32> to vector<64xf32>
    %96 = vector.shape_cast %95 : vector<64xf32> to vector<64x1xf32>
    %97 = vector.broadcast %96 : vector<64x1xf32> to vector<64x64xf32>
    %98 = arith.divf %94, %97 : vector<64x64xf32>
    %cst_49 = arith.constant dense<0.000000e+00> : vector<64x8xf32>
    %99 = tpu.matmul %98, %87, %cst_49 {dimension_numbers = #tpu.dot_dimension_numbers<[1], [0], [0], [1], [0, 0, 1, 1], [], []>} : vector<64x64xf32>, vector<64x8xf32>, vector<64x8xf32> -> vector<64x8xf32>
    %100 = vector.extract_strided_slice %99 {offsets = [0, 0], sizes = [16, 8], strides = [1, 1]} : vector<64x8xf32> to vector<16x8xf32>
    %101 = vector.extract_strided_slice %99 {offsets = [16, 0], sizes = [16, 8], strides = [1, 1]} : vector<64x8xf32> to vector<16x8xf32>
    %102 = vector.extract_strided_slice %99 {offsets = [32, 0], sizes = [16, 8], strides = [1, 1]} : vector<64x8xf32> to vector<16x8xf32>
    %103 = vector.extract_strided_slice %99 {offsets = [48, 0], sizes = [16, 8], strides = [1, 1]} : vector<64x8xf32> to vector<16x8xf32>
    %104 = tpu.concatenate %100, %101, %102, %103 in 1 : vector<16x8xf32>, vector<16x8xf32>, vector<16x8xf32>, vector<16x8xf32> -> vector<16x32xf32>
    %cst_50 = arith.constant dense<0.000000e+00> : vector<16x32xf32>
    %105 = tpu.matmul %104, %69, %cst_50 {dimension_numbers = #tpu.dot_dimension_numbers<[1], [0], [0], [1], [0, 0, 1, 1], [], []>} : vector<16x32xf32>, vector<32x32xf32>, vector<16x32xf32> -> vector<16x32xf32>
    %106 = vector.broadcast %70 : vector<1x32xf32> to vector<16x32xf32>
    %107 = arith.addf %105, %106 : vector<16x32xf32>
    %108 = arith.addf %58, %107 : vector<16x32xf32>
    %109 = vector.extract_strided_slice %35 {offsets = [1, 0], sizes = [1, 32], strides = [1, 1]} : vector<8x32xf32> to vector<1x32xf32>
    %110 = vector.extract_strided_slice %36 {offsets = [1, 0], sizes = [1, 32], strides = [1, 1]} : vector<8x32xf32> to vector<1x32xf32>
    %cst_51 = arith.constant dense<0.000000e+00> : vector<16xf32>
    %111 = vector.multi_reduction <add>, %108, %cst_51 [1] : vector<16x32xf32> to vector<16xf32>
    %112 = vector.shape_cast %111 : vector<16xf32> to vector<16x1xf32>
    %cst_52 = arith.constant 3.200000e+01 : f32
    %113 = vector.broadcast %cst_52 : f32 to vector<16x1xf32>
    %114 = arith.divf %112, %113 : vector<16x1xf32>
    %115 = vector.broadcast %114 : vector<16x1xf32> to vector<16x32xf32>
    %116 = arith.subf %108, %115 : vector<16x32xf32>
    %117 = arith.mulf %116, %116 : vector<16x32xf32>
    %cst_53 = arith.constant dense<0.000000e+00> : vector<16xf32>
    %118 = vector.multi_reduction <add>, %117, %cst_53 [1] : vector<16x32xf32> to vector<16xf32>
    %119 = vector.shape_cast %118 : vector<16xf32> to vector<16x1xf32>
    %cst_54 = arith.constant 3.200000e+01 : f32
    %120 = vector.broadcast %cst_54 : f32 to vector<16x1xf32>
    %121 = arith.divf %119, %120 : vector<16x1xf32>
    %cst_55 = arith.constant 9.99999974E-6 : f32
    %122 = vector.broadcast %cst_55 : f32 to vector<16x1xf32>
    %123 = arith.addf %121, %122 : vector<16x1xf32>
    %124 = math.rsqrt %123 : vector<16x1xf32>
    %125 = vector.broadcast %124 : vector<16x1xf32> to vector<16x32xf32>
    %126 = arith.mulf %116, %125 : vector<16x32xf32>
    %127 = vector.broadcast %109 : vector<1x32xf32> to vector<16x32xf32>
    %128 = arith.mulf %126, %127 : vector<16x32xf32>
    %129 = vector.broadcast %110 : vector<1x32xf32> to vector<16x32xf32>
    %130 = arith.addf %128, %129 : vector<16x32xf32>
    %c0_56 = arith.constant 0 : index
    %c0_57 = arith.constant 0 : index
    %c0_58 = arith.constant 0 : index
    %131 = vector.load %arg10[%c0_56, %c0_57, %c0_58] : memref<2x32x32xf32, #tpu.memory_space<vmem>>, vector<1x32x32xf32>
    %132 = vector.shape_cast %131 : vector<1x32x32xf32> to vector<32x32xf32>
    %cst_59 = arith.constant dense<0.000000e+00> : vector<16x32xf32>
    %133 = tpu.matmul %130, %132, %cst_59 {dimension_numbers = #tpu.dot_dimension_numbers<[1], [0], [0], [1], [0, 0, 1, 1], [], []>} : vector<16x32xf32>, vector<32x32xf32>, vector<16x32xf32> -> vector<16x32xf32>
    %134 = vector.extract_strided_slice %30 {offsets = [0, 0], sizes = [1, 32], strides = [1, 1]} : vector<2x32xf32> to vector<1x32xf32>
    %135 = vector.broadcast %134 : vector<1x32xf32> to vector<16x32xf32>
    %136 = arith.addf %133, %135 : vector<16x32xf32>
    %c0_60 = arith.constant 0 : index
    %c0_61 = arith.constant 0 : index
    %c0_62 = arith.constant 0 : index
    %137 = vector.load %arg12[%c0_60, %c0_61, %c0_62] : memref<2x32x64xf32, #tpu.memory_space<vmem>>, vector<1x32x64xf32>
    %138 = vector.shape_cast %137 : vector<1x32x64xf32> to vector<32x64xf32>
    %cst_63 = arith.constant dense<0.000000e+00> : vector<16x64xf32>
    %139 = tpu.matmul %1, %138, %cst_63 {dimension_numbers = #tpu.dot_dimension_numbers<[1], [0], [0], [1], [0, 0, 1, 1], [], []>} : vector<16x32xf32>, vector<32x64xf32>, vector<16x64xf32> -> vector<16x64xf32>
    %140 = vector.extract_strided_slice %31 {offsets = [0, 0], sizes = [1, 64], strides = [1, 1]} : vector<2x64xf32> to vector<1x64xf32>
    %141 = vector.broadcast %140 : vector<1x64xf32> to vector<16x64xf32>
    %142 = arith.addf %139, %141 : vector<16x64xf32>
    %143 = vector.extract_strided_slice %142 {offsets = [0, 0], sizes = [16, 32], strides = [1, 1]} : vector<16x64xf32> to vector<16x32xf32>
    %144 = vector.extract_strided_slice %142 {offsets = [0, 32], sizes = [16, 32], strides = [1, 1]} : vector<16x64xf32> to vector<16x32xf32>
    %c0_64 = arith.constant 0 : index
    %c0_65 = arith.constant 0 : index
    %c0_66 = arith.constant 0 : index
    %145 = vector.load %arg14[%c0_64, %c0_65, %c0_66] : memref<2x32x32xf32, #tpu.memory_space<vmem>>, vector<1x32x32xf32>
    %146 = vector.shape_cast %145 : vector<1x32x32xf32> to vector<32x32xf32>
    %147 = vector.extract_strided_slice %32 {offsets = [0, 0], sizes = [1, 32], strides = [1, 1]} : vector<2x32xf32> to vector<1x32xf32>
    %cst_67 = arith.constant 0.353553385 : f32
    %148 = vector.broadcast %cst_67 : f32 to vector<16x32xf32>
    %149 = arith.mulf %136, %148 : vector<16x32xf32>
    %150 = vector.extract_strided_slice %149 {offsets = [0, 0], sizes = [16, 8], strides = [1, 1]} : vector<16x32xf32> to vector<16x8xf32>
    %151 = vector.extract_strided_slice %149 {offsets = [0, 8], sizes = [16, 8], strides = [1, 1]} : vector<16x32xf32> to vector<16x8xf32>
    %152 = vector.extract_strided_slice %149 {offsets = [0, 16], sizes = [16, 8], strides = [1, 1]} : vector<16x32xf32> to vector<16x8xf32>
    %153 = vector.extract_strided_slice %149 {offsets = [0, 24], sizes = [16, 8], strides = [1, 1]} : vector<16x32xf32> to vector<16x8xf32>
    %154 = tpu.concatenate %150, %151, %152, %153 in 0 : vector<16x8xf32>, vector<16x8xf32>, vector<16x8xf32>, vector<16x8xf32> -> vector<64x8xf32>
    %155 = vector.extract_strided_slice %143 {offsets = [0, 0], sizes = [16, 8], strides = [1, 1]} : vector<16x32xf32> to vector<16x8xf32>
    %156 = vector.extract_strided_slice %143 {offsets = [0, 8], sizes = [16, 8], strides = [1, 1]} : vector<16x32xf32> to vector<16x8xf32>
    %157 = vector.extract_strided_slice %143 {offsets = [0, 16], sizes = [16, 8], strides = [1, 1]} : vector<16x32xf32> to vector<16x8xf32>
    %158 = vector.extract_strided_slice %143 {offsets = [0, 24], sizes = [16, 8], strides = [1, 1]} : vector<16x32xf32> to vector<16x8xf32>
    %159 = tpu.concatenate %155, %156, %157, %158 in 0 : vector<16x8xf32>, vector<16x8xf32>, vector<16x8xf32>, vector<16x8xf32> -> vector<64x8xf32>
    %160 = vector.extract_strided_slice %144 {offsets = [0, 0], sizes = [16, 8], strides = [1, 1]} : vector<16x32xf32> to vector<16x8xf32>
    %161 = vector.extract_strided_slice %144 {offsets = [0, 8], sizes = [16, 8], strides = [1, 1]} : vector<16x32xf32> to vector<16x8xf32>
    %162 = vector.extract_strided_slice %144 {offsets = [0, 16], sizes = [16, 8], strides = [1, 1]} : vector<16x32xf32> to vector<16x8xf32>
    %163 = vector.extract_strided_slice %144 {offsets = [0, 24], sizes = [16, 8], strides = [1, 1]} : vector<16x32xf32> to vector<16x8xf32>
    %164 = tpu.concatenate %160, %161, %162, %163 in 0 : vector<16x8xf32>, vector<16x8xf32>, vector<16x8xf32>, vector<16x8xf32> -> vector<64x8xf32>
    %cst_68 = arith.constant dense<0.000000e+00> : vector<64x64xf32>
    %165 = tpu.matmul %154, %159, %cst_68 {dimension_numbers = #tpu.dot_dimension_numbers<[1], [1], [0], [0], [0, 0, 1, 0], [], []>} : vector<64x8xf32>, vector<64x8xf32>, vector<64x64xf32> -> vector<64x64xf32>
    %166 = arith.addf %165, %27 : vector<64x64xf32>
    %cst_69 = arith.constant dense<0xFF800000> : vector<64xf32>
    %167 = vector.multi_reduction <maximumf>, %166, %cst_69 [1] : vector<64x64xf32> to vector<64xf32>
    %168 = vector.shape_cast %167 : vector<64xf32> to vector<64x1xf32>
    %169 = vector.broadcast %168 : vector<64x1xf32> to vector<64x64xf32>
    %170 = arith.subf %166, %169 : vector<64x64xf32>
    %171 = math.exp %170 : vector<64x64xf32>
    %cst_70 = arith.constant dense<0.000000e+00> : vector<64xf32>
    %172 = vector.multi_reduction <add>, %171, %cst_70 [1] : vector<64x64xf32> to vector<64xf32>
    %173 = vector.shape_cast %172 : vector<64xf32> to vector<64x1xf32>
    %174 = vector.broadcast %173 : vector<64x1xf32> to vector<64x64xf32>
    %175 = arith.divf %171, %174 : vector<64x64xf32>
    %cst_71 = arith.constant dense<0.000000e+00> : vector<64x8xf32>
    %176 = tpu.matmul %175, %164, %cst_71 {dimension_numbers = #tpu.dot_dimension_numbers<[1], [0], [0], [1], [0, 0, 1, 1], [], []>} : vector<64x64xf32>, vector<64x8xf32>, vector<64x8xf32> -> vector<64x8xf32>
    %177 = vector.extract_strided_slice %176 {offsets = [0, 0], sizes = [16, 8], strides = [1, 1]} : vector<64x8xf32> to vector<16x8xf32>
    %178 = vector.extract_strided_slice %176 {offsets = [16, 0], sizes = [16, 8], strides = [1, 1]} : vector<64x8xf32> to vector<16x8xf32>
    %179 = vector.extract_strided_slice %176 {offsets = [32, 0], sizes = [16, 8], strides = [1, 1]} : vector<64x8xf32> to vector<16x8xf32>
    %180 = vector.extract_strided_slice %176 {offsets = [48, 0], sizes = [16, 8], strides = [1, 1]} : vector<64x8xf32> to vector<16x8xf32>
    %181 = tpu.concatenate %177, %178, %179, %180 in 1 : vector<16x8xf32>, vector<16x8xf32>, vector<16x8xf32>, vector<16x8xf32> -> vector<16x32xf32>
    %cst_72 = arith.constant dense<0.000000e+00> : vector<16x32xf32>
    %182 = tpu.matmul %181, %146, %cst_72 {dimension_numbers = #tpu.dot_dimension_numbers<[1], [0], [0], [1], [0, 0, 1, 1], [], []>} : vector<16x32xf32>, vector<32x32xf32>, vector<16x32xf32> -> vector<16x32xf32>
    %183 = vector.broadcast %147 : vector<1x32xf32> to vector<16x32xf32>
    %184 = arith.addf %182, %183 : vector<16x32xf32>
    %185 = arith.addf %130, %184 : vector<16x32xf32>
    %186 = vector.extract_strided_slice %35 {offsets = [2, 0], sizes = [1, 32], strides = [1, 1]} : vector<8x32xf32> to vector<1x32xf32>
    %187 = vector.extract_strided_slice %36 {offsets = [2, 0], sizes = [1, 32], strides = [1, 1]} : vector<8x32xf32> to vector<1x32xf32>
    %cst_73 = arith.constant dense<0.000000e+00> : vector<16xf32>
    %188 = vector.multi_reduction <add>, %185, %cst_73 [1] : vector<16x32xf32> to vector<16xf32>
    %189 = vector.shape_cast %188 : vector<16xf32> to vector<16x1xf32>
    %cst_74 = arith.constant 3.200000e+01 : f32
    %190 = vector.broadcast %cst_74 : f32 to vector<16x1xf32>
    %191 = arith.divf %189, %190 : vector<16x1xf32>
    %192 = vector.broadcast %191 : vector<16x1xf32> to vector<16x32xf32>
    %193 = arith.subf %185, %192 : vector<16x32xf32>
    %194 = arith.mulf %193, %193 : vector<16x32xf32>
    %cst_75 = arith.constant dense<0.000000e+00> : vector<16xf32>
    %195 = vector.multi_reduction <add>, %194, %cst_75 [1] : vector<16x32xf32> to vector<16xf32>
    %196 = vector.shape_cast %195 : vector<16xf32> to vector<16x1xf32>
    %cst_76 = arith.constant 3.200000e+01 : f32
    %197 = vector.broadcast %cst_76 : f32 to vector<16x1xf32>
    %198 = arith.divf %196, %197 : vector<16x1xf32>
    %cst_77 = arith.constant 9.99999974E-6 : f32
    %199 = vector.broadcast %cst_77 : f32 to vector<16x1xf32>
    %200 = arith.addf %198, %199 : vector<16x1xf32>
    %201 = math.rsqrt %200 : vector<16x1xf32>
    %202 = vector.broadcast %201 : vector<16x1xf32> to vector<16x32xf32>
    %203 = arith.mulf %193, %202 : vector<16x32xf32>
    %204 = vector.broadcast %186 : vector<1x32xf32> to vector<16x32xf32>
    %205 = arith.mulf %203, %204 : vector<16x32xf32>
    %206 = vector.broadcast %187 : vector<1x32xf32> to vector<16x32xf32>
    %207 = arith.addf %205, %206 : vector<16x32xf32>
    %c0_78 = arith.constant 0 : index
    %c0_79 = arith.constant 0 : index
    %c0_80 = arith.constant 0 : index
    %208 = vector.load %arg16[%c0_78, %c0_79, %c0_80] : memref<2x32x64xf32, #tpu.memory_space<vmem>>, vector<1x32x64xf32>
    %209 = vector.shape_cast %208 : vector<1x32x64xf32> to vector<32x64xf32>
    %cst_81 = arith.constant dense<0.000000e+00> : vector<16x64xf32>
    %210 = tpu.matmul %207, %209, %cst_81 {dimension_numbers = #tpu.dot_dimension_numbers<[1], [0], [0], [1], [0, 0, 1, 1], [], []>} : vector<16x32xf32>, vector<32x64xf32>, vector<16x64xf32> -> vector<16x64xf32>
    %211 = vector.extract_strided_slice %33 {offsets = [0, 0], sizes = [1, 64], strides = [1, 1]} : vector<2x64xf32> to vector<1x64xf32>
    %212 = vector.broadcast %211 : vector<1x64xf32> to vector<16x64xf32>
    %213 = arith.addf %210, %212 : vector<16x64xf32>
    %cst_82 = arith.constant 0.000000e+00 : f32
    %214 = vector.broadcast %cst_82 : f32 to vector<16x64xf32>
    %215 = arith.maximumf %213, %214 : vector<16x64xf32>
    %c0_83 = arith.constant 0 : index
    %c0_84 = arith.constant 0 : index
    %c0_85 = arith.constant 0 : index
    %216 = vector.load %arg18[%c0_83, %c0_84, %c0_85] : memref<2x64x32xf32, #tpu.memory_space<vmem>>, vector<1x64x32xf32>
    %217 = vector.shape_cast %216 : vector<1x64x32xf32> to vector<64x32xf32>
    %cst_86 = arith.constant dense<0.000000e+00> : vector<16x32xf32>
    %218 = tpu.matmul %215, %217, %cst_86 {dimension_numbers = #tpu.dot_dimension_numbers<[1], [0], [0], [1], [0, 0, 1, 1], [], []>} : vector<16x64xf32>, vector<64x32xf32>, vector<16x32xf32> -> vector<16x32xf32>
    %219 = vector.extract_strided_slice %34 {offsets = [0, 0], sizes = [1, 32], strides = [1, 1]} : vector<2x32xf32> to vector<1x32xf32>
    %220 = vector.broadcast %219 : vector<1x32xf32> to vector<16x32xf32>
    %221 = arith.addf %218, %220 : vector<16x32xf32>
    %222 = arith.addf %207, %221 : vector<16x32xf32>
    %223 = vector.extract_strided_slice %35 {offsets = [3, 0], sizes = [1, 32], strides = [1, 1]} : vector<8x32xf32> to vector<1x32xf32>
    %224 = vector.extract_strided_slice %36 {offsets = [3, 0], sizes = [1, 32], strides = [1, 1]} : vector<8x32xf32> to vector<1x32xf32>
    %cst_87 = arith.constant dense<0.000000e+00> : vector<16xf32>
    %225 = vector.multi_reduction <add>, %222, %cst_87 [1] : vector<16x32xf32> to vector<16xf32>
    %226 = vector.shape_cast %225 : vector<16xf32> to vector<16x1xf32>
    %cst_88 = arith.constant 3.200000e+01 : f32
    %227 = vector.broadcast %cst_88 : f32 to vector<16x1xf32>
    %228 = arith.divf %226, %227 : vector<16x1xf32>
    %229 = vector.broadcast %228 : vector<16x1xf32> to vector<16x32xf32>
    %230 = arith.subf %222, %229 : vector<16x32xf32>
    %231 = arith.mulf %230, %230 : vector<16x32xf32>
    %cst_89 = arith.constant dense<0.000000e+00> : vector<16xf32>
    %232 = vector.multi_reduction <add>, %231, %cst_89 [1] : vector<16x32xf32> to vector<16xf32>
    %233 = vector.shape_cast %232 : vector<16xf32> to vector<16x1xf32>
    %cst_90 = arith.constant 3.200000e+01 : f32
    %234 = vector.broadcast %cst_90 : f32 to vector<16x1xf32>
    %235 = arith.divf %233, %234 : vector<16x1xf32>
    %cst_91 = arith.constant 9.99999974E-6 : f32
    %236 = vector.broadcast %cst_91 : f32 to vector<16x1xf32>
    %237 = arith.addf %235, %236 : vector<16x1xf32>
    %238 = math.rsqrt %237 : vector<16x1xf32>
    %239 = vector.broadcast %238 : vector<16x1xf32> to vector<16x32xf32>
    %240 = arith.mulf %230, %239 : vector<16x32xf32>
    %241 = vector.broadcast %223 : vector<1x32xf32> to vector<16x32xf32>
    %242 = arith.mulf %240, %241 : vector<16x32xf32>
    %243 = vector.broadcast %224 : vector<1x32xf32> to vector<16x32xf32>
    %244 = arith.addf %242, %243 : vector<16x32xf32>
    %c1 = arith.constant 1 : index
    %c0_92 = arith.constant 0 : index
    %c0_93 = arith.constant 0 : index
    %245 = vector.load %arg6[%c1, %c0_92, %c0_93] : memref<2x32x96xf32, #tpu.memory_space<vmem>>, vector<1x32x96xf32>
    %246 = vector.shape_cast %245 : vector<1x32x96xf32> to vector<32x96xf32>
    %cst_94 = arith.constant dense<0.000000e+00> : vector<16x96xf32>
    %247 = tpu.matmul %244, %246, %cst_94 {dimension_numbers = #tpu.dot_dimension_numbers<[1], [0], [0], [1], [0, 0, 1, 1], [], []>} : vector<16x32xf32>, vector<32x96xf32>, vector<16x96xf32> -> vector<16x96xf32>
    %248 = vector.extract_strided_slice %28 {offsets = [1, 0], sizes = [1, 96], strides = [1, 1]} : vector<2x96xf32> to vector<1x96xf32>
    %249 = vector.broadcast %248 : vector<1x96xf32> to vector<16x96xf32>
    %250 = arith.addf %247, %249 : vector<16x96xf32>
    %251 = vector.extract_strided_slice %250 {offsets = [0, 0], sizes = [16, 32], strides = [1, 1]} : vector<16x96xf32> to vector<16x32xf32>
    %252 = vector.extract_strided_slice %250 {offsets = [0, 32], sizes = [16, 32], strides = [1, 1]} : vector<16x96xf32> to vector<16x32xf32>
    %253 = vector.extract_strided_slice %250 {offsets = [0, 64], sizes = [16, 32], strides = [1, 1]} : vector<16x96xf32> to vector<16x32xf32>
    %c1_95 = arith.constant 1 : index
    %c0_96 = arith.constant 0 : index
    %c0_97 = arith.constant 0 : index
    %254 = vector.load %arg8[%c1_95, %c0_96, %c0_97] : memref<2x32x32xf32, #tpu.memory_space<vmem>>, vector<1x32x32xf32>
    %255 = vector.shape_cast %254 : vector<1x32x32xf32> to vector<32x32xf32>
    %256 = vector.extract_strided_slice %29 {offsets = [1, 0], sizes = [1, 32], strides = [1, 1]} : vector<2x32xf32> to vector<1x32xf32>
    %cst_98 = arith.constant 0.353553385 : f32
    %257 = vector.broadcast %cst_98 : f32 to vector<16x32xf32>
    %258 = arith.mulf %251, %257 : vector<16x32xf32>
    %259 = vector.extract_strided_slice %258 {offsets = [0, 0], sizes = [16, 8], strides = [1, 1]} : vector<16x32xf32> to vector<16x8xf32>
    %260 = vector.extract_strided_slice %258 {offsets = [0, 8], sizes = [16, 8], strides = [1, 1]} : vector<16x32xf32> to vector<16x8xf32>
    %261 = vector.extract_strided_slice %258 {offsets = [0, 16], sizes = [16, 8], strides = [1, 1]} : vector<16x32xf32> to vector<16x8xf32>
    %262 = vector.extract_strided_slice %258 {offsets = [0, 24], sizes = [16, 8], strides = [1, 1]} : vector<16x32xf32> to vector<16x8xf32>
    %263 = tpu.concatenate %259, %260, %261, %262 in 0 : vector<16x8xf32>, vector<16x8xf32>, vector<16x8xf32>, vector<16x8xf32> -> vector<64x8xf32>
    %264 = vector.extract_strided_slice %252 {offsets = [0, 0], sizes = [16, 8], strides = [1, 1]} : vector<16x32xf32> to vector<16x8xf32>
    %265 = vector.extract_strided_slice %252 {offsets = [0, 8], sizes = [16, 8], strides = [1, 1]} : vector<16x32xf32> to vector<16x8xf32>
    %266 = vector.extract_strided_slice %252 {offsets = [0, 16], sizes = [16, 8], strides = [1, 1]} : vector<16x32xf32> to vector<16x8xf32>
    %267 = vector.extract_strided_slice %252 {offsets = [0, 24], sizes = [16, 8], strides = [1, 1]} : vector<16x32xf32> to vector<16x8xf32>
    %268 = tpu.concatenate %264, %265, %266, %267 in 0 : vector<16x8xf32>, vector<16x8xf32>, vector<16x8xf32>, vector<16x8xf32> -> vector<64x8xf32>
    %269 = vector.extract_strided_slice %253 {offsets = [0, 0], sizes = [16, 8], strides = [1, 1]} : vector<16x32xf32> to vector<16x8xf32>
    %270 = vector.extract_strided_slice %253 {offsets = [0, 8], sizes = [16, 8], strides = [1, 1]} : vector<16x32xf32> to vector<16x8xf32>
    %271 = vector.extract_strided_slice %253 {offsets = [0, 16], sizes = [16, 8], strides = [1, 1]} : vector<16x32xf32> to vector<16x8xf32>
    %272 = vector.extract_strided_slice %253 {offsets = [0, 24], sizes = [16, 8], strides = [1, 1]} : vector<16x32xf32> to vector<16x8xf32>
    %273 = tpu.concatenate %269, %270, %271, %272 in 0 : vector<16x8xf32>, vector<16x8xf32>, vector<16x8xf32>, vector<16x8xf32> -> vector<64x8xf32>
    %cst_99 = arith.constant dense<0.000000e+00> : vector<64x64xf32>
    %274 = tpu.matmul %263, %268, %cst_99 {dimension_numbers = #tpu.dot_dimension_numbers<[1], [1], [0], [0], [0, 0, 1, 0], [], []>} : vector<64x8xf32>, vector<64x8xf32>, vector<64x64xf32> -> vector<64x64xf32>
    %275 = arith.addf %274, %14 : vector<64x64xf32>
    %cst_100 = arith.constant dense<0xFF800000> : vector<64xf32>
    %276 = vector.multi_reduction <maximumf>, %275, %cst_100 [1] : vector<64x64xf32> to vector<64xf32>
    %277 = vector.shape_cast %276 : vector<64xf32> to vector<64x1xf32>
    %278 = vector.broadcast %277 : vector<64x1xf32> to vector<64x64xf32>
    %279 = arith.subf %275, %278 : vector<64x64xf32>
    %280 = math.exp %279 : vector<64x64xf32>
    %cst_101 = arith.constant dense<0.000000e+00> : vector<64xf32>
    %281 = vector.multi_reduction <add>, %280, %cst_101 [1] : vector<64x64xf32> to vector<64xf32>
    %282 = vector.shape_cast %281 : vector<64xf32> to vector<64x1xf32>
    %283 = vector.broadcast %282 : vector<64x1xf32> to vector<64x64xf32>
    %284 = arith.divf %280, %283 : vector<64x64xf32>
    %cst_102 = arith.constant dense<0.000000e+00> : vector<64x8xf32>
    %285 = tpu.matmul %284, %273, %cst_102 {dimension_numbers = #tpu.dot_dimension_numbers<[1], [0], [0], [1], [0, 0, 1, 1], [], []>} : vector<64x64xf32>, vector<64x8xf32>, vector<64x8xf32> -> vector<64x8xf32>
    %286 = vector.extract_strided_slice %285 {offsets = [0, 0], sizes = [16, 8], strides = [1, 1]} : vector<64x8xf32> to vector<16x8xf32>
    %287 = vector.extract_strided_slice %285 {offsets = [16, 0], sizes = [16, 8], strides = [1, 1]} : vector<64x8xf32> to vector<16x8xf32>
    %288 = vector.extract_strided_slice %285 {offsets = [32, 0], sizes = [16, 8], strides = [1, 1]} : vector<64x8xf32> to vector<16x8xf32>
    %289 = vector.extract_strided_slice %285 {offsets = [48, 0], sizes = [16, 8], strides = [1, 1]} : vector<64x8xf32> to vector<16x8xf32>
    %290 = tpu.concatenate %286, %287, %288, %289 in 1 : vector<16x8xf32>, vector<16x8xf32>, vector<16x8xf32>, vector<16x8xf32> -> vector<16x32xf32>
    %cst_103 = arith.constant dense<0.000000e+00> : vector<16x32xf32>
    %291 = tpu.matmul %290, %255, %cst_103 {dimension_numbers = #tpu.dot_dimension_numbers<[1], [0], [0], [1], [0, 0, 1, 1], [], []>} : vector<16x32xf32>, vector<32x32xf32>, vector<16x32xf32> -> vector<16x32xf32>
    %292 = vector.broadcast %256 : vector<1x32xf32> to vector<16x32xf32>
    %293 = arith.addf %291, %292 : vector<16x32xf32>
    %294 = arith.addf %244, %293 : vector<16x32xf32>
    %295 = vector.extract_strided_slice %35 {offsets = [4, 0], sizes = [1, 32], strides = [1, 1]} : vector<8x32xf32> to vector<1x32xf32>
    %296 = vector.extract_strided_slice %36 {offsets = [4, 0], sizes = [1, 32], strides = [1, 1]} : vector<8x32xf32> to vector<1x32xf32>
    %cst_104 = arith.constant dense<0.000000e+00> : vector<16xf32>
    %297 = vector.multi_reduction <add>, %294, %cst_104 [1] : vector<16x32xf32> to vector<16xf32>
    %298 = vector.shape_cast %297 : vector<16xf32> to vector<16x1xf32>
    %cst_105 = arith.constant 3.200000e+01 : f32
    %299 = vector.broadcast %cst_105 : f32 to vector<16x1xf32>
    %300 = arith.divf %298, %299 : vector<16x1xf32>
    %301 = vector.broadcast %300 : vector<16x1xf32> to vector<16x32xf32>
    %302 = arith.subf %294, %301 : vector<16x32xf32>
    %303 = arith.mulf %302, %302 : vector<16x32xf32>
    %cst_106 = arith.constant dense<0.000000e+00> : vector<16xf32>
    %304 = vector.multi_reduction <add>, %303, %cst_106 [1] : vector<16x32xf32> to vector<16xf32>
    %305 = vector.shape_cast %304 : vector<16xf32> to vector<16x1xf32>
    %cst_107 = arith.constant 3.200000e+01 : f32
    %306 = vector.broadcast %cst_107 : f32 to vector<16x1xf32>
    %307 = arith.divf %305, %306 : vector<16x1xf32>
    %cst_108 = arith.constant 9.99999974E-6 : f32
    %308 = vector.broadcast %cst_108 : f32 to vector<16x1xf32>
    %309 = arith.addf %307, %308 : vector<16x1xf32>
    %310 = math.rsqrt %309 : vector<16x1xf32>
    %311 = vector.broadcast %310 : vector<16x1xf32> to vector<16x32xf32>
    %312 = arith.mulf %302, %311 : vector<16x32xf32>
    %313 = vector.broadcast %295 : vector<1x32xf32> to vector<16x32xf32>
    %314 = arith.mulf %312, %313 : vector<16x32xf32>
    %315 = vector.broadcast %296 : vector<1x32xf32> to vector<16x32xf32>
    %316 = arith.addf %314, %315 : vector<16x32xf32>
    %c1_109 = arith.constant 1 : index
    %c0_110 = arith.constant 0 : index
    %c0_111 = arith.constant 0 : index
    %317 = vector.load %arg10[%c1_109, %c0_110, %c0_111] : memref<2x32x32xf32, #tpu.memory_space<vmem>>, vector<1x32x32xf32>
    %318 = vector.shape_cast %317 : vector<1x32x32xf32> to vector<32x32xf32>
    %cst_112 = arith.constant dense<0.000000e+00> : vector<16x32xf32>
    %319 = tpu.matmul %316, %318, %cst_112 {dimension_numbers = #tpu.dot_dimension_numbers<[1], [0], [0], [1], [0, 0, 1, 1], [], []>} : vector<16x32xf32>, vector<32x32xf32>, vector<16x32xf32> -> vector<16x32xf32>
    %320 = vector.extract_strided_slice %30 {offsets = [1, 0], sizes = [1, 32], strides = [1, 1]} : vector<2x32xf32> to vector<1x32xf32>
    %321 = vector.broadcast %320 : vector<1x32xf32> to vector<16x32xf32>
    %322 = arith.addf %319, %321 : vector<16x32xf32>
    %c1_113 = arith.constant 1 : index
    %c0_114 = arith.constant 0 : index
    %c0_115 = arith.constant 0 : index
    %323 = vector.load %arg12[%c1_113, %c0_114, %c0_115] : memref<2x32x64xf32, #tpu.memory_space<vmem>>, vector<1x32x64xf32>
    %324 = vector.shape_cast %323 : vector<1x32x64xf32> to vector<32x64xf32>
    %cst_116 = arith.constant dense<0.000000e+00> : vector<16x64xf32>
    %325 = tpu.matmul %1, %324, %cst_116 {dimension_numbers = #tpu.dot_dimension_numbers<[1], [0], [0], [1], [0, 0, 1, 1], [], []>} : vector<16x32xf32>, vector<32x64xf32>, vector<16x64xf32> -> vector<16x64xf32>
    %326 = vector.extract_strided_slice %31 {offsets = [1, 0], sizes = [1, 64], strides = [1, 1]} : vector<2x64xf32> to vector<1x64xf32>
    %327 = vector.broadcast %326 : vector<1x64xf32> to vector<16x64xf32>
    %328 = arith.addf %325, %327 : vector<16x64xf32>
    %329 = vector.extract_strided_slice %328 {offsets = [0, 0], sizes = [16, 32], strides = [1, 1]} : vector<16x64xf32> to vector<16x32xf32>
    %330 = vector.extract_strided_slice %328 {offsets = [0, 32], sizes = [16, 32], strides = [1, 1]} : vector<16x64xf32> to vector<16x32xf32>
    %c1_117 = arith.constant 1 : index
    %c0_118 = arith.constant 0 : index
    %c0_119 = arith.constant 0 : index
    %331 = vector.load %arg14[%c1_117, %c0_118, %c0_119] : memref<2x32x32xf32, #tpu.memory_space<vmem>>, vector<1x32x32xf32>
    %332 = vector.shape_cast %331 : vector<1x32x32xf32> to vector<32x32xf32>
    %333 = vector.extract_strided_slice %32 {offsets = [1, 0], sizes = [1, 32], strides = [1, 1]} : vector<2x32xf32> to vector<1x32xf32>
    %cst_120 = arith.constant 0.353553385 : f32
    %334 = vector.broadcast %cst_120 : f32 to vector<16x32xf32>
    %335 = arith.mulf %322, %334 : vector<16x32xf32>
    %336 = vector.extract_strided_slice %335 {offsets = [0, 0], sizes = [16, 8], strides = [1, 1]} : vector<16x32xf32> to vector<16x8xf32>
    %337 = vector.extract_strided_slice %335 {offsets = [0, 8], sizes = [16, 8], strides = [1, 1]} : vector<16x32xf32> to vector<16x8xf32>
    %338 = vector.extract_strided_slice %335 {offsets = [0, 16], sizes = [16, 8], strides = [1, 1]} : vector<16x32xf32> to vector<16x8xf32>
    %339 = vector.extract_strided_slice %335 {offsets = [0, 24], sizes = [16, 8], strides = [1, 1]} : vector<16x32xf32> to vector<16x8xf32>
    %340 = tpu.concatenate %336, %337, %338, %339 in 0 : vector<16x8xf32>, vector<16x8xf32>, vector<16x8xf32>, vector<16x8xf32> -> vector<64x8xf32>
    %341 = vector.extract_strided_slice %329 {offsets = [0, 0], sizes = [16, 8], strides = [1, 1]} : vector<16x32xf32> to vector<16x8xf32>
    %342 = vector.extract_strided_slice %329 {offsets = [0, 8], sizes = [16, 8], strides = [1, 1]} : vector<16x32xf32> to vector<16x8xf32>
    %343 = vector.extract_strided_slice %329 {offsets = [0, 16], sizes = [16, 8], strides = [1, 1]} : vector<16x32xf32> to vector<16x8xf32>
    %344 = vector.extract_strided_slice %329 {offsets = [0, 24], sizes = [16, 8], strides = [1, 1]} : vector<16x32xf32> to vector<16x8xf32>
    %345 = tpu.concatenate %341, %342, %343, %344 in 0 : vector<16x8xf32>, vector<16x8xf32>, vector<16x8xf32>, vector<16x8xf32> -> vector<64x8xf32>
    %346 = vector.extract_strided_slice %330 {offsets = [0, 0], sizes = [16, 8], strides = [1, 1]} : vector<16x32xf32> to vector<16x8xf32>
    %347 = vector.extract_strided_slice %330 {offsets = [0, 8], sizes = [16, 8], strides = [1, 1]} : vector<16x32xf32> to vector<16x8xf32>
    %348 = vector.extract_strided_slice %330 {offsets = [0, 16], sizes = [16, 8], strides = [1, 1]} : vector<16x32xf32> to vector<16x8xf32>
    %349 = vector.extract_strided_slice %330 {offsets = [0, 24], sizes = [16, 8], strides = [1, 1]} : vector<16x32xf32> to vector<16x8xf32>
    %350 = tpu.concatenate %346, %347, %348, %349 in 0 : vector<16x8xf32>, vector<16x8xf32>, vector<16x8xf32>, vector<16x8xf32> -> vector<64x8xf32>
    %cst_121 = arith.constant dense<0.000000e+00> : vector<64x64xf32>
    %351 = tpu.matmul %340, %345, %cst_121 {dimension_numbers = #tpu.dot_dimension_numbers<[1], [1], [0], [0], [0, 0, 1, 0], [], []>} : vector<64x8xf32>, vector<64x8xf32>, vector<64x64xf32> -> vector<64x64xf32>
    %352 = arith.addf %351, %27 : vector<64x64xf32>
    %cst_122 = arith.constant dense<0xFF800000> : vector<64xf32>
    %353 = vector.multi_reduction <maximumf>, %352, %cst_122 [1] : vector<64x64xf32> to vector<64xf32>
    %354 = vector.shape_cast %353 : vector<64xf32> to vector<64x1xf32>
    %355 = vector.broadcast %354 : vector<64x1xf32> to vector<64x64xf32>
    %356 = arith.subf %352, %355 : vector<64x64xf32>
    %357 = math.exp %356 : vector<64x64xf32>
    %cst_123 = arith.constant dense<0.000000e+00> : vector<64xf32>
    %358 = vector.multi_reduction <add>, %357, %cst_123 [1] : vector<64x64xf32> to vector<64xf32>
    %359 = vector.shape_cast %358 : vector<64xf32> to vector<64x1xf32>
    %360 = vector.broadcast %359 : vector<64x1xf32> to vector<64x64xf32>
    %361 = arith.divf %357, %360 : vector<64x64xf32>
    %cst_124 = arith.constant dense<0.000000e+00> : vector<64x8xf32>
    %362 = tpu.matmul %361, %350, %cst_124 {dimension_numbers = #tpu.dot_dimension_numbers<[1], [0], [0], [1], [0, 0, 1, 1], [], []>} : vector<64x64xf32>, vector<64x8xf32>, vector<64x8xf32> -> vector<64x8xf32>
    %363 = vector.extract_strided_slice %362 {offsets = [0, 0], sizes = [16, 8], strides = [1, 1]} : vector<64x8xf32> to vector<16x8xf32>
    %364 = vector.extract_strided_slice %362 {offsets = [16, 0], sizes = [16, 8], strides = [1, 1]} : vector<64x8xf32> to vector<16x8xf32>
    %365 = vector.extract_strided_slice %362 {offsets = [32, 0], sizes = [16, 8], strides = [1, 1]} : vector<64x8xf32> to vector<16x8xf32>
    %366 = vector.extract_strided_slice %362 {offsets = [48, 0], sizes = [16, 8], strides = [1, 1]} : vector<64x8xf32> to vector<16x8xf32>
    %367 = tpu.concatenate %363, %364, %365, %366 in 1 : vector<16x8xf32>, vector<16x8xf32>, vector<16x8xf32>, vector<16x8xf32> -> vector<16x32xf32>
    %cst_125 = arith.constant dense<0.000000e+00> : vector<16x32xf32>
    %368 = tpu.matmul %367, %332, %cst_125 {dimension_numbers = #tpu.dot_dimension_numbers<[1], [0], [0], [1], [0, 0, 1, 1], [], []>} : vector<16x32xf32>, vector<32x32xf32>, vector<16x32xf32> -> vector<16x32xf32>
    %369 = vector.broadcast %333 : vector<1x32xf32> to vector<16x32xf32>
    %370 = arith.addf %368, %369 : vector<16x32xf32>
    %371 = arith.addf %316, %370 : vector<16x32xf32>
    %372 = vector.extract_strided_slice %35 {offsets = [5, 0], sizes = [1, 32], strides = [1, 1]} : vector<8x32xf32> to vector<1x32xf32>
    %373 = vector.extract_strided_slice %36 {offsets = [5, 0], sizes = [1, 32], strides = [1, 1]} : vector<8x32xf32> to vector<1x32xf32>
    %cst_126 = arith.constant dense<0.000000e+00> : vector<16xf32>
    %374 = vector.multi_reduction <add>, %371, %cst_126 [1] : vector<16x32xf32> to vector<16xf32>
    %375 = vector.shape_cast %374 : vector<16xf32> to vector<16x1xf32>
    %cst_127 = arith.constant 3.200000e+01 : f32
    %376 = vector.broadcast %cst_127 : f32 to vector<16x1xf32>
    %377 = arith.divf %375, %376 : vector<16x1xf32>
    %378 = vector.broadcast %377 : vector<16x1xf32> to vector<16x32xf32>
    %379 = arith.subf %371, %378 : vector<16x32xf32>
    %380 = arith.mulf %379, %379 : vector<16x32xf32>
    %cst_128 = arith.constant dense<0.000000e+00> : vector<16xf32>
    %381 = vector.multi_reduction <add>, %380, %cst_128 [1] : vector<16x32xf32> to vector<16xf32>
    %382 = vector.shape_cast %381 : vector<16xf32> to vector<16x1xf32>
    %cst_129 = arith.constant 3.200000e+01 : f32
    %383 = vector.broadcast %cst_129 : f32 to vector<16x1xf32>
    %384 = arith.divf %382, %383 : vector<16x1xf32>
    %cst_130 = arith.constant 9.99999974E-6 : f32
    %385 = vector.broadcast %cst_130 : f32 to vector<16x1xf32>
    %386 = arith.addf %384, %385 : vector<16x1xf32>
    %387 = math.rsqrt %386 : vector<16x1xf32>
    %388 = vector.broadcast %387 : vector<16x1xf32> to vector<16x32xf32>
    %389 = arith.mulf %379, %388 : vector<16x32xf32>
    %390 = vector.broadcast %372 : vector<1x32xf32> to vector<16x32xf32>
    %391 = arith.mulf %389, %390 : vector<16x32xf32>
    %392 = vector.broadcast %373 : vector<1x32xf32> to vector<16x32xf32>
    %393 = arith.addf %391, %392 : vector<16x32xf32>
    %c1_131 = arith.constant 1 : index
    %c0_132 = arith.constant 0 : index
    %c0_133 = arith.constant 0 : index
    %394 = vector.load %arg16[%c1_131, %c0_132, %c0_133] : memref<2x32x64xf32, #tpu.memory_space<vmem>>, vector<1x32x64xf32>
    %395 = vector.shape_cast %394 : vector<1x32x64xf32> to vector<32x64xf32>
    %cst_134 = arith.constant dense<0.000000e+00> : vector<16x64xf32>
    %396 = tpu.matmul %393, %395, %cst_134 {dimension_numbers = #tpu.dot_dimension_numbers<[1], [0], [0], [1], [0, 0, 1, 1], [], []>} : vector<16x32xf32>, vector<32x64xf32>, vector<16x64xf32> -> vector<16x64xf32>
    %397 = vector.extract_strided_slice %33 {offsets = [1, 0], sizes = [1, 64], strides = [1, 1]} : vector<2x64xf32> to vector<1x64xf32>
    %398 = vector.broadcast %397 : vector<1x64xf32> to vector<16x64xf32>
    %399 = arith.addf %396, %398 : vector<16x64xf32>
    %cst_135 = arith.constant 0.000000e+00 : f32
    %400 = vector.broadcast %cst_135 : f32 to vector<16x64xf32>
    %401 = arith.maximumf %399, %400 : vector<16x64xf32>
    %c1_136 = arith.constant 1 : index
    %c0_137 = arith.constant 0 : index
    %c0_138 = arith.constant 0 : index
    %402 = vector.load %arg18[%c1_136, %c0_137, %c0_138] : memref<2x64x32xf32, #tpu.memory_space<vmem>>, vector<1x64x32xf32>
    %403 = vector.shape_cast %402 : vector<1x64x32xf32> to vector<64x32xf32>
    %cst_139 = arith.constant dense<0.000000e+00> : vector<16x32xf32>
    %404 = tpu.matmul %401, %403, %cst_139 {dimension_numbers = #tpu.dot_dimension_numbers<[1], [0], [0], [1], [0, 0, 1, 1], [], []>} : vector<16x64xf32>, vector<64x32xf32>, vector<16x32xf32> -> vector<16x32xf32>
    %405 = vector.extract_strided_slice %34 {offsets = [1, 0], sizes = [1, 32], strides = [1, 1]} : vector<2x32xf32> to vector<1x32xf32>
    %406 = vector.broadcast %405 : vector<1x32xf32> to vector<16x32xf32>
    %407 = arith.addf %404, %406 : vector<16x32xf32>
    %408 = arith.addf %393, %407 : vector<16x32xf32>
    %409 = vector.extract_strided_slice %35 {offsets = [6, 0], sizes = [1, 32], strides = [1, 1]} : vector<8x32xf32> to vector<1x32xf32>
    %410 = vector.extract_strided_slice %36 {offsets = [6, 0], sizes = [1, 32], strides = [1, 1]} : vector<8x32xf32> to vector<1x32xf32>
    %cst_140 = arith.constant dense<0.000000e+00> : vector<16xf32>
    %411 = vector.multi_reduction <add>, %408, %cst_140 [1] : vector<16x32xf32> to vector<16xf32>
    %412 = vector.shape_cast %411 : vector<16xf32> to vector<16x1xf32>
    %cst_141 = arith.constant 3.200000e+01 : f32
    %413 = vector.broadcast %cst_141 : f32 to vector<16x1xf32>
    %414 = arith.divf %412, %413 : vector<16x1xf32>
    %415 = vector.broadcast %414 : vector<16x1xf32> to vector<16x32xf32>
    %416 = arith.subf %408, %415 : vector<16x32xf32>
    %417 = arith.mulf %416, %416 : vector<16x32xf32>
    %cst_142 = arith.constant dense<0.000000e+00> : vector<16xf32>
    %418 = vector.multi_reduction <add>, %417, %cst_142 [1] : vector<16x32xf32> to vector<16xf32>
    %419 = vector.shape_cast %418 : vector<16xf32> to vector<16x1xf32>
    %cst_143 = arith.constant 3.200000e+01 : f32
    %420 = vector.broadcast %cst_143 : f32 to vector<16x1xf32>
    %421 = arith.divf %419, %420 : vector<16x1xf32>
    %cst_144 = arith.constant 9.99999974E-6 : f32
    %422 = vector.broadcast %cst_144 : f32 to vector<16x1xf32>
    %423 = arith.addf %421, %422 : vector<16x1xf32>
    %424 = math.rsqrt %423 : vector<16x1xf32>
    %425 = vector.broadcast %424 : vector<16x1xf32> to vector<16x32xf32>
    %426 = arith.mulf %416, %425 : vector<16x32xf32>
    %427 = vector.broadcast %409 : vector<1x32xf32> to vector<16x32xf32>
    %428 = arith.mulf %426, %427 : vector<16x32xf32>
    %429 = vector.broadcast %410 : vector<1x32xf32> to vector<16x32xf32>
    %430 = arith.addf %428, %429 : vector<16x32xf32>
    %431 = vector.extract_strided_slice %35 {offsets = [7, 0], sizes = [1, 32], strides = [1, 1]} : vector<8x32xf32> to vector<1x32xf32>
    %432 = vector.extract_strided_slice %36 {offsets = [7, 0], sizes = [1, 32], strides = [1, 1]} : vector<8x32xf32> to vector<1x32xf32>
    %cst_145 = arith.constant dense<0.000000e+00> : vector<16xf32>
    %433 = vector.multi_reduction <add>, %430, %cst_145 [1] : vector<16x32xf32> to vector<16xf32>
    %434 = vector.shape_cast %433 : vector<16xf32> to vector<16x1xf32>
    %cst_146 = arith.constant 3.200000e+01 : f32
    %435 = vector.broadcast %cst_146 : f32 to vector<16x1xf32>
    %436 = arith.divf %434, %435 : vector<16x1xf32>
    %437 = vector.broadcast %436 : vector<16x1xf32> to vector<16x32xf32>
    %438 = arith.subf %430, %437 : vector<16x32xf32>
    %439 = arith.mulf %438, %438 : vector<16x32xf32>
    %cst_147 = arith.constant dense<0.000000e+00> : vector<16xf32>
    %440 = vector.multi_reduction <add>, %439, %cst_147 [1] : vector<16x32xf32> to vector<16xf32>
    %441 = vector.shape_cast %440 : vector<16xf32> to vector<16x1xf32>
    %cst_148 = arith.constant 3.200000e+01 : f32
    %442 = vector.broadcast %cst_148 : f32 to vector<16x1xf32>
    %443 = arith.divf %441, %442 : vector<16x1xf32>
    %cst_149 = arith.constant 9.99999974E-6 : f32
    %444 = vector.broadcast %cst_149 : f32 to vector<16x1xf32>
    %445 = arith.addf %443, %444 : vector<16x1xf32>
    %446 = math.rsqrt %445 : vector<16x1xf32>
    %447 = vector.broadcast %446 : vector<16x1xf32> to vector<16x32xf32>
    %448 = arith.mulf %438, %447 : vector<16x32xf32>
    %449 = vector.broadcast %431 : vector<1x32xf32> to vector<16x32xf32>
    %450 = arith.mulf %448, %449 : vector<16x32xf32>
    %451 = vector.broadcast %432 : vector<1x32xf32> to vector<16x32xf32>
    %452 = arith.addf %450, %451 : vector<16x32xf32>
    %c0_150 = arith.constant 0 : index
    %c0_151 = arith.constant 0 : index
    %453 = vector.load %arg22[%c0_150, %c0_151] : memref<16x32xf32, #tpu.memory_space<vmem>>, vector<16x32xf32>
    tpu.vector_store %arg22[%c0_150, %c0_151], %452 {strides = array<i32>} : memref<16x32xf32, #tpu.memory_space<vmem>>, vector<16x32xf32>,
    return
  }
}

</mosaic_0001>

<bundles_post_ra>
// kernel: transformer_node_decoder.1
= control target key start
LH: loop header
LB: loop body
LE: loop exit
PB: predicated region body
PF: predicated region fallthrough
CT: control target
= control target key end

     0   :  { %s6030_s0 = inlined_call_operand.vmem [shape: f32[16,32], index: 0, kind: input, shape index: {}]   ;;  %s6031_s1 = inlined_call_operand.vmem [shape: f32[16,32], index: 1, kind: input, shape index: {}]   ;;  %s6032_s2 = inlined_call_operand.vmem [shape: s32[2,8], index: 2, kind: input, shape index: {}]   ;;  %s6033_s3 = inlined_call_operand.vmem [shape: s32[2,8], index: 3, kind: input, shape index: {}]   ;;  %s6034_s4 = inlined_call_operand.vmem [shape: f32[64,64], index: 4, kind: input, shape index: {}, may-alias: {4,5}]   ;;  %s6035_s5 = inlined_call_operand.vmem [shape: f32[64,64], index: 5, kind: input, shape index: {}, may-alias: {4,5}]   ;;  %s6036_s6 = inlined_call_operand.vmem [shape: f32[2,32,96], index: 6, kind: input, shape index: {}]   ;;  %s6037_s7 = inlined_call_operand.vmem [shape: f32[2,96], index: 7, kind: input, shape index: {}]   ;;  %s6038_s8 = inlined_call_operand.vmem [shape: f32[2,32,32], index: 8, kind: input, shape index: {}]   ;;  %s6039_s9 = inlined_call_operand.hbm [shape: f32[2,32], index: 9, kind: input, shape index: {}]   ;;  %s6040_s10 = inlined_call_operand.vmem [shape: f32[2,32,32], index: 10, kind: input, shape index: {}]   ;;  %s6041_s11 = inlined_call_operand.hbm [shape: f32[2,32], index: 11, kind: input, shape index: {}]   ;;  %s6042_s12 = inlined_call_operand.vmem [shape: f32[2,32,64], index: 12, kind: input, shape index: {}]   ;;  %s6043_s13 = inlined_call_operand.hbm [shape: f32[2,64], index: 13, kind: input, shape index: {}]   ;;  %s6044_s14 = inlined_call_operand.hbm [shape: f32[2,32,32], index: 14, kind: input, shape index: {}]   ;;  %s6045_s15 = inlined_call_operand.hbm [shape: f32[2,32], index: 15, kind: input, shape index: {}]   ;;  %s6046_s16 = inlined_call_operand.hbm [shape: f32[2,32,64], index: 16, kind: input, shape index: {}]   ;;  %s6047_s17 = inlined_call_operand.hbm [shape: f32[2,64], index: 17, kind: input, shape index: {}]   ;;  %s6048_s18 = inlined_call_operand.vmem [shape: f32[2,64,32], index: 18, kind: input, shape index: {}]   ;;  %s6049_s19 = inlined_call_operand.hbm [shape: f32[2,32], index: 19, kind: input, shape index: {}]   ;;  %s6050_s20 = inlined_call_operand.hbm [shape: f32[8,32], index: 20, kind: input, shape index: {}]   ;;  %s6051_s21 = inlined_call_operand.hbm [shape: f32[8,32], index: 21, kind: input, shape index: {}]   ;;  %s6052_s22 = inlined_call_operand.vmem [shape: f32[16,32], index: 22, kind: output, shape index: {}]  }
   0x1   :  { %6058 = sst [smem:[#allocation24_spill]] %s6030_s0 }
   0x2   :  { %6059 = sst [smem:[#allocation25_spill]] %s6031_s1 }
   0x3   :  { %6060 = sst [smem:[#allocation26_spill]] %s6032_s2 }
   0x4   :  { %6061 = sst [smem:[#allocation27_spill]] %s6033_s3 }
   0x5   :  { %6062 = sst [smem:[#allocation28_spill]] %s6034_s4 }
   0x6   :  { %6063 = sst [smem:[#allocation29_spill]] %s6035_s5 }
   0x7   :  { %6064 = sst [smem:[#allocation30_spill]] %s6036_s6 }
   0x8   :  { %27 = vsyncpa [#allocation3], 0 }
   0x9   :  { %28 = vsyncpa [#allocation5], 0 }
   0xa   :  { %29 = vsyncpa [#allocation8], 0 }
   0xb   :  { %30 = vsyncpa [#allocation11], 0 }
   0xc   :  { %31 = vsyncpa [#allocation14], 0 }
   0xd   :  { %32 = vsyncpa [#allocation17], 0  ;;  %s4823_s3 = smov [#allocation4]   ;;  %s4824_s29 = smov [#allocation7]  }
   0xe   :  { %s69_s28 = sshll.u32 %s4823_s3, 4  ;;  %s90_s30 = sshll.u32 %s4824_s29, 4  ;;  %s70_s28 = int_to_ptr.vmem [resolvable:$true] %s69_s28  ;;  %s91_s30 = int_to_ptr.vmem [resolvable:$true] %s90_s30 }
   0xf   :  { %s4619_s4 = scalar_lea.vmem %s70_s28, 32  ;;  %p4624_p1 = scmp.lt.s32.totalorder %s70_s28, %s70_s28 }
  0x10   :  { %p4620_p0 = scmp.ne.s32.totalorder %s70_s28, %s4619_s4  ;;  %p4625_p2 = scmp.lt.s32.totalorder %s4619_s4, %s4619_s4 }
  0x12   :  { %p4626_p3 = por %p4625_p2, %p4624_p1 }
  0x14   :  { %p4627_p4 = pnand %p4626_p3, %p4620_p0 }
  0x16   :  { %4630 = shalt.err (!%p4627_p4)
}
  0x17   :  { %72 = dma.hbm_to_vmem [thread:$0]  %s6041_s11, 32, %s70_s28, [#allocation5]  }
  0x18   :  { %s4639_s1 = scalar_lea.vmem %s91_s30, 1024  ;;  %p4644_p6 = scmp.lt.s32.totalorder %s91_s30, %s91_s30 }
  0x19   :  { %p4640_p5 = scmp.ne.s32.totalorder %s91_s30, %s4639_s1  ;;  %p4645_p7 = scmp.lt.s32.totalorder %s4639_s1, %s4639_s1 }
  0x1b   :  { %p4646_p8 = por %p4645_p7, %p4644_p6 }
  0x1d   :  { %p4647_p9 = pnand %p4646_p8, %p4640_p5 }
  0x1f   :  { %4650 = shalt.err (!%p4647_p9)
}
  0x20   :  { %s4825_s5 = smov 128   ;;  %s4826_s24 = smov 8  }
  0x21   :  { %96 = dma.hbm_to_vmem [thread:$0]  %s6044_s14, 1024, %s91_s30, [#allocation8], %s4825_s5, %s4825_s5, %s4826_s24  }
  0x22   :  { %s4827_s26 = smov [#allocation10]   ;;  %s4828_s27 = smov [#allocation13]  }
  0x23   :  { %s112_s2 = sshll.u32 %s4827_s26, 4  ;;  %s137_s3 = sshll.u32 %s4828_s27, 4  ;;  %s113_s2 = int_to_ptr.vmem [resolvable:$true] %s112_s2  ;;  %s138_s3 = int_to_ptr.vmem [resolvable:$true] %s137_s3 }
  0x24   :  { %s4659_s11 = scalar_lea.vmem %s113_s2, 1024  ;;  %p4664_p11 = scmp.lt.s32.totalorder %s113_s2, %s113_s2 }
  0x25   :  { %p4660_p10 = scmp.ne.s32.totalorder %s113_s2, %s4659_s11  ;;  %p4665_p12 = scmp.lt.s32.totalorder %s4659_s11, %s4659_s11 }
  0x27   :  { %p4666_p13 = por %p4665_p12, %p4664_p11 }
  0x29   :  { %p4667_p0 = pnand %p4666_p13, %p4660_p10 }
  0x2b   :  { %4670 = shalt.err (!%p4667_p0)
}
  0x2c   :  { %118 = dma.hbm_to_vmem [thread:$0]  %s6046_s16, 1024, %s113_s2, [#allocation11], %s4825_s5, %s4825_s5, %s4826_s24  }
  0x2d   :  { %s4679_s4 = scalar_lea.vmem %s138_s3, 32  ;;  %p4684_p2 = scmp.lt.s32.totalorder %s138_s3, %s138_s3 }
  0x2e   :  { %p4680_p1 = scmp.ne.s32.totalorder %s138_s3, %s4679_s4  ;;  %p4685_p3 = scmp.lt.s32.totalorder %s4679_s4, %s4679_s4 }
  0x30   :  { %p4686_p4 = por %p4685_p3, %p4684_p2 }
  0x32   :  { %p4687_p5 = pnand %p4686_p4, %p4680_p1 }
  0x34   :  { %4690 = shalt.err (!%p4687_p5)
}
  0x35   :  { %140 = dma.hbm_to_vmem [thread:$0]  %s6049_s19, 32, %s138_s3, [#allocation14]  }
  0x36   :  { %s4829_s0 = smov [#allocation2]   ;;  %s4830_s1 = smov [#allocation6]  }
  0x37   :  { %s57_s23 = sshll.u32 %s4829_s0, 4  ;;  %s81_s6 = sshll.u32 %s4830_s1, 4  ;;  %s58_s23 = int_to_ptr.vmem [resolvable:$true] %s57_s23  ;;  %s82_s6 = int_to_ptr.vmem [resolvable:$true] %s81_s6 }
  0x38   :  { %s4699_s25 = scalar_lea.vmem %s58_s23, 32  ;;  %p4704_p7 = scmp.lt.s32.totalorder %s58_s23, %s58_s23 }
  0x39   :  { %p4700_p6 = scmp.ne.s32.totalorder %s58_s23, %s4699_s25  ;;  %p4705_p8 = scmp.lt.s32.totalorder %s4699_s25, %s4699_s25 }
  0x3b   :  { %p4706_p9 = por %p4705_p8, %p4704_p7 }
  0x3d   :  { %p4707_p10 = pnand %p4706_p9, %p4700_p6 }
  0x3f   :  { %4710 = shalt.err (!%p4707_p10)
}
  0x40   :  { %60 = dma.hbm_to_vmem [thread:$0]  %s6039_s9, 32, %s58_s23, [#allocation3]  }
  0x41   :  { %s4719_s26 = scalar_lea.vmem %s82_s6, 32  ;;  %p4724_p12 = scmp.lt.s32.totalorder %s82_s6, %s82_s6 }
  0x42   :  { %p4720_p11 = scmp.ne.s32.totalorder %s82_s6, %s4719_s26  ;;  %p4725_p13 = scmp.lt.s32.totalorder %s4719_s26, %s4719_s26 }
  0x44   :  { %p4726_p0 = por %p4725_p13, %p4724_p12 }
  0x46   :  { %p4727_p1 = pnand %p4726_p0, %p4720_p11 }
  0x48   :  { %4730 = shalt.err (!%p4727_p1)
}
  0x49   :  { %84 = dma.hbm_to_vmem [thread:$0]  %s6043_s13, 32, %s82_s6, [#allocation5]  }
  0x4a   :  { %s4831_s27 = smov [#allocation9]   ;;  %s4832_s11 = smov [#allocation12]  }
  0x4b   :  { %s103_s3 = sshll.u32 %s4831_s27, 4  ;;  %s125_s28 = sshll.u32 %s4832_s11, 4  ;;  %s104_s3 = int_to_ptr.vmem [resolvable:$true] %s103_s3  ;;  %s126_s28 = int_to_ptr.vmem [resolvable:$true] %s125_s28 }
  0x4c   :  { %s4739_s29 = scalar_lea.vmem %s104_s3, 32  ;;  %p4744_p3 = scmp.lt.s32.totalorder %s104_s3, %s104_s3 }
  0x4d   :  { %p4740_p2 = scmp.ne.s32.totalorder %s104_s3, %s4739_s29  ;;  %p4745_p4 = scmp.lt.s32.totalorder %s4739_s29, %s4739_s29 }
  0x4f   :  { %p4746_p5 = por %p4745_p4, %p4744_p3 }
  0x51   :  { %p4747_p6 = pnand %p4746_p5, %p4740_p2 }
  0x53   :  { %4750 = shalt.err (!%p4747_p6)
}
  0x54   :  { %106 = dma.hbm_to_vmem [thread:$0]  %s6045_s15, 32, %s104_s3, [#allocation8]  }
  0x55   :  { %s4759_s14 = scalar_lea.vmem %s126_s28, 32  ;;  %p4764_p8 = scmp.lt.s32.totalorder %s126_s28, %s126_s28 }
  0x56   :  { %p4760_p7 = scmp.ne.s32.totalorder %s126_s28, %s4759_s14  ;;  %p4765_p9 = scmp.lt.s32.totalorder %s4759_s14, %s4759_s14 }
  0x58   :  { %p4766_p10 = por %p4765_p9, %p4764_p8 }
  0x5a   :  { %p4767_p11 = pnand %p4766_p10, %p4760_p7 }
  0x5c   :  { %4770 = shalt.err (!%p4767_p11)
}
  0x5d   :  { %128 = dma.hbm_to_vmem [thread:$0]  %s6047_s17, 32, %s126_s28, [#allocation11]  }
  0x5e   :  { %s4833_s0 = smov [#allocation15]   ;;  %s4834_s1 = smov [#allocation16]  }
  0x5f   :  { %s147_s23 = sshll.u32 %s4833_s0, 4  ;;  %s157_s6 = sshll.u32 %s4834_s1, 4  ;;  %s148_s23 = int_to_ptr.vmem [resolvable:$true] %s147_s23  ;;  %s158_s6 = int_to_ptr.vmem [resolvable:$true] %s157_s6 }
  0x60   :  { %s4779_s25 = scalar_lea.vmem %s148_s23, 128  ;;  %p4784_p13 = scmp.lt.s32.totalorder %s148_s23, %s148_s23 }
  0x61   :  { %p4780_p12 = scmp.ne.s32.totalorder %s148_s23, %s4779_s25  ;;  %p4785_p0 = scmp.lt.s32.totalorder %s4779_s25, %s4779_s25 }
  0x63   :  { %p4786_p1 = por %p4785_p0, %p4784_p13 }
  0x65   :  { %p4787_p2 = pnand %p4786_p1, %p4780_p12 }
  0x67   :  { %4790 = shalt.err (!%p4787_p2)
}
  0x68   :  { %150 = dma.hbm_to_vmem [thread:$0]  %s6050_s20, 128, %s148_s23, [#allocation14]  }
  0x69   :  { %s4799_s5 = scalar_lea.vmem %s158_s6, 128  ;;  %p4804_p4 = scmp.lt.s32.totalorder %s158_s6, %s158_s6 }
  0x6a   :  { %p4800_p3 = scmp.ne.s32.totalorder %s158_s6, %s4799_s5  ;;  %p4805_p5 = scmp.lt.s32.totalorder %s4799_s5, %s4799_s5 }
  0x6c   :  { %p4806_p6 = por %p4805_p5, %p4804_p4 }
  0x6e   :  { %p4807_p7 = pnand %p4806_p6, %p4800_p3 }
  0x70   :  { %4810 = shalt.err (!%p4807_p7)
}
  0x71   :  { %160 = dma.hbm_to_vmem [thread:$0]  %s6051_s21, 128, %s158_s6, [#allocation17]  }
  0x72   :  { %4811 = dma.done.wait [#allocation3], 32  }
  0x73   :  { %4812 = vsyncadd [#allocation3], 4294967264 }
  0x74   :  { %4813 = dma.done.wait [#allocation5], 64  }
  0x75   :  { %4814 = vsyncadd [#allocation5], 4294967232 }
  0x76   :  { %4815 = dma.done.wait [#allocation8], 1056  }
  0x77   :  { %4816 = vsyncadd [#allocation8], 4294966240 }
  0x78   :  { %4817 = dma.done.wait [#allocation11], 1056  }
  0x79   :  { %4818 = vsyncadd [#allocation11], 4294966240 }
  0x7a   :  { %4819 = dma.done.wait [#allocation14], 160  }
  0x7b   :  { %4820 = vsyncadd [#allocation14], 4294967136 }
  0x7c   :  { %4821 = dma.done.wait [#allocation17], 128  }
  0x7d   :  { %4822 = vsyncadd [#allocation17], 4294967168  ;;  %vm217_vm0 = vcmask 261120   ;;  %s6065_s2 = sld [smem:[#allocation24_spill]]  ;;  %v223_v23 = vlaneseq  ;;  %v5019_v27 = vld [vmem:[#allocation15] sm:$0xff]  ;;  %v5021_v28 = vld [vmem:[#allocation16] sm:$0xff] }
  0x7e   :  { %s6066_s28 = sld [smem:[#allocation30_spill]]  ;;  %v271_v39 = vld [vmem:[%s6037_s7] sm:$0x3]  ;;  %s4835_s1 = smov 104   ;;  %vm207_vm1 = vcmask 64512   ;;  %vm215_vm2 = vcmask 130048  }
  0x7f   :  { %v5014_v25 = vshrl.u32 %v223_v23, 7  ;;  %s4836_s6 = smov 120   ;;  %s4837_s25 = smov 112   ;;  %vm219_vm3 = vcmask 392192   ;;  %vm595_vm5 = vcmask 523264   ;;  %vm865_vm6 = vcmask 195584  }
  0x80   :  { %s4838_s15 = smov 96   ;;  %s6067_s17 = sld [smem:[#allocation26_spill]] }
  0x81   :  { %v5017_v26 = vsub.s32 0, %v5014_v25  ;;  %s4839_s26 = smov 16   ;;  %s4840_s20 = smov 32  }
  0x82   :  { %s4841_s19 = smov 48   ;;  %s6068_s3 = sld [smem:[#allocation28_spill]] }
  0x83   :  { %v191_v0 = vld [vmem:[%s6065_s2] sm:$0xff]  ;;  %v192_v1 = vld [vmem:[%s6065_s2 + $0x8] sm:$0xff]  ;;  %v310_v29 = vrot.slane %v5019_v27, %v5017_v26  ;;  %v316_v32 = vrot.slane %v5021_v28, %v5017_v26  ;;  %v326_v40 = vrot.slane %v271_v39, %v5017_v26  ;;  %s4843_s27 = smov 64   ;;  %s4844_s30 = smov 24  }
  0x84   :  { %v280_v2 = vsel %vm217_vm0, %v191_v0, 0.0  ;;  %v283_v3 = vsel %vm217_vm0, %v192_v1, 0.0  ;;  %v322_v14 = vld [vmem:[%s6066_s28 + $0x18] sm:$0xff]  ;;  %v321_v15 = vld [vmem:[%s6066_s28 + $0x10] sm:$0xff]  ;;  %v320_v16 = vld [vmem:[%s6066_s28 + $0x8] sm:$0xff]  ;;  %s6070_s9 = sld [smem:[#allocation27_spill]] }
  0x85   :  { %281 = vadd.xlane.f32.xlu0 %v280_v2  ;;  %4022 = vmatprep.subr.mxu0 %v322_v14  ;;  %v319_v17 = vld [vmem:[%s6066_s28] sm:$0xff]  ;;  %s6071_s13 = sld [smem:[#allocation29_spill]] }
  0x86   :  { %4023 = vmatpush3.msra.mxu0 %v322_v14  ;;  %v203_v53 = vld [vmem:[%s6067_s17] sm:$0x3] }
  0x87   :  { %4024 = vmatprep.subr.mxu0 %v321_v15  ;;  %v204_v54 = vrot.slane %v203_v53, 1 }
  0x88   :  { %4025 = vmatpush3.msra.mxu0 %v321_v15 }
  0x89   :  { %284 = vadd.xlane.f32.xlu0 %v283_v3  ;;  %4026 = vmatprep.subr.mxu0 %v320_v16 }
  0x8a   :  { %4027 = vmatpush3.msra.mxu0 %v320_v16  ;;  %v196_v16 = vld [vmem:[%s6068_s3 + $0x8] sm:$0xff] }
  0x8b   :  { %4028 = vmatprep.subr.mxu0 %v319_v17 }
  0x8c   :  { %4029 = vmatpush3.msra.mxu0 %v319_v17  ;;  %v195_v17 = vld [vmem:[%s6068_s3] sm:$0xff] }
 0x10e   :  { %v282_v4 = vpop.xlane.xlu0 %281 }
 0x10f   :  { %v287_v5 = vmul.f32 0.03125, %v282_v4 }
 0x111   :  { %v289_v6 = vsub.f32 %v191_v0, %v287_v5 }
 0x112   :  { %v285_v7 = vpop.xlane.xlu0 %284 }
 0x113   :  { %v288_v8 = vmul.f32 0.03125, %v285_v7  ;;  %v291_v9 = vmul.f32 %v289_v6, %v289_v6 }
 0x115   :  { %v290_v10 = vsub.f32 %v192_v1, %v288_v8  ;;  %v293_v11 = vsel %vm217_vm0, %v291_v9, 0.0 }
 0x116   :  { %294 = vadd.xlane.f32.xlu1 %v293_v11 }
 0x117   :  { %v292_v12 = vmul.f32 %v290_v10, %v290_v10 }
 0x119   :  { %v296_v13 = vsel %vm217_vm0, %v292_v12, 0.0 }
 0x11a   :  { %297 = vadd.xlane.f32.xlu1 %v296_v13  ;;  %v4842_v13 = vmov 0.0  }
 0x19f   :  { %v295_v18 = vpop.xlane.xlu1 %294 }
 0x1a0   :  { %v299_v19 = vmul.f32 0.03125, %v295_v18 }
 0x1a2   :  { %v301_v20 = vadd.f32 1e-05, %v299_v19 }
 0x1a3   :  { %v298_v21 = vpop.xlane.xlu1 %297 }
 0x1a4   :  { %4438 = vrsqrt.f32 %v301_v20  ;;  %v300_v22 = vmul.f32 0.03125, %v298_v21  ;;  %v198_v20 = vld [vmem:[%s6068_s3 + $0x18] sm:$0xff] }
 0x1a6   :  { %v302_v24 = vadd.f32 1e-05, %v300_v22 }
 0x1a8   :  { %4440 = vrsqrt.f32 %v302_v24 }
 0x1b1   :  { %v4439_v30 = vpop.eup %4438 }
 0x1b2   :  { %v305_v31 = vmul.f32 %v4439_v30, %v289_v6 }
 0x1b4   :  { %v311_v33 = vmul.f32 %v310_v29, %v305_v31 }
 0x1b5   :  { %v4441_v34 = vpop.eup %4440 }
 0x1b6   :  { %v306_v35 = vmul.f32 %v4441_v34, %v290_v10  ;;  %v5027_v36 = vadd.f32 %v316_v32, %v311_v33  ;;  %v200_v33 = vld [vmem:[%s6068_s3 + $0x28] sm:$0xff] }
 0x1b8   :  { %v312_v37 = vmul.f32 %v310_v29, %v306_v35  ;;  %4030 = vmatprep.mubr.msk.f32.mxu0 %vm217_vm0, %v5027_v36 }
 0x1ba   :  { %v5031_v38 = vadd.f32 %v316_v32, %v312_v37  ;;  %v197_v32 = vld [vmem:[%s6068_s3 + $0x10] sm:$0xff] }
 0x1bc   :  { %4031 = vmatmul.mubr.msk.f32.vlgmr.msra.gmra.mxu0 %vm217_vm0, %v5031_v38 }
 0x27c   :  { %v4032_v41 = vpop.f32.mrf.mxu0 }
 0x27d   :  { %v5039_v42 = vadd.f32 %v4032_v41, %v326_v40 }
 0x27e   :  { %v399_v43 = vpop.f32.mrf.mxu0 }
 0x27f   :  { %v5041_v44 = vadd.f32 %v399_v43, %v326_v40  ;;  %440 = vrot.lane.b32.xlu0 %v5039_v42, %s4835_s1  ;;  %v413_v52 = vmul.f32 0.35355338, %v5039_v42  ;;  %v199_v43 = vld [vmem:[%s6068_s3 + $0x20] sm:$0xff] }
 0x281   :  { %438 = vrot.lane.b32.xlu1 %v5041_v44, %s4835_s1  ;;  %v412_v45 = vmul.f32 0.35355338, %v5041_v44 }
 0x283   :  { %432 = vrot.lane.b32.xlu0 %v5039_v42, %s4836_s6  ;;  %4049 = vmatprep.mubr.msk.f32.mxu1 %vm207_vm1, %v412_v45 }
 0x285   :  { %436 = vrot.lane.b32.xlu1 %v5039_v42, %s4837_s25 }
 0x289   :  { %434 = vrot.lane.b32.xlu1 %v5041_v44, %s4837_s25 }
 0x28d   :  { %430 = vrot.lane.b32.xlu1 %v5041_v44, %s4836_s6 }
 0x2f1   :  { %v5057_v46 = vpop.permute.xlu0 %440 }
 0x2f2   :  { %456 = vrot.lane.b32.xlu0 %v5057_v46, %s4838_s15 }
 0x2f3   :  { %v5061_v47 = vpop.permute.xlu1 %438 }
 0x2f4   :  { %454 = vrot.lane.b32.xlu1 %v5061_v47, %s4838_s15 }
 0x2f5   :  { %v5069_v49 = vpop.permute.xlu0 %432 }
 0x2f7   :  { %v5065_v48 = vpop.permute.xlu1 %436 }
 0x2f8   :  { %452 = vrot.lane.b32.xlu0 %v5065_v48, %s4838_s15 }
 0x2fb   :  { %v5071_v50 = vpop.permute.xlu1 %434 }
 0x2fc   :  { %448 = vrot.lane.b32.xlu0 %v5069_v49, %s4838_s15  ;;  %450 = vrot.lane.b32.xlu1 %v5071_v50, %s4838_s15 }
 0x2ff   :  { %v5077_v51 = vpop.permute.xlu1 %430 }
 0x300   :  { %444 = vrot.lane.b32.xlu0 %v5039_v42, %s4838_s15  ;;  %446 = vrot.lane.b32.xlu1 %v5077_v51, %s4838_s15 }
 0x304   :  { %442 = vrot.lane.b32.xlu1 %v5041_v44, %s4838_s15  ;;  %416 = vrot.lane.b32.xlu0 %v412_v45, %s4836_s6 }
 0x308   :  { %418 = vrot.lane.b32.xlu1 %v413_v52, %s4836_s6  ;;  %420 = vrot.lane.b32.xlu0 %v412_v45, %s4837_s25 }
 0x30c   :  { %422 = vrot.lane.b32.xlu1 %v413_v52, %s4837_s25  ;;  %424 = vrot.lane.b32.xlu0 %v412_v45, %s4835_s1  ;;  %v202_v45 = vld [vmem:[%s6068_s3 + $0x38] sm:$0xff] }
 0x310   :  { %426 = vrot.lane.b32.xlu1 %v413_v52, %s4835_s1  ;;  %205 = vrot.lane.b32.xlu0 %v204_v54, %s4826_s24 }
 0x364   :  { %v457_v55 = vpop.permute.xlu0 %456 }
 0x365   :  { %4033 = vmatprep.subr.msk.mxu1 %vm207_vm1, %v457_v55 }
 0x366   :  { %4034 = vmatpush3.xpose.msk.msra.mxu1 %vm207_vm1, %v457_v55  ;;  %v455_v56 = vpop.permute.xlu1 %454 }
 0x367   :  { %4035 = vmatprep.subr.msk.mxu1 %vm207_vm1, %v455_v56 }
 0x36a   :  { %v453_v57 = vpop.permute.xlu0 %452  ;;  %4036 = vmatpush3.xpose.msk.msra.mxu1 %vm207_vm1, %v455_v56 }
 0x36b   :  { %4037 = vmatprep.subr.msk.mxu1 %vm207_vm1, %v453_v57 }
 0x36e   :  { %v449_v58 = vpop.permute.xlu0 %448  ;;  %4038 = vmatpush3.xpose.msk.msra.mxu1 %vm207_vm1, %v453_v57  ;;  %v451_v59 = vpop.permute.xlu1 %450 }
 0x36f   :  { %4039 = vmatprep.subr.msk.mxu1 %vm207_vm1, %v451_v59 }
 0x372   :  { %v445_v60 = vpop.permute.xlu0 %444  ;;  %4040 = vmatpush3.xpose.msk.msra.mxu1 %vm207_vm1, %v451_v59  ;;  %v447_v61 = vpop.permute.xlu1 %446 }
 0x373   :  { %4041 = vmatprep.subr.msk.mxu1 %vm207_vm1, %v449_v58 }
 0x376   :  { %4042 = vmatpush3.xpose.msk.msra.mxu1 %vm207_vm1, %v449_v58  ;;  %v417_v62 = vpop.permute.xlu0 %416  ;;  %v443_v0 = vpop.permute.xlu1 %442 }
 0x377   :  { %4043 = vmatprep.subr.msk.mxu1 %vm207_vm1, %v447_v61 }
 0x37a   :  { %4044 = vmatpush3.xpose.msk.msra.mxu1 %vm207_vm1, %v447_v61  ;;  %v421_v63 = vpop.permute.xlu0 %420  ;;  %v419_v4 = vpop.permute.xlu1 %418 }
 0x37b   :  { %4045 = vmatprep.subr.msk.mxu1 %vm207_vm1, %v445_v60 }
 0x37e   :  { %4046 = vmatpush3.xpose.msk.msra.mxu1 %vm207_vm1, %v445_v60  ;;  %v425_v1 = vpop.permute.xlu0 %424  ;;  %v423_v5 = vpop.permute.xlu1 %422  ;;  %v201_v60 = vld [vmem:[%s6068_s3 + $0x30] sm:$0xff]  ;;  %s6069_s3 = sld [smem:[#allocation25_spill]] }
 0x37f   :  { %4047 = vmatprep.subr.msk.mxu1 %vm207_vm1, %v443_v0 }
 0x382   :  { %4048 = vmatpush3.xpose.msk.msra.mxu1 %vm207_vm1, %v443_v0  ;;  %v206_v2 = vpop.permute.xlu0 %205  ;;  %v427_v6 = vpop.permute.xlu1 %426 }
 0x383   :  { %v208_v3 = vsel %vm207_vm1, %v203_v53, %v206_v2 }
 0x384   :  { %209 = vrot.lane.b32.xlu1 %v208_v3, %s4839_s26  ;;  %211 = vrot.lane.b32.xlu0 %v208_v3, %s4840_s20 }
 0x385   :  { %4050 = vmatmul.mubr.msk.f32.vlgmr.msra.gmra.mxu1 %vm207_vm1, %v413_v52 }
 0x386   :  { %4052 = vmatprep.mubr.msk.f32.mxu1 %vm207_vm1, %v417_v62 }
 0x388   :  { %213 = vrot.lane.b32.xlu1 %v208_v3, %s4841_s19 }
 0x389   :  { %4053 = vmatmul.mubr.msk.f32.gmra.mxu1 %vm207_vm1, %v419_v4 }
 0x38a   :  { %4055 = vmatprep.mubr.msk.f32.mxu1 %vm207_vm1, %v421_v63 }
 0x38d   :  { %4056 = vmatmul.mubr.msk.f32.gmra.mxu1 %vm207_vm1, %v423_v5 }
 0x38e   :  { %4058 = vmatprep.mubr.msk.f32.mxu1 %vm207_vm1, %v425_v1 }
 0x391   :  { %4059 = vmatmul.mubr.msk.f32.gmra.mxu1 %vm207_vm1, %v427_v6 }
 0x3f6   :  { %v210_v7 = vpop.permute.xlu1 %209  ;;  %v212_v9 = vpop.permute.xlu0 %211 }
 0x3f7   :  { %v216_v8 = vsel %vm215_vm2, %v208_v3, %v210_v7 }
 0x3f8   :  { %v218_v11 = vsel %vm217_vm0, %v216_v8, %v212_v9 }
 0x3fa   :  { %v214_v10 = vpop.permute.xlu1 %213 }
 0x3fb   :  { %v220_v12 = vsel %vm219_vm3, %v218_v11, %v214_v10 }
 0x3fc   :  { %vm221_vm4 = vcmp.ne.s32.totalorder %v220_v12, 0 }
 0x3fd   :  { %v222_v14 = vsel %vm221_vm4, -1e+09, %v4842_v13 }
 0x3fe   :  { %v226_v15 = vrot.slane %v222_v14, %v5017_v26 }
 0x400   :  { %v5134_v18 = vadd.f32 %v226_v15, %v196_v16  ;;  %v5140_v22 = vadd.f32 %v226_v15, %v195_v17  ;;  %v5144_v30 = vadd.f32 %v226_v15, %v198_v20  ;;  %v5154_v39 = vadd.f32 %v226_v15, %v197_v32 }
 0x401   :  { %v5156_v40 = vadd.f32 %v226_v15, %v200_v33  ;;  %v5167_v56 = vadd.f32 %v226_v15, %v199_v43  ;;  %v5170_v58 = vadd.f32 %v226_v15, %v202_v45  ;;  %v5178_v1 = vadd.f32 %v226_v15, %v201_v60 }
 0x445   :  { %v4051_v19 = vpop.f32.mrf.mxu1 }
 0x446   :  { %v562_v21 = vadd.f32 %v4051_v19, %v5134_v18 }
 0x447   :  { %v556_v23 = vpop.f32.mrf.mxu1 }
 0x448   :  { %v557_v24 = vadd.f32 %v556_v23, %v5140_v22  ;;  %v599_v29 = vsel %vm595_vm5, %v562_v21, -inf }
 0x449   :  { %600 = vmax.xlane.f32.xlu1 %v599_v29  ;;  %v4054_v31 = vpop.f32.mrf.mxu1 }
 0x44a   :  { %v572_v34 = vadd.f32 %v4054_v31, %v5144_v30  ;;  %v596_v35 = vsel %vm595_vm5, %v557_v24, -inf }
 0x44b   :  { %v566_v37 = vpop.f32.mrf.mxu1  ;;  %597 = vmax.xlane.f32.xlu0 %v596_v35 }
 0x44c   :  { %v567_v52 = vadd.f32 %v566_v37, %v5154_v39  ;;  %v605_v54 = vsel %vm595_vm5, %v572_v34, -inf }
 0x44d   :  { %v4057_v41 = vpop.f32.mrf.mxu1 }
 0x44e   :  { %v582_v53 = vadd.f32 %v4057_v41, %v5156_v40  ;;  %v602_v63 = vsel %vm595_vm5, %v567_v52, -inf }
 0x44f   :  { %v576_v55 = vpop.f32.mrf.mxu1  ;;  %606 = vmax.xlane.f32.xlu0 %v605_v54 }
 0x450   :  { %v611_v57 = vsel %vm595_vm5, %v582_v53, -inf  ;;  %v577_v61 = vadd.f32 %v576_v55, %v5167_v56 }
 0x451   :  { %612 = vmax.xlane.f32.xlu1 %v611_v57  ;;  %v4060_v59 = vpop.f32.mrf.mxu1 }
 0x452   :  { %v592_v62 = vadd.f32 %v4060_v59, %v5170_v58  ;;  %v608_v4 = vsel %vm595_vm5, %v577_v61, -inf }
 0x453   :  { %v586_v0 = vpop.f32.mrf.mxu1  ;;  %603 = vmax.xlane.f32.xlu0 %v602_v63 }
 0x454   :  { %v617_v2 = vsel %vm595_vm5, %v592_v62, -inf  ;;  %v587_v3 = vadd.f32 %v586_v0, %v5178_v1 }
 0x455   :  { %618 = vmax.xlane.f32.xlu1 %v617_v2 }
 0x456   :  { %v614_v5 = vsel %vm595_vm5, %v587_v3, -inf }
 0x457   :  { %609 = vmax.xlane.f32.xlu0 %v608_v4 }
 0x45b   :  { %615 = vmax.xlane.f32.xlu0 %v614_v5 }
 0x466   :  { %696 = vrot.lane.b32.xlu1 %v5061_v47, %s4843_s27 }
 0x46a   :  { %694 = vrot.lane.b32.xlu1 %v5065_v48, %s4843_s27 }
 0x46e   :  { %692 = vrot.lane.b32.xlu1 %v5071_v50, %s4843_s27 }
 0x471   :  { %698 = vrot.lane.b32.xlu0 %v5057_v46, %s4843_s27 }
 0x472   :  { %688 = vrot.lane.b32.xlu1 %v5077_v51, %s4843_s27 }
 0x475   :  { %690 = vrot.lane.b32.xlu0 %v5069_v49, %s4843_s27 }
 0x4d2   :  { %v601_v6 = vpop.xlane.xlu1 %600 }
 0x4d3   :  { %v621_v7 = vsub.f32 %v562_v21, %v601_v6 }
 0x4d4   :  { %v598_v8 = vpop.xlane.xlu0 %597 }
 0x4d5   :  { %v630_v9 = vmul.f32 1.442695, %v621_v7  ;;  %v620_v47 = vsub.f32 %v557_v24, %v598_v8 }
 0x4d7   :  { %4442 = vpow2.f32 %v630_v9  ;;  %v628_v10 = vmul.f32 1.442695, %v620_v47 }
 0x4d8   :  { %v607_v48 = vpop.xlane.xlu0 %606 }
 0x4d9   :  { %4444 = vpow2.f32 %v628_v10  ;;  %v623_v11 = vsub.f32 %v572_v34, %v607_v48 }
 0x4da   :  { %v613_v50 = vpop.xlane.xlu1 %612 }
 0x4db   :  { %v634_v12 = vmul.f32 1.442695, %v623_v11  ;;  %v625_v14 = vsub.f32 %v582_v53, %v613_v50 }
 0x4dc   :  { %v604_v46 = vpop.xlane.xlu0 %603 }
 0x4dd   :  { %4446 = vpow2.f32 %v634_v12  ;;  %v638_v15 = vmul.f32 1.442695, %v625_v14  ;;  %v622_v51 = vsub.f32 %v567_v52, %v604_v46 }
 0x4de   :  { %v619_v16 = vpop.xlane.xlu1 %618 }
 0x4df   :  { %4448 = vpow2.f32 %v638_v15  ;;  %v632_v49 = vmul.f32 1.442695, %v622_v51  ;;  %v627_v17 = vsub.f32 %v592_v62, %v619_v16 }
 0x4e0   :  { %v610_v19 = vpop.xlane.xlu0 %609 }
 0x4e1   :  { %4450 = vpow2.f32 %v632_v49  ;;  %v642_v20 = vmul.f32 1.442695, %v627_v17  ;;  %v624_v21 = vsub.f32 %v577_v61, %v610_v19 }
 0x4e2   :  { %v697_v23 = vpop.permute.xlu1 %696 }
 0x4e3   :  { %4452 = vpow2.f32 %v642_v20  ;;  %v636_v24 = vmul.f32 1.442695, %v624_v21 }
 0x4e4   :  { %v5196_v29 = vpop.eup %4442  ;;  %v616_v31 = vpop.xlane.xlu0 %615 }
 0x4e5   :  { %4454 = vpow2.f32 %v636_v24  ;;  %v626_v32 = vsub.f32 %v587_v3, %v616_v31  ;;  %v647_v33 = vsel %vm595_vm5, %v5196_v29, 0.0  ;;  %v411_v31 = vld [vmem:[%s6038_s8 + $0x18] sm:$0xff] }
 0x4e6   :  { %v4445_v34 = vpop.eup %4444  ;;  %648 = vadd.xlane.f32.xlu1 %v647_v33  ;;  %v695_v37 = vpop.permute.xlu1 %694  ;;  %v409_v33 = vld [vmem:[%s6038_s8 + $0x8] sm:$0xff] }
 0x4e7   :  { %v640_v35 = vmul.f32 1.442695, %v626_v32  ;;  %v644_v41 = vsel %vm595_vm5, %v4445_v34, 0.0  ;;  %v410_v32 = vld [vmem:[%s6038_s8 + $0x10] sm:$0xff] }
 0x4e8   :  { %645 = vadd.xlane.f32.xlu0 %v644_v41  ;;  %v699_v43 = vpop.permute.xlu0 %698 }
 0x4e9   :  { %4456 = vpow2.f32 %v640_v35  ;;  %4061 = vmatprep.subr.mxu0 %v699_v43 }
 0x4ea   :  { %v5201_v45 = vpop.eup %4446  ;;  %4062 = vmatpush3.msra.mxu0 %v699_v43  ;;  %v693_v54 = vpop.permute.xlu1 %692 }
 0x4eb   :  { %4063 = vmatprep.subr.mxu0 %v697_v23  ;;  %v653_v52 = vsel %vm595_vm5, %v5201_v45, 0.0 }
 0x4ec   :  { %v5205_v53 = vpop.eup %4448  ;;  %654 = vadd.xlane.f32.xlu1 %v653_v52  ;;  %4064 = vmatpush3.msra.mxu0 %v697_v23  ;;  %v691_v61 = vpop.permute.xlu0 %690 }
 0x4ed   :  { %4065 = vmatprep.subr.mxu0 %v695_v37  ;;  %v659_v57 = vsel %vm595_vm5, %v5205_v53, 0.0 }
 0x4ee   :  { %v4451_v55 = vpop.eup %4450  ;;  %4066 = vmatpush3.msra.mxu0 %v695_v37  ;;  %v689_v63 = vpop.permute.xlu1 %688 }
 0x4ef   :  { %4067 = vmatprep.subr.mxu0 %v693_v54  ;;  %v650_v59 = vsel %vm595_vm5, %v4451_v55, 0.0 }
 0x4f0   :  { %v5210_v60 = vpop.eup %4452  ;;  %660 = vadd.xlane.f32.xlu1 %v659_v57  ;;  %651 = vadd.xlane.f32.xlu0 %v650_v59 }
 0x4f1   :  { %4068 = vmatpush3.msra.mxu0 %v693_v54  ;;  %v665_v0 = vsel %vm595_vm5, %v5210_v60, 0.0 }
 0x4f2   :  { %v4455_v62 = vpop.eup %4454  ;;  %4069 = vmatprep.subr.mxu0 %v691_v61 }
 0x4f3   :  { %4070 = vmatpush3.msra.mxu0 %v691_v61  ;;  %v656_v2 = vsel %vm595_vm5, %v4455_v62, 0.0 }
 0x4f4   :  { %4071 = vmatprep.subr.mxu0 %v689_v63  ;;  %666 = vadd.xlane.f32.xlu1 %v665_v0 }
 0x4f5   :  { %657 = vadd.xlane.f32.xlu0 %v656_v2  ;;  %4072 = vmatpush3.msra.mxu0 %v689_v63 }
 0x4f6   :  { %v4457_v3 = vpop.eup %4456 }
 0x4f7   :  { %v662_v4 = vsel %vm595_vm5, %v4457_v3, 0.0 }
 0x4f9   :  { %663 = vadd.xlane.f32.xlu0 %v662_v4 }
 0x505   :  { %684 = vrot.lane.b32.xlu1 %v5041_v44, %s4843_s27 }
 0x50f   :  { %686 = vrot.lane.b32.xlu0 %v5039_v42, %s4843_s27 }
 0x56f   :  { %v649_v6 = vpop.xlane.xlu1 %648 }
 0x571   :  { %v646_v5 = vpop.xlane.xlu0 %645 }
 0x572   :  { %4458 = vrcp.f32 %v646_v5 }
 0x573   :  { %4460 = vrcp.f32 %v649_v6  ;;  %v1085_v6 = vld [vmem:[%s6042_s12 + $0x18] sm:$0xff] }
 0x574   :  { %4111 = vmatprep.subr.mxu1 %v1085_v6 }
 0x575   :  { %v655_v7 = vpop.xlane.xlu1 %654  ;;  %4112 = vmatpush3.msra.mxu1 %v1085_v6 }
 0x579   :  { %v652_v8 = vpop.xlane.xlu0 %651  ;;  %v661_v9 = vpop.xlane.xlu1 %660 }
 0x57a   :  { %4462 = vrcp.f32 %v652_v8  ;;  %v193_v8 = vld [vmem:[%s6069_s3] sm:$0xff] }
 0x57b   :  { %4464 = vrcp.f32 %v655_v7  ;;  %v1084_v7 = vld [vmem:[%s6042_s12 + $0x10] sm:$0xff]  ;;  %4119 = vmatprep.mubr.msk.f32.mxu1 %vm217_vm0, %v193_v8 }
 0x57c   :  { %4113 = vmatprep.subr.mxu1 %v1084_v7 }
 0x57d   :  { %v667_v11 = vpop.xlane.xlu1 %666  ;;  %4114 = vmatpush3.msra.mxu1 %v1084_v7 }
 0x57e   :  { %v658_v47 = vpop.xlane.xlu0 %657 }
 0x57f   :  { %v4459_v10 = vpop.eup %4458  ;;  %4466 = vrcp.f32 %v658_v47  ;;  %v1082_v47 = vld [vmem:[%s6042_s12] sm:$0xff] }
 0x580   :  { %v669_v48 = vmul.f32 %v4459_v10, %v4445_v34  ;;  %4468 = vrcp.f32 %v661_v9  ;;  %v4461_v42 = vpop.eup %4460  ;;  %v408_v34 = vld [vmem:[%s6038_s8] sm:$0xff]  ;;  %v1083_v9 = vld [vmem:[%s6042_s12 + $0x8] sm:$0xff] }
 0x581   :  { %v685_v14 = vpop.permute.xlu1 %684  ;;  %v671_v46 = vmul.f32 %v4461_v42, %v5196_v29  ;;  %4115 = vmatprep.subr.mxu1 %v1083_v9  ;;  %v194_v10 = vld [vmem:[%s6069_s3 + $0x8] sm:$0xff] }
 0x582   :  { %v664_v50 = vpop.xlane.xlu0 %663  ;;  %4077 = vmatprep.mubr.msk.f32.mxu0 %vm595_vm5, %v669_v48  ;;  %4116 = vmatpush3.msra.mxu1 %v1083_v9  ;;  %v272_v48 = vld [vmem:[#allocation2] sm:$0x3] }
 0x583   :  { %4470 = vrcp.f32 %v664_v50  ;;  %4117 = vmatprep.subr.mxu1 %v1082_v47 }
 0x584   :  { %4472 = vrcp.f32 %v667_v11  ;;  %4118 = vmatpush3.msra.mxu1 %v1082_v47  ;;  %v871_v11 = vrot.slane %v272_v48, %v5017_v26  ;;  %v273_v48 = vld [vmem:[#allocation4] sm:$0x3] }
 0x585   :  { %4120 = vmatmul.mubr.msk.f32.vlgmr.msra.gmra.mxu1 %vm217_vm0, %v194_v10 }
 0x586   :  { %v687_v44 = vpop.permute.xlu0 %686 }
 0x587   :  { %4073 = vmatprep.subr.mxu0 %v687_v44  ;;  %v4463_v12 = vpop.eup %4462 }
 0x588   :  { %4074 = vmatpush3.msra.mxu0 %v687_v44  ;;  %v673_v15 = vmul.f32 %v4463_v12, %v4451_v55  ;;  %v4465_v51 = vpop.eup %4464 }
 0x589   :  { %4075 = vmatprep.subr.mxu0 %v685_v14  ;;  %v675_v49 = vmul.f32 %v4465_v51, %v5201_v45 }
 0x58a   :  { %4076 = vmatpush3.msra.mxu0 %v685_v14 }
 0x58b   :  { %4078 = vmatmul.mubr.msk.f32.vlgmr.msra.gmra.mxu0 %vm595_vm5, %v671_v46  ;;  %4089 = vmatprep.subr.mxu0 %v411_v31 }
 0x58c   :  { %v4467_v16 = vpop.eup %4466  ;;  %4080 = vmatprep.mubr.msk.f32.mxu0 %vm595_vm5, %v673_v15  ;;  %4090 = vmatpush3.msra.mxu0 %v411_v31  ;;  %v995_v31 = vld [vmem:[%s6040_s10 + $0x10] sm:$0xff] }
 0x58d   :  { %v677_v17 = vmul.f32 %v4467_v16, %v4455_v62  ;;  %v4469_v19 = vpop.eup %4468  ;;  %4091 = vmatprep.subr.mxu0 %v410_v32 }
 0x58e   :  { %v679_v21 = vmul.f32 %v4469_v19, %v5205_v53  ;;  %4092 = vmatpush3.msra.mxu0 %v410_v32  ;;  %v994_v32 = vld [vmem:[%s6040_s10 + $0x8] sm:$0xff] }
 0x58f   :  { %4081 = vmatmul.mubr.msk.f32.gmra.mxu0 %vm595_vm5, %v675_v49  ;;  %4093 = vmatprep.subr.mxu0 %v409_v33 }
 0x590   :  { %v4471_v20 = vpop.eup %4470  ;;  %4083 = vmatprep.mubr.msk.f32.mxu0 %vm595_vm5, %v677_v17  ;;  %4094 = vmatpush3.msra.mxu0 %v409_v33  ;;  %v993_v33 = vld [vmem:[%s6040_s10] sm:$0xff] }
 0x591   :  { %v681_v23 = vmul.f32 %v4471_v20, %v4457_v3  ;;  %v4473_v24 = vpop.eup %4472  ;;  %4095 = vmatprep.subr.mxu0 %v408_v34 }
 0x592   :  { %v683_v29 = vmul.f32 %v4473_v24, %v5210_v60  ;;  %4096 = vmatpush3.msra.mxu0 %v408_v34  ;;  %v274_v34 = vld [vmem:[#allocation6] sm:$0x3] }
 0x593   :  { %4084 = vmatmul.mubr.msk.f32.gmra.mxu0 %vm595_vm5, %v679_v21 }
 0x594   :  { %4086 = vmatprep.mubr.msk.f32.mxu0 %vm595_vm5, %v681_v23 }
 0x597   :  { %4087 = vmatmul.mubr.msk.f32.gmra.mxu0 %vm595_vm5, %v683_v29 }
 0x64b   :  { %v4079_v35 = vpop.f32.mrf.mxu0 }
 0x64d   :  { %v798_v37 = vpop.f32.mrf.mxu0 }
 0x64f   :  { %v4082_v41 = vpop.f32.mrf.mxu0 }
 0x650   :  { %841 = vrot.lane.b32.xlu1 %v4082_v41, %s4826_s24 }
 0x651   :  { %v808_v43 = vpop.f32.mrf.mxu0 }
 0x652   :  { %839 = vrot.lane.b32.xlu0 %v808_v43, %s4826_s24 }
 0x653   :  { %v4085_v45 = vpop.f32.mrf.mxu0 }
 0x654   :  { %849 = vrot.lane.b32.xlu1 %v4085_v45, %s4839_s26 }
 0x655   :  { %v818_v52 = vpop.f32.mrf.mxu0 }
 0x656   :  { %847 = vrot.lane.b32.xlu0 %v818_v52, %s4839_s26 }
 0x657   :  { %v4088_v53 = vpop.f32.mrf.mxu0 }
 0x658   :  { %857 = vrot.lane.b32.xlu1 %v4088_v53, %s4844_s30 }
 0x659   :  { %v828_v54 = vpop.f32.mrf.mxu0 }
 0x65a   :  { %855 = vrot.lane.b32.xlu0 %v828_v54, %s4844_s30 }
 0x6c2   :  { %v842_v55 = vpop.permute.xlu1 %841 }
 0x6c3   :  { %v862_v63 = vsel %vm207_vm1, %v4079_v35, %v842_v55  ;;  %v4121_v35 = vpop.f32.mrf.mxu1 }
 0x6c4   :  { %v840_v57 = vpop.permute.xlu0 %839 }
 0x6c5   :  { %v861_v61 = vsel %vm207_vm1, %v798_v37, %v840_v57  ;;  %v1089_v37 = vrot.slane %v274_v34, %v5017_v26  ;;  %v1162_v41 = vpop.f32.mrf.mxu1 }
 0x6c6   :  { %v850_v59 = vpop.permute.xlu1 %849 }
 0x6c7   :  { %v864_v3 = vsel %vm215_vm2, %v862_v63, %v850_v59  ;;  %v5298_v43 = vadd.f32 %v4121_v35, %v1089_v37  ;;  %v5300_v45 = vadd.f32 %v1162_v41, %v1089_v37  ;;  %v236_v37 = vld [vmem:[%s6071_s13 + $0x8] sm:$0xff]  ;;  %v235_v41 = vld [vmem:[%s6071_s13] sm:$0xff] }
 0x6c8   :  { %v848_v60 = vpop.permute.xlu0 %847 }
 0x6c9   :  { %v863_v0 = vsel %vm215_vm2, %v861_v61, %v848_v60  ;;  %v5315_v60 = vsub.s32 1, %v5014_v25 }
 0x6ca   :  { %v858_v62 = vpop.permute.xlu1 %857 }
 0x6cb   :  { %v867_v5 = vsel %vm865_vm6, %v864_v3, %v858_v62  ;;  %v984_v61 = vrot.slane %v5019_v27, %v5315_v60 }
 0x6cc   :  { %v856_v2 = vpop.permute.xlu0 %855 }
 0x6cd   :  { %v866_v4 = vsel %vm865_vm6, %v863_v0, %v856_v2  ;;  %v990_v0 = vrot.slane %v5021_v28, %v5315_v60 }
 0x6ce   :  { %4097 = vmatprep.mubr.msk.f32.mxu0 %vm217_vm0, %v866_v4 }
 0x6cf   :  { %4098 = vmatmul.mubr.msk.f32.vlgmr.msra.gmra.mxu0 %vm217_vm0, %v867_v5 }
 0x78f   :  { %v4099_v50 = vpop.f32.mrf.mxu0 }
 0x790   :  { %v950_v42 = vadd.f32 %v4099_v50, %v871_v11 }
 0x791   :  { %v944_v44 = vpop.f32.mrf.mxu0 }
 0x792   :  { %v945_v12 = vadd.f32 %v944_v44, %v871_v11  ;;  %v954_v14 = vadd.f32 %v950_v42, %v5031_v38  ;;  %v1000_v11 = vrot.slane %v273_v48, %v5017_v26 }
 0x794   :  { %v958_v46 = vsel %vm217_vm0, %v954_v14, 0.0  ;;  %v953_v15 = vadd.f32 %v945_v12, %v5027_v36  ;;  %v996_v36 = vld [vmem:[%s6040_s10 + $0x18] sm:$0xff] }
 0x795   :  { %959 = vadd.xlane.f32.xlu1 %v958_v46  ;;  %4100 = vmatprep.subr.mxu0 %v996_v36 }
 0x796   :  { %v955_v51 = vsel %vm217_vm0, %v953_v15, 0.0  ;;  %4101 = vmatpush3.msra.mxu0 %v996_v36 }
 0x797   :  { %956 = vadd.xlane.f32.xlu0 %v955_v51  ;;  %4102 = vmatprep.subr.mxu0 %v995_v31 }
 0x798   :  { %4103 = vmatpush3.msra.mxu0 %v995_v31 }
 0x799   :  { %4104 = vmatprep.subr.mxu0 %v994_v32 }
 0x79a   :  { %4105 = vmatpush3.msra.mxu0 %v994_v32 }
 0x79b   :  { %4106 = vmatprep.subr.mxu0 %v993_v33 }
 0x79c   :  { %4107 = vmatpush3.msra.mxu0 %v993_v33 }
 0x7a6   :  { %1201 = vrot.lane.b32.xlu1 %v5300_v45, %s4835_s1 }
 0x7aa   :  { %1199 = vrot.lane.b32.xlu1 %v5298_v43, %s4837_s25 }
 0x7ae   :  { %1197 = vrot.lane.b32.xlu1 %v5300_v45, %s4837_s25 }
 0x7b2   :  { %1193 = vrot.lane.b32.xlu1 %v5300_v45, %s4836_s6 }
 0x81e   :  { %v960_v16 = vpop.xlane.xlu1 %959 }
 0x81f   :  { %v962_v49 = vmul.f32 0.03125, %v960_v16 }
 0x820   :  { %v957_v17 = vpop.xlane.xlu0 %956 }
 0x821   :  { %v961_v19 = vmul.f32 0.03125, %v957_v17  ;;  %v964_v20 = vsub.f32 %v954_v14, %v962_v49 }
 0x822   :  { %v5327_v7 = vpop.permute.xlu1 %1201 }
 0x823   :  { %v963_v21 = vsub.f32 %v953_v15, %v961_v19  ;;  %v966_v29 = vmul.f32 %v964_v20, %v964_v20  ;;  %v243_v15 = vld [vmem:[%s6070_s9] sm:$0x3] }
 0x824   :  { %v244_v51 = vrot.slane %v243_v15, 1 }
 0x825   :  { %v965_v23 = vmul.f32 %v963_v21, %v963_v21  ;;  %v970_v38 = vsel %vm217_vm0, %v966_v29, 0.0 }
 0x826   :  { %v5337_v28 = vpop.permute.xlu1 %1199 }
 0x827   :  { %v967_v24 = vsel %vm217_vm0, %v965_v23, 0.0 }
 0x828   :  { %968 = vadd.xlane.f32.xlu0 %v967_v24 }
 0x82a   :  { %v5345_v9 = vpop.permute.xlu1 %1197 }
 0x82c   :  { %971 = vadd.xlane.f32.xlu0 %v970_v38 }
 0x82e   :  { %v5357_v10 = vpop.permute.xlu1 %1193 }
 0x842   :  { %1203 = vrot.lane.b32.xlu0 %v5298_v43, %s4835_s1 }
 0x846   :  { %1195 = vrot.lane.b32.xlu0 %v5298_v43, %s4836_s6 }
 0x8b1   :  { %v969_v52 = vpop.xlane.xlu0 %968 }
 0x8b2   :  { %v973_v53 = vmul.f32 0.03125, %v969_v52 }
 0x8b4   :  { %v975_v54 = vadd.f32 1e-05, %v973_v53 }
 0x8b5   :  { %v972_v55 = vpop.xlane.xlu0 %971 }
 0x8b6   :  { %4474 = vrsqrt.f32 %v975_v54  ;;  %v974_v57 = vmul.f32 0.03125, %v972_v55 }
 0x8b8   :  { %v976_v59 = vadd.f32 1e-05, %v974_v57 }
 0x8b9   :  { %v5321_v2 = vpop.permute.xlu0 %1203 }
 0x8ba   :  { %4476 = vrsqrt.f32 %v976_v59  ;;  %4122 = vmatprep.subr.msk.mxu0 %vm207_vm1, %v5321_v2 }
 0x8bd   :  { %v5351_v47 = vpop.permute.xlu0 %1195 }
 0x8c3   :  { %v4475_v62 = vpop.eup %4474 }
 0x8c4   :  { %v979_v63 = vmul.f32 %v4475_v62, %v963_v21  ;;  %v238_v62 = vld [vmem:[%s6071_s13 + $0x18] sm:$0xff] }
 0x8c6   :  { %v985_v3 = vmul.f32 %v984_v61, %v979_v63  ;;  %v237_v63 = vld [vmem:[%s6071_s13 + $0x10] sm:$0xff] }
 0x8c7   :  { %v4477_v4 = vpop.eup %4476 }
 0x8c8   :  { %v980_v5 = vmul.f32 %v4477_v4, %v964_v20  ;;  %v5325_v6 = vadd.f32 %v990_v0, %v985_v3  ;;  %v240_v4 = vld [vmem:[%s6071_s13 + $0x28] sm:$0xff] }
 0x8ca   :  { %v986_v8 = vmul.f32 %v984_v61, %v980_v5  ;;  %4108 = vmatprep.mubr.msk.f32.mxu0 %vm217_vm0, %v5325_v6 }
 0x8cc   :  { %v5331_v27 = vadd.f32 %v990_v0, %v986_v8 }
 0x8ce   :  { %4109 = vmatmul.mubr.msk.f32.vlgmr.msra.gmra.mxu0 %vm217_vm0, %v5331_v27 }
 0x8cf   :  { %4123 = vmatpush3.xpose.msk.msra.mxu0 %vm207_vm1, %v5321_v2 }
 0x8d0   :  { %4124 = vmatprep.subr.msk.mxu0 %vm207_vm1, %v5327_v7 }
 0x8d3   :  { %4125 = vmatpush3.xpose.msk.msra.mxu0 %vm207_vm1, %v5327_v7 }
 0x8d4   :  { %4126 = vmatprep.subr.msk.mxu0 %vm207_vm1, %v5337_v28 }
 0x8d7   :  { %4127 = vmatpush3.xpose.msk.msra.mxu0 %vm207_vm1, %v5337_v28 }
 0x8d8   :  { %4128 = vmatprep.subr.msk.mxu0 %vm207_vm1, %v5345_v9 }
 0x8db   :  { %4129 = vmatpush3.xpose.msk.msra.mxu0 %vm207_vm1, %v5345_v9 }
 0x8dc   :  { %4130 = vmatprep.subr.msk.mxu0 %vm207_vm1, %v5351_v47 }
 0x8df   :  { %4131 = vmatpush3.xpose.msk.msra.mxu0 %vm207_vm1, %v5351_v47 }
 0x8e0   :  { %4132 = vmatprep.subr.msk.mxu0 %vm207_vm1, %v5357_v10 }
 0x8e3   :  { %4133 = vmatpush3.xpose.msk.msra.mxu0 %vm207_vm1, %v5357_v10 }
 0x8e4   :  { %4134 = vmatprep.subr.msk.mxu0 %vm207_vm1, %v5298_v43 }
 0x8e7   :  { %4135 = vmatpush3.xpose.msk.msra.mxu0 %vm207_vm1, %v5298_v43 }
 0x8e8   :  { %4136 = vmatprep.subr.msk.mxu0 %vm207_vm1, %v5300_v45 }
 0x8eb   :  { %4137 = vmatpush3.xpose.msk.msra.mxu0 %vm207_vm1, %v5300_v45 }
 0x98e   :  { %v4110_v50 = vpop.f32.mrf.mxu0 }
 0x98f   :  { %v1079_v42 = vadd.f32 %v4110_v50, %v1000_v11 }
 0x990   :  { %v1073_v44 = vpop.f32.mrf.mxu0 }
 0x991   :  { %v1176_v12 = vmul.f32 0.35355338, %v1079_v42  ;;  %v1074_v14 = vadd.f32 %v1073_v44, %v1000_v11  ;;  %v239_v11 = vld [vmem:[%s6071_s13 + $0x20] sm:$0xff] }
 0x993   :  { %v1175_v46 = vmul.f32 0.35355338, %v1074_v14  ;;  %1181 = vrot.lane.b32.xlu1 %v1176_v12, %s4836_s6  ;;  %v242_v14 = vld [vmem:[%s6071_s13 + $0x38] sm:$0xff] }
 0x995   :  { %1179 = vrot.lane.b32.xlu0 %v1175_v46, %s4836_s6  ;;  %4138 = vmatprep.mubr.msk.f32.mxu0 %vm207_vm1, %v1175_v46 }
 0x996   :  { %4139 = vmatmul.mubr.msk.f32.vlgmr.msra.gmra.mxu0 %vm207_vm1, %v1176_v12 }
 0x997   :  { %1185 = vrot.lane.b32.xlu1 %v1176_v12, %s4837_s25 }
 0x999   :  { %1183 = vrot.lane.b32.xlu0 %v1175_v46, %s4837_s25 }
 0x99b   :  { %1189 = vrot.lane.b32.xlu1 %v1176_v12, %s4835_s1 }
 0x99d   :  { %1187 = vrot.lane.b32.xlu0 %v1175_v46, %s4835_s1 }
 0x9a1   :  { %245 = vrot.lane.b32.xlu0 %v244_v51, %s4826_s24 }
 0xa05   :  { %v1182_v16 = vpop.permute.xlu1 %1181 }
 0xa07   :  { %v1180_v49 = vpop.permute.xlu0 %1179 }
 0xa08   :  { %4141 = vmatprep.mubr.msk.f32.mxu0 %vm207_vm1, %v1180_v49 }
 0xa09   :  { %4142 = vmatmul.mubr.msk.f32.gmra.mxu0 %vm207_vm1, %v1182_v16  ;;  %v1186_v17 = vpop.permute.xlu1 %1185  ;;  %v241_v16 = vld [vmem:[%s6071_s13 + $0x30] sm:$0xff] }
 0xa0b   :  { %v1184_v19 = vpop.permute.xlu0 %1183 }
 0xa0c   :  { %4144 = vmatprep.mubr.msk.f32.mxu0 %vm207_vm1, %v1184_v19 }
 0xa0d   :  { %4145 = vmatmul.mubr.msk.f32.gmra.mxu0 %vm207_vm1, %v1186_v17  ;;  %v1190_v21 = vpop.permute.xlu1 %1189 }
 0xa0f   :  { %v1188_v20 = vpop.permute.xlu0 %1187 }
 0xa10   :  { %4147 = vmatprep.mubr.msk.f32.mxu0 %vm207_vm1, %v1188_v20 }
 0xa11   :  { %4148 = vmatmul.mubr.msk.f32.gmra.mxu0 %vm207_vm1, %v1190_v21 }
 0xa13   :  { %v246_v23 = vpop.permute.xlu0 %245 }
 0xa14   :  { %v247_v24 = vsel %vm207_vm1, %v243_v15, %v246_v23 }
 0xa15   :  { %248 = vrot.lane.b32.xlu1 %v247_v24, %s4839_s26  ;;  %250 = vrot.lane.b32.xlu0 %v247_v24, %s4840_s20 }
 0xa19   :  { %252 = vrot.lane.b32.xlu1 %v247_v24, %s4841_s19 }
 0xa56   :  { %v4140_v34 = vpop.f32.mrf.mxu0 }
 0xa58   :  { %v1303_v55 = vpop.f32.mrf.mxu0 }
 0xa87   :  { %v249_v29 = vpop.permute.xlu1 %248  ;;  %v251_v36 = vpop.permute.xlu0 %250 }
 0xa88   :  { %v254_v38 = vsel %vm215_vm2, %v247_v24, %v249_v29 }
 0xa89   :  { %v255_v31 = vsel %vm217_vm0, %v254_v38, %v251_v36 }
 0xa8b   :  { %v253_v32 = vpop.permute.xlu1 %252 }
 0xa8c   :  { %v256_v33 = vsel %vm219_vm3, %v255_v31, %v253_v32 }
 0xa8d   :  { %vm257_vm7 = vcmp.ne.s32.totalorder %v256_v33, 0 }
 0xa8e   :  { %v258_v35 = vsel %vm257_vm7, -1e+09, %v4842_v13 }
 0xa8f   :  { %v262_v52 = vrot.slane %v258_v35, %v5017_v26 }
 0xa91   :  { %v5407_v53 = vadd.f32 %v262_v52, %v236_v37  ;;  %v5409_v54 = vadd.f32 %v262_v52, %v235_v41  ;;  %v5421_v0 = vadd.f32 %v262_v52, %v238_v62  ;;  %v5427_v8 = vadd.f32 %v262_v52, %v237_v63 }
 0xa92   :  { %v5433_v42 = vadd.f32 %v262_v52, %v240_v4  ;;  %v5440_v15 = vadd.f32 %v262_v52, %v239_v11  ;;  %v5446_v17 = vadd.f32 %v262_v52, %v242_v14  ;;  %v5451_v24 = vadd.f32 %v262_v52, %v241_v16 }
 0xa93   :  { %v1309_v57 = vadd.f32 %v4140_v34, %v5407_v53  ;;  %v1304_v59 = vadd.f32 %v1303_v55, %v5409_v54 }
 0xa95   :  { %v1345_v13 = vsel %vm595_vm5, %v1309_v57, -inf  ;;  %v1342_v61 = vsel %vm595_vm5, %v1304_v59, -inf }
 0xa96   :  { %1346 = vmax.xlane.f32.xlu1 %v1345_v13  ;;  %1343 = vmax.xlane.f32.xlu0 %v1342_v61 }
 0xac9   :  { %v4143_v3 = vpop.f32.mrf.mxu0 }
 0xaca   :  { %v1319_v5 = vadd.f32 %v4143_v3, %v5421_v0 }
 0xacb   :  { %v1313_v48 = vpop.f32.mrf.mxu0 }
 0xacc   :  { %v1314_v50 = vadd.f32 %v1313_v48, %v5427_v8  ;;  %v1351_v44 = vsel %vm595_vm5, %v1319_v5, -inf }
 0xacd   :  { %v4146_v12 = vpop.f32.mrf.mxu0  ;;  %1352 = vmax.xlane.f32.xlu0 %v1351_v44 }
 0xace   :  { %v1329_v46 = vadd.f32 %v4146_v12, %v5433_v42  ;;  %v1348_v20 = vsel %vm595_vm5, %v1314_v50, -inf }
 0xacf   :  { %v1323_v51 = vpop.f32.mrf.mxu0 }
 0xad0   :  { %v1324_v49 = vadd.f32 %v1323_v51, %v5440_v15  ;;  %v1357_v19 = vsel %vm595_vm5, %v1329_v46, -inf }
 0xad1   :  { %v4149_v21 = vpop.f32.mrf.mxu0  ;;  %1358 = vmax.xlane.f32.xlu1 %v1357_v19  ;;  %1349 = vmax.xlane.f32.xlu0 %v1348_v20 }
 0xad2   :  { %v1339_v23 = vadd.f32 %v4149_v21, %v5446_v17  ;;  %v1354_v31 = vsel %vm595_vm5, %v1324_v49, -inf }
 0xad3   :  { %v1333_v29 = vpop.f32.mrf.mxu0 }
 0xad4   :  { %v1334_v38 = vadd.f32 %v1333_v29, %v5451_v24  ;;  %v1363_v36 = vsel %vm595_vm5, %v1339_v23, -inf }
 0xad5   :  { %1364 = vmax.xlane.f32.xlu1 %v1363_v36  ;;  %1355 = vmax.xlane.f32.xlu0 %v1354_v31 }
 0xad6   :  { %v1360_v32 = vsel %vm595_vm5, %v1334_v38, -inf }
 0xad9   :  { %1361 = vmax.xlane.f32.xlu0 %v1360_v32 }
 0xae6   :  { %1442 = vrot.lane.b32.xlu1 %v5327_v7, %s4838_s15 }
 0xaea   :  { %1440 = vrot.lane.b32.xlu1 %v5337_v28, %s4838_s15 }
 0xaee   :  { %1438 = vrot.lane.b32.xlu1 %v5345_v9, %s4838_s15 }
 0xaef   :  { %1444 = vrot.lane.b32.xlu0 %v5321_v2, %s4838_s15 }
 0xaf2   :  { %1434 = vrot.lane.b32.xlu1 %v5357_v10, %s4838_s15 }
 0xaf3   :  { %1436 = vrot.lane.b32.xlu0 %v5351_v47, %s4838_s15 }
 0xb1f   :  { %v1347_v33 = vpop.xlane.xlu1 %1346  ;;  %v1344_v34 = vpop.xlane.xlu0 %1343 }
 0xb20   :  { %v1367_v35 = vsub.f32 %v1309_v57, %v1347_v33  ;;  %v1366_v37 = vsub.f32 %v1304_v59, %v1344_v34 }
 0xb22   :  { %v1376_v7 = vmul.f32 1.442695, %v1367_v35  ;;  %v1374_v41 = vmul.f32 1.442695, %v1366_v37 }
 0xb24   :  { %4478 = vpow2.f32 %v1376_v7 }
 0xb25   :  { %4480 = vpow2.f32 %v1374_v41 }
 0xb31   :  { %v5469_v28 = vpop.eup %4478 }
 0xb32   :  { %v5471_v9 = vpop.eup %4480  ;;  %v1393_v2 = vsel %vm595_vm5, %v5469_v28, 0.0 }
 0xb33   :  { %1394 = vadd.xlane.f32.xlu1 %v1393_v2  ;;  %v1390_v10 = vsel %vm595_vm5, %v5471_v9, 0.0 }
 0xb34   :  { %1391 = vadd.xlane.f32.xlu0 %v1390_v10 }
 0xb56   :  { %v1353_v47 = vpop.xlane.xlu0 %1352 }
 0xb57   :  { %v1369_v52 = vsub.f32 %v1319_v5, %v1353_v47 }
 0xb59   :  { %v1380_v55 = vmul.f32 1.442695, %v1369_v52 }
 0xb5a   :  { %v1359_v57 = vpop.xlane.xlu1 %1358  ;;  %v1350_v59 = vpop.xlane.xlu0 %1349 }
 0xb5b   :  { %4482 = vpow2.f32 %v1380_v55  ;;  %v1371_v13 = vsub.f32 %v1329_v46, %v1359_v57  ;;  %v1368_v61 = vsub.f32 %v1314_v50, %v1350_v59 }
 0xb5d   :  { %v1384_v62 = vmul.f32 1.442695, %v1371_v13  ;;  %v1378_v63 = vmul.f32 1.442695, %v1368_v61 }
 0xb5e   :  { %v1365_v3 = vpop.xlane.xlu1 %1364  ;;  %v1356_v4 = vpop.xlane.xlu0 %1355 }
 0xb5f   :  { %4484 = vpow2.f32 %v1384_v62  ;;  %v1373_v48 = vsub.f32 %v1339_v23, %v1365_v3  ;;  %v1370_v11 = vsub.f32 %v1324_v49, %v1356_v4 }
 0xb60   :  { %4486 = vpow2.f32 %v1378_v63 }
 0xb61   :  { %v1388_v44 = vmul.f32 1.442695, %v1373_v48  ;;  %v1382_v12 = vmul.f32 1.442695, %v1370_v11 }
 0xb62   :  { %v1443_v14 = vpop.permute.xlu1 %1442  ;;  %v1362_v51 = vpop.xlane.xlu0 %1361 }
 0xb63   :  { %4488 = vpow2.f32 %v1388_v44  ;;  %v1372_v5 = vsub.f32 %v1334_v38, %v1362_v51 }
 0xb64   :  { %4490 = vpow2.f32 %v1382_v12 }
 0xb65   :  { %v1386_v16 = vmul.f32 1.442695, %v1372_v5 }
 0xb66   :  { %v1441_v19 = vpop.permute.xlu1 %1440  ;;  %v1445_v20 = vpop.permute.xlu0 %1444 }
 0xb67   :  { %4492 = vpow2.f32 %v1386_v16  ;;  %4150 = vmatprep.subr.mxu1 %v1445_v20 }
 0xb68   :  { %v5477_v50 = vpop.eup %4482  ;;  %4151 = vmatpush3.msra.mxu1 %v1445_v20  ;;  %v1173_v20 = vld [vmem:[#allocation7 + $0x10] sm:$0xff] }
 0xb69   :  { %4152 = vmatprep.subr.mxu1 %v1443_v14  ;;  %v1399_v46 = vsel %vm595_vm5, %v5477_v50, 0.0 }
 0xb6a   :  { %v1439_v49 = vpop.permute.xlu1 %1438  ;;  %1400 = vadd.xlane.f32.xlu1 %v1399_v46  ;;  %4153 = vmatpush3.msra.mxu1 %v1443_v14  ;;  %v1437_v38 = vpop.permute.xlu0 %1436  ;;  %v1171_v46 = vld [vmem:[#allocation7] sm:$0xff] }
 0xb6b   :  { %4154 = vmatprep.subr.mxu1 %v1441_v19 }
 0xb6c   :  { %v5481_v21 = vpop.eup %4484  ;;  %4155 = vmatpush3.msra.mxu1 %v1441_v19  ;;  %v1174_v19 = vld [vmem:[#allocation7 + $0x18] sm:$0xff] }
 0xb6d   :  { %v4487_v23 = vpop.eup %4486  ;;  %4156 = vmatprep.subr.mxu1 %v1439_v49  ;;  %v1405_v29 = vsel %vm595_vm5, %v5481_v21, 0.0 }
 0xb6e   :  { %1406 = vadd.xlane.f32.xlu1 %v1405_v29  ;;  %v1396_v36 = vsel %vm595_vm5, %v4487_v23, 0.0  ;;  %4157 = vmatpush3.msra.mxu1 %v1439_v49  ;;  %v1435_v32 = vpop.permute.xlu1 %1434 }
 0xb6f   :  { %1397 = vadd.xlane.f32.xlu0 %v1396_v36  ;;  %4158 = vmatprep.subr.mxu1 %v1437_v38 }
 0xb70   :  { %v4489_v31 = vpop.eup %4488  ;;  %4159 = vmatpush3.msra.mxu1 %v1437_v38 }
 0xb71   :  { %v4491_v33 = vpop.eup %4490  ;;  %4160 = vmatprep.subr.mxu1 %v1435_v32  ;;  %v1411_v34 = vsel %vm595_vm5, %v4489_v31, 0.0 }
 0xb72   :  { %1412 = vadd.xlane.f32.xlu1 %v1411_v34  ;;  %v1402_v35 = vsel %vm595_vm5, %v4491_v33, 0.0  ;;  %4161 = vmatpush3.msra.mxu1 %v1435_v32 }
 0xb73   :  { %1403 = vadd.xlane.f32.xlu0 %v1402_v35 }
 0xb74   :  { %v4493_v37 = vpop.eup %4492 }
 0xb75   :  { %v1408_v7 = vsel %vm595_vm5, %v4493_v37, 0.0 }
 0xb77   :  { %1409 = vadd.xlane.f32.xlu0 %v1408_v7 }
 0xb83   :  { %1430 = vrot.lane.b32.xlu1 %v5300_v45, %s4838_s15 }
 0xb8d   :  { %1432 = vrot.lane.b32.xlu0 %v5298_v43, %s4838_s15 }
 0xbbc   :  { %v1395_v47 = vpop.xlane.xlu1 %1394 }
 0xbbd   :  { %v1392_v41 = vpop.xlane.xlu0 %1391 }
 0xbbe   :  { %4494 = vrcp.f32 %v1392_v41 }
 0xbbf   :  { %4496 = vrcp.f32 %v1395_v47 }
 0xbcb   :  { %v4495_v2 = vpop.eup %4494 }
 0xbcc   :  { %v1415_v10 = vmul.f32 %v4495_v2, %v5471_v9  ;;  %v4497_v43 = vpop.eup %4496 }
 0xbcd   :  { %v1417_v63 = vmul.f32 %v4497_v43, %v5469_v28 }
 0xbce   :  { %4166 = vmatprep.mubr.msk.f32.mxu1 %vm595_vm5, %v1415_v10 }
 0xbf3   :  { %v1401_v52 = vpop.xlane.xlu1 %1400 }
 0xbf7   :  { %v1407_v57 = vpop.xlane.xlu1 %1406 }
 0xbf8   :  { %v1398_v55 = vpop.xlane.xlu0 %1397 }
 0xbf9   :  { %4498 = vrcp.f32 %v1398_v55 }
 0xbfa   :  { %4500 = vrcp.f32 %v1401_v52 }
 0xbfb   :  { %v1413_v45 = vpop.xlane.xlu1 %1412 }
 0xbfc   :  { %v1404_v59 = vpop.xlane.xlu0 %1403 }
 0xbfd   :  { %4502 = vrcp.f32 %v1404_v59  ;;  %v275_v59 = vld [vmem:[#allocation9] sm:$0x3] }
 0xbfe   :  { %4504 = vrcp.f32 %v1407_v57 }
 0xbff   :  { %v1431_v62 = vpop.permute.xlu1 %1430 }
 0xc00   :  { %v1410_v13 = vpop.xlane.xlu0 %1409 }
 0xc01   :  { %4506 = vrcp.f32 %v1410_v13 }
 0xc02   :  { %4508 = vrcp.f32 %v1413_v45  ;;  %v1616_v45 = vrot.slane %v275_v59, %v5017_v26 }
 0xc04   :  { %v1433_v61 = vpop.permute.xlu0 %1432 }
 0xc05   :  { %4162 = vmatprep.subr.mxu1 %v1433_v61 }
 0xc06   :  { %v4499_v9 = vpop.eup %4498  ;;  %4163 = vmatpush3.msra.mxu1 %v1433_v61 }
 0xc07   :  { %4164 = vmatprep.subr.mxu1 %v1431_v62  ;;  %v1419_v3 = vmul.f32 %v4499_v9, %v4487_v23  ;;  %v4501_v4 = vpop.eup %4500 }
 0xc08   :  { %4165 = vmatpush3.msra.mxu1 %v1431_v62  ;;  %v1421_v11 = vmul.f32 %v4501_v4, %v5477_v50  ;;  %v1172_v50 = vld [vmem:[#allocation7 + $0x8] sm:$0xff] }
 0xc09   :  { %4167 = vmatmul.mubr.msk.f32.vlgmr.msra.gmra.mxu1 %vm595_vm5, %v1417_v63  ;;  %4178 = vmatprep.subr.mxu1 %v1174_v19 }
 0xc0a   :  { %v4503_v48 = vpop.eup %4502  ;;  %4169 = vmatprep.mubr.msk.f32.mxu1 %vm595_vm5, %v1419_v3  ;;  %4179 = vmatpush3.msra.mxu1 %v1174_v19  ;;  %v1740_v19 = vld [vmem:[#allocation10 + $0x10] sm:$0xff] }
 0xc0b   :  { %v1423_v44 = vmul.f32 %v4503_v48, %v4491_v33  ;;  %v4505_v12 = vpop.eup %4504  ;;  %4180 = vmatprep.subr.mxu1 %v1173_v20 }
 0xc0c   :  { %v1425_v51 = vmul.f32 %v4505_v12, %v5481_v21  ;;  %4181 = vmatpush3.msra.mxu1 %v1173_v20  ;;  %v1739_v20 = vld [vmem:[#allocation10 + $0x8] sm:$0xff] }
 0xc0d   :  { %4170 = vmatmul.mubr.msk.f32.gmra.mxu1 %vm595_vm5, %v1421_v11  ;;  %4182 = vmatprep.subr.mxu1 %v1172_v50 }
 0xc0e   :  { %v4507_v14 = vpop.eup %4506  ;;  %4172 = vmatprep.mubr.msk.f32.mxu1 %vm595_vm5, %v1423_v44  ;;  %4183 = vmatpush3.msra.mxu1 %v1172_v50  ;;  %v1738_v50 = vld [vmem:[#allocation10] sm:$0xff] }
 0xc0f   :  { %v1427_v28 = vmul.f32 %v4507_v14, %v4493_v37  ;;  %v4509_v5 = vpop.eup %4508  ;;  %4184 = vmatprep.subr.mxu1 %v1171_v46 }
 0xc10   :  { %v1429_v16 = vmul.f32 %v4509_v5, %v4489_v31  ;;  %4185 = vmatpush3.msra.mxu1 %v1171_v46  ;;  %v1836_v46 = vld [vmem:[%s6048_s18 + $0x38] sm:$0xff] }
 0xc11   :  { %4173 = vmatmul.mubr.msk.f32.gmra.mxu1 %vm595_vm5, %v1425_v51  ;;  %4200 = vmatprep.subr.mxu0 %v1836_v46 }
 0xc12   :  { %4175 = vmatprep.mubr.msk.f32.mxu1 %vm595_vm5, %v1427_v28  ;;  %4201 = vmatpush3.msra.mxu0 %v1836_v46 }
 0xc15   :  { %4176 = vmatmul.mubr.msk.f32.gmra.mxu1 %vm595_vm5, %v1429_v16 }
 0xcc9   :  { %v4168_v49 = vpop.f32.mrf.mxu1 }
 0xccb   :  { %v1544_v21 = vpop.f32.mrf.mxu1 }
 0xccd   :  { %v4171_v23 = vpop.f32.mrf.mxu1 }
 0xcce   :  { %1587 = vrot.lane.b32.xlu1 %v4171_v23, %s4826_s24  ;;  %v1833_v23 = vld [vmem:[%s6048_s18 + $0x20] sm:$0xff] }
 0xccf   :  { %v1554_v29 = vpop.f32.mrf.mxu1 }
 0xcd0   :  { %1585 = vrot.lane.b32.xlu0 %v1554_v29, %s4826_s24  ;;  %v1832_v29 = vld [vmem:[%s6048_s18 + $0x18] sm:$0xff] }
 0xcd1   :  { %v4174_v38 = vpop.f32.mrf.mxu1 }
 0xcd2   :  { %1595 = vrot.lane.b32.xlu1 %v4174_v38, %s4839_s26 }
 0xcd3   :  { %v1564_v36 = vpop.f32.mrf.mxu1 }
 0xcd4   :  { %1593 = vrot.lane.b32.xlu0 %v1564_v36, %s4839_s26 }
 0xcd5   :  { %v4177_v31 = vpop.f32.mrf.mxu1 }
 0xcd6   :  { %1603 = vrot.lane.b32.xlu1 %v4177_v31, %s4844_s30 }
 0xcd7   :  { %v1574_v32 = vpop.f32.mrf.mxu1 }
 0xcd8   :  { %1601 = vrot.lane.b32.xlu0 %v1574_v32, %s4844_s30 }
 0xd40   :  { %v1588_v33 = vpop.permute.xlu1 %1587 }
 0xd41   :  { %v1608_v2 = vsel %vm207_vm1, %v4168_v49, %v1588_v33  ;;  %v1835_v49 = vld [vmem:[%s6048_s18 + $0x30] sm:$0xff] }
 0xd42   :  { %v1586_v34 = vpop.permute.xlu0 %1585  ;;  %4202 = vmatprep.subr.mxu0 %v1835_v49 }
 0xd43   :  { %v1607_v7 = vsel %vm207_vm1, %v1544_v21, %v1586_v34  ;;  %v1834_v21 = vld [vmem:[%s6048_s18 + $0x28] sm:$0xff]  ;;  %4203 = vmatpush3.msra.mxu0 %v1835_v49 }
 0xd44   :  { %v1596_v35 = vpop.permute.xlu1 %1595  ;;  %4204 = vmatprep.subr.mxu0 %v1834_v21 }
 0xd45   :  { %v1610_v52 = vsel %vm215_vm2, %v1608_v2, %v1596_v35  ;;  %4205 = vmatpush3.msra.mxu0 %v1834_v21  ;;  %v1728_v35 = vsub.s32 2, %v5014_v25 }
 0xd46   :  { %v1594_v37 = vpop.permute.xlu0 %1593  ;;  %4206 = vmatprep.subr.mxu0 %v1833_v23 }
 0xd47   :  { %v1609_v10 = vsel %vm215_vm2, %v1607_v7, %v1594_v37  ;;  %4207 = vmatpush3.msra.mxu0 %v1833_v23  ;;  %v5542_v37 = vld [vmem:[#allocation15] sm:$0xff] }
 0xd48   :  { %v1604_v41 = vpop.permute.xlu1 %1603  ;;  %4208 = vmatprep.subr.mxu0 %v1832_v29  ;;  %v1729_v7 = vrot.slane %v5542_v37, %v1728_v35 }
 0xd49   :  { %v1612_v57 = vsel %vm865_vm6, %v1610_v52, %v1604_v41  ;;  %4209 = vmatpush3.msra.mxu0 %v1832_v29 }
 0xd4a   :  { %v1602_v47 = vpop.permute.xlu0 %1601 }
 0xd4b   :  { %v1611_v55 = vsel %vm865_vm6, %v1609_v10, %v1602_v47  ;;  %v5545_v10 = vld [vmem:[#allocation16] sm:$0xff] }
 0xd4c   :  { %4186 = vmatprep.mubr.msk.f32.mxu1 %vm217_vm0, %v1611_v55  ;;  %v1735_v47 = vrot.slane %v5545_v10, %v1728_v35  ;;  %v3717_v35 = vld [vmem:[%s6066_s28 + $0x28] sm:$0xff] }
 0xd4d   :  { %4187 = vmatmul.mubr.msk.f32.vlgmr.msra.gmra.mxu1 %vm217_vm0, %v1612_v57 }
 0xe0d   :  { %v4188_v13 = vpop.f32.mrf.mxu1 }
 0xe0e   :  { %v1695_v43 = vadd.f32 %v4188_v13, %v1616_v45 }
 0xe0f   :  { %v1689_v61 = vpop.f32.mrf.mxu1 }
 0xe10   :  { %v1699_v9 = vadd.f32 %v1695_v43, %v5331_v27  ;;  %v1690_v62 = vadd.f32 %v1689_v61, %v1616_v45  ;;  %v1831_v43 = vld [vmem:[%s6048_s18 + $0x10] sm:$0xff]  ;;  %v1830_v61 = vld [vmem:[%s6048_s18 + $0x8] sm:$0xff] }
 0xe11   :  { %4210 = vmatprep.subr.mxu0 %v1831_v43 }
 0xe12   :  { %v1698_v63 = vadd.f32 %v1690_v62, %v5325_v6  ;;  %v1703_v3 = vsel %vm217_vm0, %v1699_v9, 0.0  ;;  %v1741_v6 = vld [vmem:[#allocation10 + $0x18] sm:$0xff]  ;;  %4211 = vmatpush3.msra.mxu0 %v1831_v43  ;;  %v276_v62 = vld [vmem:[#allocation12] sm:$0x3] }
 0xe13   :  { %1704 = vadd.xlane.f32.xlu1 %v1703_v3  ;;  %4189 = vmatprep.subr.mxu1 %v1741_v6 }
 0xe14   :  { %v1700_v4 = vsel %vm217_vm0, %v1698_v63, 0.0  ;;  %4190 = vmatpush3.msra.mxu1 %v1741_v6  ;;  %4212 = vmatprep.subr.mxu0 %v1830_v61 }
 0xe15   :  { %1701 = vadd.xlane.f32.xlu0 %v1700_v4  ;;  %4191 = vmatprep.subr.mxu1 %v1740_v19 }
 0xe16   :  { %4192 = vmatpush3.msra.mxu1 %v1740_v19  ;;  %4213 = vmatpush3.msra.mxu0 %v1830_v61 }
 0xe17   :  { %4193 = vmatprep.subr.mxu1 %v1739_v20 }
 0xe18   :  { %4194 = vmatpush3.msra.mxu1 %v1739_v20 }
 0xe19   :  { %4195 = vmatprep.subr.mxu1 %v1738_v50 }
 0xe1a   :  { %4196 = vmatpush3.msra.mxu1 %v1738_v50 }
 0xe9c   :  { %v1705_v48 = vpop.xlane.xlu1 %1704 }
 0xe9d   :  { %v1707_v11 = vmul.f32 0.03125, %v1705_v48 }
 0xe9e   :  { %v1702_v44 = vpop.xlane.xlu0 %1701 }
 0xe9f   :  { %v1706_v12 = vmul.f32 0.03125, %v1702_v44  ;;  %v1709_v14 = vsub.f32 %v1699_v9, %v1707_v11  ;;  %v1829_v9 = vld [vmem:[%s6048_s18] sm:$0xff] }
 0xea0   :  { %4214 = vmatprep.subr.mxu0 %v1829_v9 }
 0xea1   :  { %v1708_v51 = vsub.f32 %v1698_v63, %v1706_v12  ;;  %v1711_v16 = vmul.f32 %v1709_v14, %v1709_v14  ;;  %4215 = vmatpush3.msra.mxu0 %v1829_v9  ;;  %v1745_v63 = vrot.slane %v276_v62, %v5017_v26 }
 0xea3   :  { %v1710_v28 = vmul.f32 %v1708_v51, %v1708_v51  ;;  %v1715_v27 = vsel %vm217_vm0, %v1711_v16, 0.0 }
 0xea5   :  { %v1712_v5 = vsel %vm217_vm0, %v1710_v28, 0.0 }
 0xea6   :  { %1713 = vadd.xlane.f32.xlu0 %v1712_v5 }
 0xeaa   :  { %1716 = vadd.xlane.f32.xlu0 %v1715_v27 }
 0xf2f   :  { %v1714_v38 = vpop.xlane.xlu0 %1713 }
 0xf30   :  { %v1718_v36 = vmul.f32 0.03125, %v1714_v38 }
 0xf32   :  { %v1720_v31 = vadd.f32 1e-05, %v1718_v36 }
 0xf33   :  { %v1717_v32 = vpop.xlane.xlu0 %1716 }
 0xf34   :  { %4510 = vrsqrt.f32 %v1720_v31  ;;  %v1719_v33 = vmul.f32 0.03125, %v1717_v32 }
 0xf36   :  { %v1721_v34 = vadd.f32 1e-05, %v1719_v33  ;;  %v3719_v33 = vld [vmem:[%s6066_s28 + $0x38] sm:$0xff] }
 0xf37   :  { %4219 = vmatprep.subr.mxu1 %v3719_v33 }
 0xf38   :  { %4512 = vrsqrt.f32 %v1721_v34  ;;  %v3718_v34 = vld [vmem:[%s6066_s28 + $0x30] sm:$0xff] }
 0xf41   :  { %v4511_v41 = vpop.eup %4510 }
 0xf42   :  { %v1724_v2 = vmul.f32 %v4511_v41, %v1708_v51 }
 0xf44   :  { %v1730_v52 = vmul.f32 %v1729_v7, %v1724_v2 }
 0xf45   :  { %v4513_v55 = vpop.eup %4512 }
 0xf46   :  { %v1725_v57 = vmul.f32 %v4513_v55, %v1709_v14  ;;  %v1736_v59 = vadd.f32 %v1735_v47, %v1730_v52  ;;  %v277_v14 = vld [vmem:[#allocation13] sm:$0x3] }
 0xf47   :  { %v1840_v51 = vrot.slane %v277_v14, %v5017_v26 }
 0xf48   :  { %v1731_v45 = vmul.f32 %v1729_v7, %v1725_v57  ;;  %4197 = vmatprep.mubr.msk.f32.mxu1 %vm217_vm0, %v1736_v59  ;;  %v3716_v7 = vld [vmem:[%s6066_s28 + $0x20] sm:$0xff] }
 0xf4a   :  { %v1737_v13 = vadd.f32 %v1735_v47, %v1731_v45 }
 0xf4c   :  { %4198 = vmatmul.mubr.msk.f32.vlgmr.msra.gmra.mxu1 %vm217_vm0, %v1737_v13 }
 0xf4d   :  { %4220 = vmatpush3.msra.mxu1 %v3719_v33 }
 0xf4e   :  { %4221 = vmatprep.subr.mxu1 %v3718_v34 }
 0xf4f   :  { %4222 = vmatpush3.msra.mxu1 %v3718_v34 }
 0xf50   :  { %4223 = vmatprep.subr.mxu1 %v3717_v35 }
 0xf51   :  { %4224 = vmatpush3.msra.mxu1 %v3717_v35 }
 0xf52   :  { %4225 = vmatprep.subr.mxu1 %v3716_v7 }
 0xf53   :  { %4226 = vmatpush3.msra.mxu1 %v3716_v7 }
0x100c   :  { %v4199_v3 = vpop.f32.mrf.mxu1 }
0x100d   :  { %v1824_v4 = vadd.f32 %v4199_v3, %v1745_v63 }
0x100e   :  { %v1818_v48 = vpop.f32.mrf.mxu1 }
0x100f   :  { %v1819_v11 = vadd.f32 %v1818_v48, %v1745_v63  ;;  %v1828_v12 = vmax.f32 %v1824_v4, 0.0 }
0x1011   :  { %v1827_v44 = vmax.f32 %v1819_v11, 0.0  ;;  %v4600_v11 = vld [vmem:[%s6037_s7] sm:$0x3] }
0x1013   :  { %4216 = vmatprep.mubr.msk.f32.mxu0 %vm595_vm5, %v1827_v44  ;;  %v1970_v44 = vrot.slane %v4600_v11, %v5315_v60 }
0x1014   :  { %4217 = vmatmul.mubr.msk.f32.vlgmr.msra.gmra.mxu0 %vm595_vm5, %v1828_v12 }
0x10d4   :  { %v4218_v28 = vpop.f32.mrf.mxu0 }
0x10d5   :  { %v1919_v5 = vadd.f32 %v4218_v28, %v1840_v51 }
0x10d6   :  { %v1913_v16 = vpop.f32.mrf.mxu0 }
0x10d7   :  { %v1923_v27 = vadd.f32 %v1919_v5, %v1737_v13  ;;  %v1914_v6 = vadd.f32 %v1913_v16, %v1840_v51 }
0x10d9   :  { %v1922_v19 = vadd.f32 %v1914_v6, %v1736_v59  ;;  %v1927_v20 = vsel %vm217_vm0, %v1923_v27, 0.0  ;;  %v1952_v59 = vsub.s32 3, %v5014_v25 }
0x10da   :  { %1928 = vadd.xlane.f32.xlu1 %v1927_v20 }
0x10db   :  { %v1924_v50 = vsel %vm217_vm0, %v1922_v19, 0.0  ;;  %v1953_v13 = vrot.slane %v5542_v37, %v1952_v59  ;;  %v1959_v63 = vrot.slane %v5545_v10, %v1952_v59 }
0x10dc   :  { %1925 = vadd.xlane.f32.xlu0 %v1924_v50 }
0x1163   :  { %v1929_v46 = vpop.xlane.xlu1 %1928 }
0x1164   :  { %v1931_v49 = vmul.f32 0.03125, %v1929_v46 }
0x1165   :  { %v1926_v21 = vpop.xlane.xlu0 %1925 }
0x1166   :  { %v1933_v23 = vsub.f32 %v1923_v27, %v1931_v49  ;;  %v1930_v29 = vmul.f32 0.03125, %v1926_v21 }
0x1168   :  { %v1932_v38 = vsub.f32 %v1922_v19, %v1930_v29  ;;  %v1935_v36 = vmul.f32 %v1933_v23, %v1933_v23 }
0x116a   :  { %v1939_v26 = vsel %vm217_vm0, %v1935_v36, 0.0  ;;  %v1934_v31 = vmul.f32 %v1932_v38, %v1932_v38 }
0x116b   :  { %1940 = vadd.xlane.f32.xlu1 %v1939_v26 }
0x116c   :  { %v1936_v32 = vsel %vm217_vm0, %v1934_v31, 0.0 }
0x116d   :  { %1937 = vadd.xlane.f32.xlu0 %v1936_v32 }
0x11f4   :  { %v1941_v41 = vpop.xlane.xlu1 %1940 }
0x11f5   :  { %v1943_v2 = vmul.f32 0.03125, %v1941_v41 }
0x11f6   :  { %v1938_v47 = vpop.xlane.xlu0 %1937 }
0x11f7   :  { %v1945_v52 = vadd.f32 1e-05, %v1943_v2  ;;  %v1942_v55 = vmul.f32 0.03125, %v1938_v47  ;;  %v4601_v2 = vld [vmem:[%s6069_s3] sm:$0xff] }
0x11f9   :  { %4514 = vrsqrt.f32 %v1945_v52  ;;  %v1944_v57 = vadd.f32 1e-05, %v1942_v55 }
0x11fb   :  { %4516 = vrsqrt.f32 %v1944_v57 }
0x1206   :  { %v4515_v45 = vpop.eup %4514 }
0x1207   :  { %v1949_v43 = vmul.f32 %v4515_v45, %v1933_v23 }
0x1208   :  { %v4517_v61 = vpop.eup %4516 }
0x1209   :  { %v1948_v9 = vmul.f32 %v4517_v61, %v1932_v38  ;;  %v1955_v62 = vmul.f32 %v1953_v13, %v1949_v43 }
0x120b   :  { %v1954_v3 = vmul.f32 %v1953_v13, %v1948_v9  ;;  %v5584_v48 = vadd.f32 %v1959_v63, %v1955_v62 }
0x120d   :  { %v5582_v4 = vadd.f32 %v1959_v63, %v1954_v3 }
0x120f   :  { %4227 = vmatprep.mubr.msk.f32.mxu1 %vm217_vm0, %v5582_v4 }
0x1210   :  { %4228 = vmatmul.mubr.msk.f32.vlgmr.msra.gmra.mxu1 %vm217_vm0, %v5584_v48 }
0x12d0   :  { %v4229_v12 = vpop.f32.mrf.mxu1 }
0x12d1   :  { %v5594_v14 = vadd.f32 %v4229_v12, %v1970_v44 }
0x12d2   :  { %v2043_v51 = vpop.f32.mrf.mxu1 }
0x12d3   :  { %v5596_v28 = vadd.f32 %v2043_v51, %v1970_v44  ;;  %2085 = vrot.lane.b32.xlu0 %v5594_v14, %s4835_s1  ;;  %v2058_v46 = vmul.f32 0.35355338, %v5594_v14 }
0x12d5   :  { %2083 = vrot.lane.b32.xlu1 %v5596_v28, %s4835_s1  ;;  %v2057_v5 = vmul.f32 0.35355338, %v5596_v28 }
0x12d7   :  { %2077 = vrot.lane.b32.xlu0 %v5594_v14, %s4836_s6  ;;  %4246 = vmatprep.mubr.msk.f32.mxu0 %vm207_vm1, %v2057_v5 }
0x12d9   :  { %2081 = vrot.lane.b32.xlu1 %v5594_v14, %s4837_s25 }
0x12dd   :  { %2079 = vrot.lane.b32.xlu1 %v5596_v28, %s4837_s25 }
0x12e1   :  { %2075 = vrot.lane.b32.xlu1 %v5596_v28, %s4836_s6 }
0x1345   :  { %v5612_v16 = vpop.permute.xlu0 %2085 }
0x1346   :  { %2101 = vrot.lane.b32.xlu0 %v5612_v16, %s4838_s15 }
0x1347   :  { %v5616_v27 = vpop.permute.xlu1 %2083 }
0x1348   :  { %2099 = vrot.lane.b32.xlu1 %v5616_v27, %s4838_s15 }
0x1349   :  { %v5624_v19 = vpop.permute.xlu0 %2077 }
0x134b   :  { %v5620_v6 = vpop.permute.xlu1 %2081 }
0x134c   :  { %2097 = vrot.lane.b32.xlu0 %v5620_v6, %s4838_s15 }
0x134f   :  { %v5626_v20 = vpop.permute.xlu1 %2079 }
0x1350   :  { %2093 = vrot.lane.b32.xlu0 %v5624_v19, %s4838_s15  ;;  %2095 = vrot.lane.b32.xlu1 %v5626_v20, %s4838_s15 }
0x1353   :  { %v5632_v50 = vpop.permute.xlu1 %2075 }
0x1354   :  { %2089 = vrot.lane.b32.xlu0 %v5594_v14, %s4838_s15  ;;  %2091 = vrot.lane.b32.xlu1 %v5632_v50, %s4838_s15 }
0x1358   :  { %2087 = vrot.lane.b32.xlu1 %v5596_v28, %s4838_s15  ;;  %2061 = vrot.lane.b32.xlu0 %v2057_v5, %s4836_s6 }
0x135c   :  { %2063 = vrot.lane.b32.xlu1 %v2058_v46, %s4836_s6  ;;  %2065 = vrot.lane.b32.xlu0 %v2057_v5, %s4837_s25 }
0x1360   :  { %2067 = vrot.lane.b32.xlu1 %v2058_v46, %s4837_s25  ;;  %2069 = vrot.lane.b32.xlu0 %v2057_v5, %s4835_s1 }
0x1364   :  { %2071 = vrot.lane.b32.xlu1 %v2058_v46, %s4835_s1 }
0x13b8   :  { %v2102_v49 = vpop.permute.xlu0 %2101 }
0x13b9   :  { %4230 = vmatprep.subr.msk.mxu0 %vm207_vm1, %v2102_v49 }
0x13ba   :  { %4231 = vmatpush3.xpose.msk.msra.mxu0 %vm207_vm1, %v2102_v49  ;;  %v2100_v21 = vpop.permute.xlu1 %2099 }
0x13bb   :  { %4232 = vmatprep.subr.msk.mxu0 %vm207_vm1, %v2100_v21 }
0x13be   :  { %v2098_v23 = vpop.permute.xlu0 %2097  ;;  %4233 = vmatpush3.xpose.msk.msra.mxu0 %vm207_vm1, %v2100_v21 }
0x13bf   :  { %4234 = vmatprep.subr.msk.mxu0 %vm207_vm1, %v2098_v23 }
0x13c2   :  { %4235 = vmatpush3.xpose.msk.msra.mxu0 %vm207_vm1, %v2098_v23  ;;  %v2096_v29 = vpop.permute.xlu1 %2095  ;;  %v2094_v38 = vpop.permute.xlu0 %2093 }
0x13c3   :  { %4236 = vmatprep.subr.msk.mxu0 %vm207_vm1, %v2096_v29 }
0x13c6   :  { %4237 = vmatpush3.xpose.msk.msra.mxu0 %vm207_vm1, %v2096_v29  ;;  %v2092_v36 = vpop.permute.xlu1 %2091  ;;  %v2090_v26 = vpop.permute.xlu0 %2089 }
0x13c7   :  { %4238 = vmatprep.subr.msk.mxu0 %vm207_vm1, %v2094_v38 }
0x13ca   :  { %4239 = vmatpush3.xpose.msk.msra.mxu0 %vm207_vm1, %v2094_v38  ;;  %v2088_v31 = vpop.permute.xlu1 %2087  ;;  %v2062_v32 = vpop.permute.xlu0 %2061 }
0x13cb   :  { %4240 = vmatprep.subr.msk.mxu0 %vm207_vm1, %v2092_v36 }
0x13ce   :  { %4241 = vmatpush3.xpose.msk.msra.mxu0 %vm207_vm1, %v2092_v36  ;;  %v2064_v33 = vpop.permute.xlu1 %2063  ;;  %v2066_v34 = vpop.permute.xlu0 %2065 }
0x13cf   :  { %4242 = vmatprep.subr.msk.mxu0 %vm207_vm1, %v2090_v26 }
0x13d2   :  { %4243 = vmatpush3.xpose.msk.msra.mxu0 %vm207_vm1, %v2090_v26  ;;  %v2068_v35 = vpop.permute.xlu1 %2067  ;;  %v2070_v7 = vpop.permute.xlu0 %2069 }
0x13d3   :  { %4244 = vmatprep.subr.msk.mxu0 %vm207_vm1, %v2088_v31 }
0x13d6   :  { %4245 = vmatpush3.xpose.msk.msra.mxu0 %vm207_vm1, %v2088_v31  ;;  %v2072_v41 = vpop.permute.xlu1 %2071 }
0x13d9   :  { %4247 = vmatmul.mubr.msk.f32.vlgmr.msra.gmra.mxu0 %vm207_vm1, %v2058_v46 }
0x13da   :  { %4249 = vmatprep.mubr.msk.f32.mxu0 %vm207_vm1, %v2062_v32 }
0x13dd   :  { %4250 = vmatmul.mubr.msk.f32.gmra.mxu0 %vm207_vm1, %v2064_v33 }
0x13de   :  { %4252 = vmatprep.mubr.msk.f32.mxu0 %vm207_vm1, %v2066_v34 }
0x13e1   :  { %4253 = vmatmul.mubr.msk.f32.gmra.mxu0 %vm207_vm1, %v2068_v35 }
0x13e2   :  { %4255 = vmatprep.mubr.msk.f32.mxu0 %vm207_vm1, %v2070_v7 }
0x13e5   :  { %4256 = vmatmul.mubr.msk.f32.gmra.mxu0 %vm207_vm1, %v2072_v41 }
0x13e6   :  { %4316 = vmatprep.mubr.msk.f32.mxu0 %vm217_vm0, %v4601_v2 }
0x1499   :  { %v4248_v47 = vpop.f32.mrf.mxu0 }
0x149a   :  { %v2207_v52 = vadd.f32 %v4248_v47, %v5134_v18 }
0x149b   :  { %v2201_v55 = vpop.f32.mrf.mxu0 }
0x149c   :  { %v2202_v57 = vadd.f32 %v2201_v55, %v5140_v22  ;;  %v2243_v59 = vsel %vm595_vm5, %v2207_v52, -inf }
0x149d   :  { %2244 = vmax.xlane.f32.xlu1 %v2243_v59  ;;  %v4251_v45 = vpop.f32.mrf.mxu0 }
0x149e   :  { %v2217_v13 = vadd.f32 %v4251_v45, %v5144_v30  ;;  %v2240_v43 = vsel %vm595_vm5, %v2202_v57, -inf }
0x149f   :  { %v2211_v61 = vpop.f32.mrf.mxu0  ;;  %2241 = vmax.xlane.f32.xlu0 %v2240_v43 }
0x14a0   :  { %v2212_v62 = vadd.f32 %v2211_v61, %v5154_v39  ;;  %v2249_v18 = vsel %vm595_vm5, %v2217_v13, -inf }
0x14a1   :  { %v4254_v9 = vpop.f32.mrf.mxu0 }
0x14a2   :  { %v2227_v63 = vadd.f32 %v4254_v9, %v5156_v40  ;;  %v2246_v12 = vsel %vm595_vm5, %v2212_v62, -inf }
0x14a3   :  { %v2221_v3 = vpop.f32.mrf.mxu0  ;;  %2250 = vmax.xlane.f32.xlu0 %v2249_v18 }
0x14a4   :  { %v2255_v22 = vsel %vm595_vm5, %v2227_v63, -inf  ;;  %v2222_v44 = vadd.f32 %v2221_v3, %v5167_v56 }
0x14a5   :  { %2256 = vmax.xlane.f32.xlu1 %v2255_v22  ;;  %v4257_v11 = vpop.f32.mrf.mxu0 }
0x14a6   :  { %v2237_v30 = vadd.f32 %v4257_v11, %v5170_v58  ;;  %v2252_v5 = vsel %vm595_vm5, %v2222_v44, -inf }
0x14a7   :  { %v2231_v51 = vpop.f32.mrf.mxu0  ;;  %2247 = vmax.xlane.f32.xlu0 %v2246_v12 }
0x14a8   :  { %v2261_v39 = vsel %vm595_vm5, %v2237_v30, -inf  ;;  %v2232_v40 = vadd.f32 %v2231_v51, %v5178_v1 }
0x14a9   :  { %2262 = vmax.xlane.f32.xlu1 %v2261_v39 }
0x14aa   :  { %v2258_v46 = vsel %vm595_vm5, %v2232_v40, -inf }
0x14ab   :  { %2253 = vmax.xlane.f32.xlu0 %v2252_v5 }
0x14af   :  { %2259 = vmax.xlane.f32.xlu0 %v2258_v46 }
0x14ba   :  { %2340 = vrot.lane.b32.xlu1 %v5616_v27, %s4843_s27 }
0x14be   :  { %2338 = vrot.lane.b32.xlu1 %v5620_v6, %s4843_s27 }
0x14c2   :  { %2336 = vrot.lane.b32.xlu1 %v5626_v20, %s4843_s27 }
0x14c5   :  { %2342 = vrot.lane.b32.xlu0 %v5612_v16, %s4843_s27 }
0x14c6   :  { %2332 = vrot.lane.b32.xlu1 %v5632_v50, %s4843_s27 }
0x14c9   :  { %2334 = vrot.lane.b32.xlu0 %v5624_v19, %s4843_s27 }
0x1526   :  { %v2245_v56 = vpop.xlane.xlu1 %2244 }
0x1527   :  { %v2265_v58 = vsub.f32 %v2207_v52, %v2245_v56 }
0x1528   :  { %v2242_v1 = vpop.xlane.xlu0 %2241 }
0x1529   :  { %v2274_v49 = vmul.f32 1.442695, %v2265_v58  ;;  %v2264_v27 = vsub.f32 %v2202_v57, %v2242_v1 }
0x152b   :  { %4518 = vpow2.f32 %v2274_v49  ;;  %v2272_v21 = vmul.f32 1.442695, %v2264_v27 }
0x152c   :  { %v2251_v6 = vpop.xlane.xlu0 %2250 }
0x152d   :  { %4520 = vpow2.f32 %v2272_v21  ;;  %v2267_v23 = vsub.f32 %v2217_v13, %v2251_v6 }
0x152e   :  { %v2257_v20 = vpop.xlane.xlu1 %2256 }
0x152f   :  { %v2278_v29 = vmul.f32 1.442695, %v2267_v23  ;;  %v2269_v38 = vsub.f32 %v2227_v63, %v2257_v20 }
0x1530   :  { %v2248_v16 = vpop.xlane.xlu0 %2247 }
0x1531   :  { %4522 = vpow2.f32 %v2278_v29  ;;  %v2282_v36 = vmul.f32 1.442695, %v2269_v38  ;;  %v2266_v50 = vsub.f32 %v2212_v62, %v2248_v16 }
0x1532   :  { %v2263_v26 = vpop.xlane.xlu1 %2262 }
0x1533   :  { %4524 = vpow2.f32 %v2282_v36  ;;  %v2276_v19 = vmul.f32 1.442695, %v2266_v50  ;;  %v2271_v31 = vsub.f32 %v2237_v30, %v2263_v26 }
0x1534   :  { %v2254_v32 = vpop.xlane.xlu0 %2253 }
0x1535   :  { %4526 = vpow2.f32 %v2276_v19  ;;  %v2286_v33 = vmul.f32 1.442695, %v2271_v31  ;;  %v2268_v34 = vsub.f32 %v2222_v44, %v2254_v32 }
0x1536   :  { %v2341_v35 = vpop.permute.xlu1 %2340 }
0x1537   :  { %4528 = vpow2.f32 %v2286_v33  ;;  %v2280_v7 = vmul.f32 1.442695, %v2268_v34 }
0x1538   :  { %v5702_v41 = vpop.eup %4518  ;;  %v2260_v2 = vpop.xlane.xlu0 %2259 }
0x1539   :  { %4530 = vpow2.f32 %v2280_v7  ;;  %v2270_v47 = vsub.f32 %v2232_v40, %v2260_v2  ;;  %v2291_v52 = vsel %vm595_vm5, %v5702_v41, 0.0  ;;  %v3724_v2 = vld [vmem:[%s6038_s8 + $0x30] sm:$0xff] }
0x153a   :  { %v4521_v55 = vpop.eup %4520  ;;  %2292 = vadd.xlane.f32.xlu1 %v2291_v52  ;;  %v2339_v59 = vpop.permute.xlu1 %2338  ;;  %v3722_v52 = vld [vmem:[%s6038_s8 + $0x20] sm:$0xff] }
0x153b   :  { %v2284_v57 = vmul.f32 1.442695, %v2270_v47  ;;  %v2288_v45 = vsel %vm595_vm5, %v4521_v55, 0.0  ;;  %v3723_v47 = vld [vmem:[%s6038_s8 + $0x28] sm:$0xff] }
0x153c   :  { %2289 = vadd.xlane.f32.xlu0 %v2288_v45  ;;  %v2343_v13 = vpop.permute.xlu0 %2342 }
0x153d   :  { %4532 = vpow2.f32 %v2284_v57  ;;  %4258 = vmatprep.subr.mxu1 %v2343_v13 }
0x153e   :  { %v5707_v43 = vpop.eup %4522  ;;  %4259 = vmatpush3.msra.mxu1 %v2343_v13  ;;  %v2337_v62 = vpop.permute.xlu1 %2336 }
0x153f   :  { %4260 = vmatprep.subr.mxu1 %v2341_v35  ;;  %v2297_v61 = vsel %vm595_vm5, %v5707_v43, 0.0 }
0x1540   :  { %v5711_v9 = vpop.eup %4524  ;;  %2298 = vadd.xlane.f32.xlu1 %v2297_v61  ;;  %4261 = vmatpush3.msra.mxu1 %v2341_v35  ;;  %v2335_v11 = vpop.permute.xlu0 %2334 }
0x1541   :  { %4262 = vmatprep.subr.mxu1 %v2339_v59  ;;  %v2303_v18 = vsel %vm595_vm5, %v5711_v9, 0.0 }
0x1542   :  { %v4527_v63 = vpop.eup %4526  ;;  %4263 = vmatpush3.msra.mxu1 %v2339_v59  ;;  %v2333_v30 = vpop.permute.xlu1 %2332 }
0x1543   :  { %4264 = vmatprep.subr.mxu1 %v2337_v62  ;;  %v2294_v3 = vsel %vm595_vm5, %v4527_v63, 0.0 }
0x1544   :  { %v5716_v22 = vpop.eup %4528  ;;  %2304 = vadd.xlane.f32.xlu1 %v2303_v18  ;;  %2295 = vadd.xlane.f32.xlu0 %v2294_v3 }
0x1545   :  { %4265 = vmatpush3.msra.mxu1 %v2337_v62  ;;  %v2309_v12 = vsel %vm595_vm5, %v5716_v22, 0.0 }
0x1546   :  { %v4531_v44 = vpop.eup %4530  ;;  %4266 = vmatprep.subr.mxu1 %v2335_v11 }
0x1547   :  { %4267 = vmatpush3.msra.mxu1 %v2335_v11  ;;  %v2300_v51 = vsel %vm595_vm5, %v4531_v44, 0.0 }
0x1548   :  { %4268 = vmatprep.subr.mxu1 %v2333_v30  ;;  %2310 = vadd.xlane.f32.xlu1 %v2309_v12 }
0x1549   :  { %2301 = vadd.xlane.f32.xlu0 %v2300_v51  ;;  %4269 = vmatpush3.msra.mxu1 %v2333_v30 }
0x154a   :  { %v4533_v39 = vpop.eup %4532 }
0x154b   :  { %v2306_v40 = vsel %vm595_vm5, %v4533_v39, 0.0 }
0x154d   :  { %2307 = vadd.xlane.f32.xlu0 %v2306_v40 }
0x1559   :  { %2328 = vrot.lane.b32.xlu1 %v5596_v28, %s4843_s27 }
0x1563   :  { %2330 = vrot.lane.b32.xlu0 %v5594_v14, %s4843_s27 }
0x15c3   :  { %v2293_v46 = vpop.xlane.xlu1 %2292 }
0x15c5   :  { %v2290_v5 = vpop.xlane.xlu0 %2289 }
0x15c6   :  { %4534 = vrcp.f32 %v2290_v5  ;;  %v3761_v5 = vld [vmem:[%s6042_s12 + $0x38] sm:$0xff] }
0x15c7   :  { %4536 = vrcp.f32 %v2293_v46  ;;  %v3760_v46 = vld [vmem:[%s6042_s12 + $0x30] sm:$0xff]  ;;  %4308 = vmatprep.subr.mxu0 %v3761_v5 }
0x15c8   :  { %4309 = vmatpush3.msra.mxu0 %v3761_v5 }
0x15c9   :  { %v2299_v56 = vpop.xlane.xlu1 %2298  ;;  %4310 = vmatprep.subr.mxu0 %v3760_v46 }
0x15ca   :  { %4311 = vmatpush3.msra.mxu0 %v3760_v46 }
0x15cd   :  { %v2296_v58 = vpop.xlane.xlu0 %2295  ;;  %v2305_v1 = vpop.xlane.xlu1 %2304 }
0x15ce   :  { %4538 = vrcp.f32 %v2296_v58  ;;  %v3758_v58 = vld [vmem:[%s6042_s12 + $0x20] sm:$0xff] }
0x15cf   :  { %4540 = vrcp.f32 %v2299_v56  ;;  %v3759_v56 = vld [vmem:[%s6042_s12 + $0x28] sm:$0xff] }
0x15d0   :  { %4312 = vmatprep.subr.mxu0 %v3759_v56 }
0x15d1   :  { %v2311_v6 = vpop.xlane.xlu1 %2310  ;;  %4313 = vmatpush3.msra.mxu0 %v3759_v56 }
0x15d2   :  { %v2302_v49 = vpop.xlane.xlu0 %2301  ;;  %4314 = vmatprep.subr.mxu0 %v3758_v58 }
0x15d3   :  { %v4535_v27 = vpop.eup %4534  ;;  %4542 = vrcp.f32 %v2302_v49  ;;  %4315 = vmatpush3.msra.mxu0 %v3758_v58  ;;  %v4603_v49 = vld [vmem:[#allocation2] sm:$0x3] }
0x15d4   :  { %v2313_v21 = vmul.f32 %v4535_v27, %v4521_v55  ;;  %4544 = vrcp.f32 %v2305_v1  ;;  %v4537_v14 = vpop.eup %4536  ;;  %v4602_v1 = vld [vmem:[%s6069_s3 + $0x8] sm:$0xff]  ;;  %v2514_v27 = vrot.slane %v4603_v49, %v5315_v60 }
0x15d5   :  { %v2329_v29 = vpop.permute.xlu1 %2328  ;;  %v2315_v38 = vmul.f32 %v4537_v14, %v5702_v41  ;;  %v3725_v41 = vld [vmem:[%s6038_s8 + $0x38] sm:$0xff]  ;;  %4317 = vmatmul.mubr.msk.f32.vlgmr.msra.gmra.mxu0 %vm217_vm0, %v4602_v1  ;;  %v4605_v1 = vld [vmem:[#allocation4] sm:$0x3] }
0x15d6   :  { %v2308_v23 = vpop.xlane.xlu0 %2307  ;;  %4274 = vmatprep.mubr.msk.f32.mxu1 %vm595_vm5, %v2313_v21  ;;  %v2644_v49 = vrot.slane %v4605_v1, %v5315_v60 }
0x15d7   :  { %4546 = vrcp.f32 %v2308_v23 }
0x15d8   :  { %4548 = vrcp.f32 %v2311_v6 }
0x15da   :  { %v2331_v28 = vpop.permute.xlu0 %2330 }
0x15db   :  { %4270 = vmatprep.subr.mxu1 %v2331_v28  ;;  %v4539_v20 = vpop.eup %4538 }
0x15dc   :  { %4271 = vmatpush3.msra.mxu1 %v2331_v28  ;;  %v2317_v16 = vmul.f32 %v4539_v20, %v4527_v63  ;;  %v4541_v36 = vpop.eup %4540 }
0x15dd   :  { %4272 = vmatprep.subr.mxu1 %v2329_v29  ;;  %v2319_v26 = vmul.f32 %v4541_v36, %v5707_v43 }
0x15de   :  { %4273 = vmatpush3.msra.mxu1 %v2329_v29 }
0x15df   :  { %4275 = vmatmul.mubr.msk.f32.vlgmr.msra.gmra.mxu1 %vm595_vm5, %v2315_v38  ;;  %4286 = vmatprep.subr.mxu1 %v3725_v41 }
0x15e0   :  { %v4543_v50 = vpop.eup %4542  ;;  %4277 = vmatprep.mubr.msk.f32.mxu1 %vm595_vm5, %v2317_v16  ;;  %4287 = vmatpush3.msra.mxu1 %v3725_v41  ;;  %v3752_v41 = vld [vmem:[%s6040_s10 + $0x20] sm:$0xff] }
0x15e1   :  { %v2321_v19 = vmul.f32 %v4543_v50, %v4531_v44  ;;  %v4545_v31 = vpop.eup %4544  ;;  %4288 = vmatprep.subr.mxu1 %v3724_v2 }
0x15e2   :  { %v2323_v33 = vmul.f32 %v4545_v31, %v5711_v9  ;;  %4289 = vmatpush3.msra.mxu1 %v3724_v2  ;;  %v4604_v2 = vld [vmem:[#allocation6] sm:$0x3] }
0x15e3   :  { %4278 = vmatmul.mubr.msk.f32.gmra.mxu1 %vm595_vm5, %v2319_v26  ;;  %4290 = vmatprep.subr.mxu1 %v3723_v47 }
0x15e4   :  { %v4547_v32 = vpop.eup %4546  ;;  %4280 = vmatprep.mubr.msk.f32.mxu1 %vm595_vm5, %v2321_v19  ;;  %4291 = vmatpush3.msra.mxu1 %v3723_v47  ;;  %v2734_v47 = vrot.slane %v4604_v2, %v5315_v60 }
0x15e5   :  { %v2325_v34 = vmul.f32 %v4547_v32, %v4533_v39  ;;  %v4549_v35 = vpop.eup %4548  ;;  %4292 = vmatprep.subr.mxu1 %v3722_v52 }
0x15e6   :  { %v2327_v7 = vmul.f32 %v4549_v35, %v5716_v22  ;;  %4293 = vmatpush3.msra.mxu1 %v3722_v52  ;;  %v3754_v35 = vld [vmem:[%s6040_s10 + $0x30] sm:$0xff] }
0x15e7   :  { %4281 = vmatmul.mubr.msk.f32.gmra.mxu1 %vm595_vm5, %v2323_v33 }
0x15e8   :  { %4283 = vmatprep.mubr.msk.f32.mxu1 %vm595_vm5, %v2325_v34 }
0x15eb   :  { %4284 = vmatmul.mubr.msk.f32.gmra.mxu1 %vm595_vm5, %v2327_v7  ;;  %v3753_v7 = vld [vmem:[%s6040_s10 + $0x28] sm:$0xff] }
0x1695   :  { %v4318_v52 = vpop.f32.mrf.mxu0 }
0x169f   :  { %v4276_v55 = vpop.f32.mrf.mxu1 }
0x16a1   :  { %v2442_v57 = vpop.f32.mrf.mxu1 }
0x16a3   :  { %v4279_v59 = vpop.f32.mrf.mxu1 }
0x16a4   :  { %2485 = vrot.lane.b32.xlu1 %v4279_v59, %s4826_s24 }
0x16a5   :  { %v2452_v45 = vpop.f32.mrf.mxu1 }
0x16a6   :  { %2483 = vrot.lane.b32.xlu0 %v2452_v45, %s4826_s24 }
0x16a7   :  { %v4282_v13 = vpop.f32.mrf.mxu1 }
0x16a8   :  { %2493 = vrot.lane.b32.xlu1 %v4282_v13, %s4839_s26 }
0x16a9   :  { %v2462_v43 = vpop.f32.mrf.mxu1 }
0x16aa   :  { %2491 = vrot.lane.b32.xlu0 %v2462_v43, %s4839_s26 }
0x16ab   :  { %v4285_v61 = vpop.f32.mrf.mxu1 }
0x16ac   :  { %2501 = vrot.lane.b32.xlu1 %v4285_v61, %s4844_s30 }
0x16ad   :  { %v2472_v9 = vpop.f32.mrf.mxu1 }
0x16ae   :  { %2499 = vrot.lane.b32.xlu0 %v2472_v9, %s4844_s30 }
0x1716   :  { %v2486_v62 = vpop.permute.xlu1 %2485 }
0x1717   :  { %v2506_v44 = vsel %vm207_vm1, %v4276_v55, %v2486_v62  ;;  %v5800_v55 = vadd.f32 %v4318_v52, %v2734_v47 }
0x1718   :  { %v2484_v63 = vpop.permute.xlu0 %2483 }
0x1719   :  { %v2505_v22 = vsel %vm207_vm1, %v2442_v57, %v2484_v63  ;;  %v2801_v57 = vpop.f32.mrf.mxu0  ;;  %v2626_v63 = vsub.s32 4, %v5014_v25 }
0x171a   :  { %v2494_v18 = vpop.permute.xlu1 %2493  ;;  %v5802_v59 = vadd.f32 %v2801_v57, %v2734_v47 }
0x171b   :  { %v2508_v51 = vsel %vm215_vm2, %v2506_v44, %v2494_v18  ;;  %v2627_v18 = vrot.slane %v5542_v37, %v2626_v63 }
0x171c   :  { %v2492_v3 = vpop.permute.xlu0 %2491 }
0x171d   :  { %v2507_v30 = vsel %vm215_vm2, %v2505_v22, %v2492_v3 }
0x171e   :  { %v2502_v11 = vpop.permute.xlu1 %2501 }
0x171f   :  { %v2510_v40 = vsel %vm865_vm6, %v2508_v51, %v2502_v11  ;;  %v2633_v11 = vrot.slane %v5545_v10, %v2626_v63 }
0x1720   :  { %v2500_v12 = vpop.permute.xlu0 %2499 }
0x1721   :  { %v2509_v39 = vsel %vm865_vm6, %v2507_v30, %v2500_v12 }
0x1722   :  { %4294 = vmatprep.mubr.msk.f32.mxu1 %vm217_vm0, %v2509_v39 }
0x1723   :  { %4295 = vmatmul.mubr.msk.f32.vlgmr.msra.gmra.mxu1 %vm217_vm0, %v2510_v40 }
0x17e3   :  { %v4296_v21 = vpop.f32.mrf.mxu1 }
0x17e4   :  { %v2593_v6 = vadd.f32 %v4296_v21, %v2514_v27 }
0x17e5   :  { %v2587_v23 = vpop.f32.mrf.mxu1 }
0x17e6   :  { %v2597_v14 = vadd.f32 %v2593_v6, %v5584_v48  ;;  %v2588_v28 = vadd.f32 %v2587_v23, %v2514_v27 }
0x17e8   :  { %v2596_v20 = vadd.f32 %v2588_v28, %v5582_v4  ;;  %v2601_v29 = vsel %vm217_vm0, %v2597_v14, 0.0  ;;  %v3755_v4 = vld [vmem:[%s6040_s10 + $0x38] sm:$0xff] }
0x17e9   :  { %2602 = vadd.xlane.f32.xlu1 %v2601_v29  ;;  %4297 = vmatprep.subr.mxu1 %v3755_v4 }
0x17ea   :  { %v2598_v38 = vsel %vm217_vm0, %v2596_v20, 0.0  ;;  %4298 = vmatpush3.msra.mxu1 %v3755_v4 }
0x17eb   :  { %2599 = vadd.xlane.f32.xlu0 %v2598_v38  ;;  %4299 = vmatprep.subr.mxu1 %v3754_v35 }
0x17ec   :  { %4300 = vmatpush3.msra.mxu1 %v3754_v35 }
0x17ed   :  { %4301 = vmatprep.subr.mxu1 %v3753_v7 }
0x17ee   :  { %4302 = vmatpush3.msra.mxu1 %v3753_v7 }
0x17ef   :  { %4303 = vmatprep.subr.mxu1 %v3752_v41 }
0x17f0   :  { %4304 = vmatpush3.msra.mxu1 %v3752_v41 }
0x17fa   :  { %2841 = vrot.lane.b32.xlu1 %v5802_v59, %s4835_s1 }
0x17fe   :  { %2839 = vrot.lane.b32.xlu1 %v5800_v55, %s4837_s25 }
0x1802   :  { %2837 = vrot.lane.b32.xlu1 %v5802_v59, %s4837_s25 }
0x1806   :  { %2833 = vrot.lane.b32.xlu1 %v5802_v59, %s4836_s6 }
0x1872   :  { %v2603_v16 = vpop.xlane.xlu1 %2602 }
0x1873   :  { %v2605_v36 = vmul.f32 0.03125, %v2603_v16 }
0x1874   :  { %v2600_v50 = vpop.xlane.xlu0 %2599 }
0x1875   :  { %v2604_v26 = vmul.f32 0.03125, %v2600_v50  ;;  %v2607_v19 = vsub.f32 %v2597_v14, %v2605_v36 }
0x1876   :  { %v5825_v40 = vpop.permute.xlu1 %2841 }
0x1877   :  { %v2606_v31 = vsub.f32 %v2596_v20, %v2604_v26  ;;  %v2609_v34 = vmul.f32 %v2607_v19, %v2607_v19 }
0x1879   :  { %v2608_v32 = vmul.f32 %v2606_v31, %v2606_v31  ;;  %v2613_v48 = vsel %vm217_vm0, %v2609_v34, 0.0 }
0x187a   :  { %v5835_v10 = vpop.permute.xlu1 %2839 }
0x187b   :  { %v2610_v33 = vsel %vm217_vm0, %v2608_v32, 0.0 }
0x187c   :  { %2611 = vadd.xlane.f32.xlu0 %v2610_v33 }
0x187e   :  { %v5843_v46 = vpop.permute.xlu1 %2837 }
0x1880   :  { %2614 = vadd.xlane.f32.xlu0 %v2613_v48 }
0x1882   :  { %v5855_v58 = vpop.permute.xlu1 %2833 }
0x1896   :  { %2843 = vrot.lane.b32.xlu0 %v5800_v55, %s4835_s1 }
0x189a   :  { %2835 = vrot.lane.b32.xlu0 %v5800_v55, %s4836_s6 }
0x1905   :  { %v2612_v45 = vpop.xlane.xlu0 %2611 }
0x1906   :  { %v2616_v13 = vmul.f32 0.03125, %v2612_v45 }
0x1908   :  { %v2618_v43 = vadd.f32 1e-05, %v2616_v13 }
0x1909   :  { %v2615_v61 = vpop.xlane.xlu0 %2614 }
0x190a   :  { %4550 = vrsqrt.f32 %v2618_v43  ;;  %v2617_v9 = vmul.f32 0.03125, %v2615_v61 }
0x190c   :  { %v2619_v62 = vadd.f32 1e-05, %v2617_v9 }
0x190d   :  { %v5819_v44 = vpop.permute.xlu0 %2843 }
0x190e   :  { %4552 = vrsqrt.f32 %v2619_v62  ;;  %4319 = vmatprep.subr.msk.mxu1 %vm207_vm1, %v5819_v44 }
0x1911   :  { %v5849_v56 = vpop.permute.xlu0 %2835 }
0x1917   :  { %v4551_v3 = vpop.eup %4550 }
0x1918   :  { %v2622_v22 = vmul.f32 %v4551_v3, %v2606_v31 }
0x191a   :  { %v2628_v30 = vmul.f32 %v2627_v18, %v2622_v22 }
0x191b   :  { %v4553_v12 = vpop.eup %4552 }
0x191c   :  { %v2623_v51 = vmul.f32 %v4553_v12, %v2607_v19  ;;  %v5823_v39 = vadd.f32 %v2633_v11, %v2628_v30 }
0x191e   :  { %v2629_v5 = vmul.f32 %v2627_v18, %v2623_v51  ;;  %4305 = vmatprep.mubr.msk.f32.mxu1 %vm217_vm0, %v5823_v39 }
0x1920   :  { %v5829_v37 = vadd.f32 %v2633_v11, %v2629_v5 }
0x1922   :  { %4306 = vmatmul.mubr.msk.f32.vlgmr.msra.gmra.mxu1 %vm217_vm0, %v5829_v37 }
0x1923   :  { %4320 = vmatpush3.xpose.msk.msra.mxu1 %vm207_vm1, %v5819_v44 }
0x1924   :  { %4321 = vmatprep.subr.msk.mxu1 %vm207_vm1, %v5825_v40 }
0x1927   :  { %4322 = vmatpush3.xpose.msk.msra.mxu1 %vm207_vm1, %v5825_v40 }
0x1928   :  { %4323 = vmatprep.subr.msk.mxu1 %vm207_vm1, %v5835_v10 }
0x192b   :  { %4324 = vmatpush3.xpose.msk.msra.mxu1 %vm207_vm1, %v5835_v10 }
0x192c   :  { %4325 = vmatprep.subr.msk.mxu1 %vm207_vm1, %v5843_v46 }
0x192f   :  { %4326 = vmatpush3.xpose.msk.msra.mxu1 %vm207_vm1, %v5843_v46 }
0x1930   :  { %4327 = vmatprep.subr.msk.mxu1 %vm207_vm1, %v5849_v56 }
0x1933   :  { %4328 = vmatpush3.xpose.msk.msra.mxu1 %vm207_vm1, %v5849_v56 }
0x1934   :  { %4329 = vmatprep.subr.msk.mxu1 %vm207_vm1, %v5855_v58 }
0x1937   :  { %4330 = vmatpush3.xpose.msk.msra.mxu1 %vm207_vm1, %v5855_v58 }
0x1938   :  { %4331 = vmatprep.subr.msk.mxu1 %vm207_vm1, %v5800_v55 }
0x193b   :  { %4332 = vmatpush3.xpose.msk.msra.mxu1 %vm207_vm1, %v5800_v55 }
0x193c   :  { %4333 = vmatprep.subr.msk.mxu1 %vm207_vm1, %v5802_v59 }
0x193f   :  { %4334 = vmatpush3.xpose.msk.msra.mxu1 %vm207_vm1, %v5802_v59 }
0x19e2   :  { %v4307_v27 = vpop.f32.mrf.mxu1 }
0x19e3   :  { %v2723_v21 = vadd.f32 %v4307_v27, %v2644_v49 }
0x19e4   :  { %v2717_v6 = vpop.f32.mrf.mxu1 }
0x19e5   :  { %v2816_v23 = vmul.f32 0.35355338, %v2723_v21  ;;  %v2718_v14 = vadd.f32 %v2717_v6, %v2644_v49 }
0x19e7   :  { %v2815_v28 = vmul.f32 0.35355338, %v2718_v14  ;;  %2821 = vrot.lane.b32.xlu1 %v2816_v23, %s4836_s6 }
0x19e9   :  { %2819 = vrot.lane.b32.xlu0 %v2815_v28, %s4836_s6  ;;  %4335 = vmatprep.mubr.msk.f32.mxu1 %vm207_vm1, %v2815_v28 }
0x19ea   :  { %4336 = vmatmul.mubr.msk.f32.vlgmr.msra.gmra.mxu1 %vm207_vm1, %v2816_v23 }
0x19eb   :  { %2825 = vrot.lane.b32.xlu1 %v2816_v23, %s4837_s25 }
0x19ed   :  { %2823 = vrot.lane.b32.xlu0 %v2815_v28, %s4837_s25 }
0x19ef   :  { %2829 = vrot.lane.b32.xlu1 %v2816_v23, %s4835_s1 }
0x19f1   :  { %2827 = vrot.lane.b32.xlu0 %v2815_v28, %s4835_s1 }
0x1a59   :  { %v2822_v20 = vpop.permute.xlu1 %2821 }
0x1a5b   :  { %v2820_v29 = vpop.permute.xlu0 %2819 }
0x1a5c   :  { %4338 = vmatprep.mubr.msk.f32.mxu1 %vm207_vm1, %v2820_v29 }
0x1a5d   :  { %4339 = vmatmul.mubr.msk.f32.gmra.mxu1 %vm207_vm1, %v2822_v20  ;;  %v2826_v38 = vpop.permute.xlu1 %2825 }
0x1a5f   :  { %v2824_v16 = vpop.permute.xlu0 %2823 }
0x1a60   :  { %4341 = vmatprep.mubr.msk.f32.mxu1 %vm207_vm1, %v2824_v16 }
0x1a61   :  { %4342 = vmatmul.mubr.msk.f32.gmra.mxu1 %vm207_vm1, %v2826_v38  ;;  %v2830_v50 = vpop.permute.xlu1 %2829 }
0x1a63   :  { %v2828_v36 = vpop.permute.xlu0 %2827 }
0x1a64   :  { %4344 = vmatprep.mubr.msk.f32.mxu1 %vm207_vm1, %v2828_v36 }
0x1a65   :  { %4345 = vmatmul.mubr.msk.f32.gmra.mxu1 %vm207_vm1, %v2830_v50 }
0x1aaa   :  { %v4337_v26 = vpop.f32.mrf.mxu1 }
0x1aab   :  { %v2949_v19 = vadd.f32 %v4337_v26, %v5407_v53 }
0x1aac   :  { %v2943_v31 = vpop.f32.mrf.mxu1 }
0x1aad   :  { %v2944_v32 = vadd.f32 %v2943_v31, %v5409_v54  ;;  %v2985_v33 = vsel %vm595_vm5, %v2949_v19, -inf }
0x1aae   :  { %2986 = vmax.xlane.f32.xlu1 %v2985_v33 }
0x1aaf   :  { %v2982_v34 = vsel %vm595_vm5, %v2944_v32, -inf }
0x1ab0   :  { %2983 = vmax.xlane.f32.xlu0 %v2982_v34 }
0x1b1d   :  { %v4340_v48 = vpop.f32.mrf.mxu1 }
0x1b1e   :  { %v2959_v4 = vadd.f32 %v4340_v48, %v5421_v0 }
0x1b1f   :  { %v2953_v35 = vpop.f32.mrf.mxu1 }
0x1b20   :  { %v2954_v7 = vadd.f32 %v2953_v35, %v5427_v8  ;;  %v2991_v41 = vsel %vm595_vm5, %v2959_v4, -inf }
0x1b21   :  { %2992 = vmax.xlane.f32.xlu0 %v2991_v41  ;;  %v4343_v2 = vpop.f32.mrf.mxu1 }
0x1b22   :  { %v2969_v53 = vadd.f32 %v4343_v2, %v5433_v42  ;;  %v2988_v52 = vsel %vm595_vm5, %v2954_v7, -inf }
0x1b23   :  { %v2963_v47 = vpop.f32.mrf.mxu1 }
0x1b24   :  { %v2964_v54 = vadd.f32 %v2963_v47, %v5440_v15  ;;  %v2997_v57 = vsel %vm595_vm5, %v2969_v53, -inf }
0x1b25   :  { %2989 = vmax.xlane.f32.xlu0 %v2988_v52  ;;  %2998 = vmax.xlane.f32.xlu1 %v2997_v57  ;;  %v4346_v45 = vpop.f32.mrf.mxu1 }
0x1b26   :  { %v2979_v0 = vadd.f32 %v4346_v45, %v5446_v17  ;;  %v2994_v43 = vsel %vm595_vm5, %v2964_v54, -inf }
0x1b27   :  { %v2973_v13 = vpop.f32.mrf.mxu1 }
0x1b28   :  { %v2974_v8 = vadd.f32 %v2973_v13, %v5451_v24  ;;  %v3003_v61 = vsel %vm595_vm5, %v2979_v0, -inf }
0x1b29   :  { %2995 = vmax.xlane.f32.xlu0 %v2994_v43  ;;  %3004 = vmax.xlane.f32.xlu1 %v3003_v61 }
0x1b2a   :  { %v3000_v42 = vsel %vm595_vm5, %v2974_v8, -inf }
0x1b2d   :  { %3001 = vmax.xlane.f32.xlu0 %v3000_v42 }
0x1b37   :  { %v2987_v24 = vpop.xlane.xlu1 %2986 }
0x1b38   :  { %v3007_v9 = vsub.f32 %v2949_v19, %v2987_v24 }
0x1b39   :  { %v2984_v15 = vpop.xlane.xlu0 %2983 }
0x1b3a   :  { %3082 = vrot.lane.b32.xlu1 %v5825_v40, %s4838_s15  ;;  %v3006_v17 = vsub.f32 %v2944_v32, %v2984_v15  ;;  %v3016_v63 = vmul.f32 1.442695, %v3007_v9 }
0x1b3c   :  { %v3014_v62 = vmul.f32 1.442695, %v3006_v17 }
0x1b3e   :  { %3080 = vrot.lane.b32.xlu1 %v5835_v10, %s4838_s15  ;;  %4554 = vpow2.f32 %v3014_v62 }
0x1b3f   :  { %4556 = vpow2.f32 %v3016_v63 }
0x1b42   :  { %3078 = vrot.lane.b32.xlu1 %v5843_v46, %s4838_s15 }
0x1b43   :  { %3084 = vrot.lane.b32.xlu0 %v5819_v44, %s4838_s15 }
0x1b46   :  { %3074 = vrot.lane.b32.xlu1 %v5855_v58, %s4838_s15 }
0x1b47   :  { %3076 = vrot.lane.b32.xlu0 %v5849_v56, %s4838_s15 }
0x1b4b   :  { %v5914_v18 = vpop.eup %4554 }
0x1b4c   :  { %v3030_v3 = vsel %vm595_vm5, %v5914_v18, 0.0  ;;  %v5918_v22 = vpop.eup %4556 }
0x1b4d   :  { %v3033_v11 = vsel %vm595_vm5, %v5918_v22, 0.0 }
0x1b66   :  { %3031 = vadd.xlane.f32.xlu0 %v3030_v3 }
0x1b6a   :  { %3034 = vadd.xlane.f32.xlu1 %v3033_v11 }
0x1baa   :  { %v2993_v44 = vpop.xlane.xlu0 %2992 }
0x1bab   :  { %v3009_v30 = vsub.f32 %v2959_v4, %v2993_v44 }
0x1bad   :  { %v3020_v12 = vmul.f32 1.442695, %v3009_v30 }
0x1bae   :  { %v2999_v51 = vpop.xlane.xlu1 %2998  ;;  %v2990_v40 = vpop.xlane.xlu0 %2989 }
0x1baf   :  { %4558 = vpow2.f32 %v3020_v12  ;;  %v3011_v5 = vsub.f32 %v2969_v53, %v2999_v51  ;;  %v3008_v10 = vsub.f32 %v2954_v7, %v2990_v40  ;;  %v2814_v12 = vld [vmem:[#allocation7 + $0x38] sm:$0xff]  ;;  %v2813_v51 = vld [vmem:[#allocation7 + $0x30] sm:$0xff]  ;;  %v2812_v40 = vld [vmem:[#allocation7 + $0x28] sm:$0xff] }
0x1bb1   :  { %v3024_v46 = vmul.f32 1.442695, %v3011_v5  ;;  %v3018_v56 = vmul.f32 1.442695, %v3008_v10  ;;  %v2811_v5 = vld [vmem:[#allocation7 + $0x20] sm:$0xff] }
0x1bb2   :  { %v3005_v58 = vpop.xlane.xlu1 %3004  ;;  %v2996_v1 = vpop.xlane.xlu0 %2995 }
0x1bb3   :  { %4560 = vpow2.f32 %v3024_v46  ;;  %v3013_v49 = vsub.f32 %v2979_v0, %v3005_v58  ;;  %v3010_v27 = vsub.f32 %v2964_v54, %v2996_v1 }
0x1bb4   :  { %4562 = vpow2.f32 %v3018_v56 }
0x1bb5   :  { %v3028_v21 = vmul.f32 1.442695, %v3013_v49  ;;  %v3022_v6 = vmul.f32 1.442695, %v3010_v27 }
0x1bb6   :  { %v3083_v23 = vpop.permute.xlu1 %3082  ;;  %v3002_v14 = vpop.xlane.xlu0 %3001 }
0x1bb7   :  { %4564 = vpow2.f32 %v3028_v21  ;;  %v3012_v28 = vsub.f32 %v2974_v8, %v3002_v14 }
0x1bb8   :  { %4566 = vpow2.f32 %v3022_v6 }
0x1bb9   :  { %v3026_v20 = vmul.f32 1.442695, %v3012_v28 }
0x1bba   :  { %v3081_v29 = vpop.permute.xlu1 %3080  ;;  %v3085_v38 = vpop.permute.xlu0 %3084 }
0x1bbb   :  { %4568 = vpow2.f32 %v3026_v20  ;;  %4347 = vmatprep.subr.mxu0 %v3085_v38 }
0x1bbc   :  { %v5922_v16 = vpop.eup %4558  ;;  %4348 = vmatpush3.msra.mxu0 %v3085_v38 }
0x1bbd   :  { %4349 = vmatprep.subr.mxu0 %v3083_v23  ;;  %v3039_v36 = vsel %vm595_vm5, %v5922_v16, 0.0 }
0x1bbe   :  { %v3079_v50 = vpop.permute.xlu1 %3078  ;;  %3040 = vadd.xlane.f32.xlu1 %v3039_v36  ;;  %4350 = vmatpush3.msra.mxu0 %v3083_v23  ;;  %v3077_v32 = vpop.permute.xlu0 %3076 }
0x1bbf   :  { %4351 = vmatprep.subr.mxu0 %v3081_v29 }
0x1bc0   :  { %v5926_v26 = vpop.eup %4560  ;;  %4352 = vmatpush3.msra.mxu0 %v3081_v29 }
0x1bc1   :  { %v4563_v19 = vpop.eup %4562  ;;  %4353 = vmatprep.subr.mxu0 %v3079_v50  ;;  %v3045_v31 = vsel %vm595_vm5, %v5926_v26, 0.0 }
0x1bc2   :  { %3046 = vadd.xlane.f32.xlu1 %v3045_v31  ;;  %v3036_v33 = vsel %vm595_vm5, %v4563_v19, 0.0  ;;  %4354 = vmatpush3.msra.mxu0 %v3079_v50  ;;  %v3075_v48 = vpop.permute.xlu1 %3074  ;;  %v4606_v31 = vld [vmem:[#allocation9] sm:$0x3] }
0x1bc3   :  { %3037 = vadd.xlane.f32.xlu0 %v3036_v33  ;;  %4355 = vmatprep.subr.mxu0 %v3077_v32 }
0x1bc4   :  { %v4565_v34 = vpop.eup %4564  ;;  %4356 = vmatpush3.msra.mxu0 %v3077_v32  ;;  %v3256_v32 = vrot.slane %v4606_v31, %v5315_v60 }
0x1bc5   :  { %v4567_v4 = vpop.eup %4566  ;;  %4357 = vmatprep.subr.mxu0 %v3075_v48  ;;  %v3051_v35 = vsel %vm595_vm5, %v4565_v34, 0.0 }
0x1bc6   :  { %3052 = vadd.xlane.f32.xlu1 %v3051_v35  ;;  %v3042_v7 = vsel %vm595_vm5, %v4567_v4, 0.0  ;;  %4358 = vmatpush3.msra.mxu0 %v3075_v48 }
0x1bc7   :  { %3043 = vadd.xlane.f32.xlu0 %v3042_v7 }
0x1bc8   :  { %v4569_v41 = vpop.eup %4568 }
0x1bc9   :  { %v3048_v2 = vsel %vm595_vm5, %v4569_v41, 0.0 }
0x1bcb   :  { %3049 = vadd.xlane.f32.xlu0 %v3048_v2 }
0x1bd7   :  { %3070 = vrot.lane.b32.xlu1 %v5802_v59, %s4838_s15 }
0x1be1   :  { %3072 = vrot.lane.b32.xlu0 %v5800_v55, %s4838_s15 }
0x1bef   :  { %v3032_v53 = vpop.xlane.xlu0 %3031 }
0x1bf0   :  { %4570 = vrcp.f32 %v3032_v53 }
0x1bf3   :  { %v3035_v52 = vpop.xlane.xlu1 %3034 }
0x1bf4   :  { %4572 = vrcp.f32 %v3035_v52 }
0x1bfd   :  { %v4571_v47 = vpop.eup %4570 }
0x1bfe   :  { %v3055_v54 = vmul.f32 %v4571_v47, %v5914_v18 }
0x1c00   :  { %4363 = vmatprep.mubr.msk.f32.mxu0 %vm595_vm5, %v3055_v54 }
0x1c01   :  { %v4573_v55 = vpop.eup %4572 }
0x1c02   :  { %v3057_v15 = vmul.f32 %v4573_v55, %v5918_v22  ;;  %v3380_v55 = vld [vmem:[#allocation10 + $0x28] sm:$0xff] }
0x1c47   :  { %v3041_v57 = vpop.xlane.xlu1 %3040 }
0x1c4b   :  { %v3047_v0 = vpop.xlane.xlu1 %3046 }
0x1c4c   :  { %v3038_v45 = vpop.xlane.xlu0 %3037 }
0x1c4d   :  { %4574 = vrcp.f32 %v3038_v45 }
0x1c4e   :  { %4576 = vrcp.f32 %v3041_v57 }
0x1c4f   :  { %v3053_v59 = vpop.xlane.xlu1 %3052 }
0x1c50   :  { %v3044_v13 = vpop.xlane.xlu0 %3043 }
0x1c51   :  { %4578 = vrcp.f32 %v3044_v13 }
0x1c52   :  { %4580 = vrcp.f32 %v3047_v0 }
0x1c53   :  { %v3071_v42 = vpop.permute.xlu1 %3070 }
0x1c54   :  { %v3050_v8 = vpop.xlane.xlu0 %3049 }
0x1c55   :  { %4582 = vrcp.f32 %v3050_v8  ;;  %v3381_v8 = vld [vmem:[#allocation10 + $0x30] sm:$0xff] }
0x1c56   :  { %4584 = vrcp.f32 %v3053_v59 }
0x1c58   :  { %v3073_v43 = vpop.permute.xlu0 %3072 }
0x1c59   :  { %4359 = vmatprep.subr.mxu0 %v3073_v43 }
0x1c5a   :  { %v4575_v61 = vpop.eup %4574  ;;  %4360 = vmatpush3.msra.mxu0 %v3073_v43  ;;  %v3379_v43 = vld [vmem:[#allocation10 + $0x20] sm:$0xff] }
0x1c5b   :  { %4361 = vmatprep.subr.mxu0 %v3071_v42  ;;  %v3059_v17 = vmul.f32 %v4575_v61, %v4563_v19  ;;  %v4577_v24 = vpop.eup %4576  ;;  %v3799_v61 = vld [vmem:[%s6048_s18 + $0x78] sm:$0xff] }
0x1c5c   :  { %4362 = vmatpush3.msra.mxu0 %v3071_v42  ;;  %v3061_v62 = vmul.f32 %v4577_v24, %v5922_v16  ;;  %v3798_v42 = vld [vmem:[%s6048_s18 + $0x70] sm:$0xff]  ;;  %4397 = vmatprep.subr.mxu1 %v3799_v61  ;;  %v3795_v24 = vld [vmem:[%s6048_s18 + $0x58] sm:$0xff] }
0x1c5d   :  { %4364 = vmatmul.mubr.msk.f32.vlgmr.msra.gmra.mxu0 %vm595_vm5, %v3057_v15  ;;  %4375 = vmatprep.subr.mxu0 %v2814_v12  ;;  %v3797_v15 = vld [vmem:[%s6048_s18 + $0x68] sm:$0xff] }
0x1c5e   :  { %v4579_v9 = vpop.eup %4578  ;;  %4366 = vmatprep.mubr.msk.f32.mxu0 %vm595_vm5, %v3059_v17  ;;  %4376 = vmatpush3.msra.mxu0 %v2814_v12  ;;  %v3796_v17 = vld [vmem:[%s6048_s18 + $0x60] sm:$0xff] }
0x1c5f   :  { %v3063_v63 = vmul.f32 %v4579_v9, %v4567_v4  ;;  %v4581_v18 = vpop.eup %4580  ;;  %4377 = vmatprep.subr.mxu0 %v2813_v51  ;;  %4398 = vmatpush3.msra.mxu1 %v3799_v61 }
0x1c60   :  { %v3065_v11 = vmul.f32 %v4581_v18, %v5926_v26  ;;  %4378 = vmatpush3.msra.mxu0 %v2813_v51  ;;  %4399 = vmatprep.subr.mxu1 %v3798_v42 }
0x1c61   :  { %4367 = vmatmul.mubr.msk.f32.gmra.mxu0 %vm595_vm5, %v3061_v62  ;;  %4379 = vmatprep.subr.mxu0 %v2812_v40 }
0x1c62   :  { %v4583_v3 = vpop.eup %4582  ;;  %4369 = vmatprep.mubr.msk.f32.mxu0 %vm595_vm5, %v3063_v63  ;;  %4380 = vmatpush3.msra.mxu0 %v2812_v40  ;;  %v5990_v40 = vld [vmem:[#allocation16] sm:$0xff] }
0x1c63   :  { %v3067_v22 = vmul.f32 %v4583_v3, %v4569_v41  ;;  %v4585_v44 = vpop.eup %4584  ;;  %4381 = vmatprep.subr.mxu0 %v2811_v5  ;;  %4400 = vmatpush3.msra.mxu1 %v3798_v42 }
0x1c64   :  { %v3069_v30 = vmul.f32 %v4585_v44, %v4565_v34  ;;  %4382 = vmatpush3.msra.mxu0 %v2811_v5  ;;  %4401 = vmatprep.subr.mxu1 %v3797_v15  ;;  %v5987_v44 = vld [vmem:[#allocation15] sm:$0xff] }
0x1c65   :  { %4370 = vmatmul.mubr.msk.f32.gmra.mxu0 %vm595_vm5, %v3065_v11  ;;  %4402 = vmatpush3.msra.mxu1 %v3797_v15 }
0x1c66   :  { %4372 = vmatprep.mubr.msk.f32.mxu0 %vm595_vm5, %v3067_v22  ;;  %4403 = vmatprep.subr.mxu1 %v3796_v17  ;;  %v3368_v22 = vsub.s32 5, %v5014_v25 }
0x1c67   :  { %4404 = vmatpush3.msra.mxu1 %v3796_v17 }
0x1c68   :  { %4405 = vmatprep.subr.mxu1 %v3795_v24  ;;  %v3375_v5 = vrot.slane %v5990_v40, %v3368_v22 }
0x1c69   :  { %4373 = vmatmul.mubr.msk.f32.gmra.mxu0 %vm595_vm5, %v3069_v30  ;;  %4406 = vmatpush3.msra.mxu1 %v3795_v24  ;;  %v3369_v30 = vrot.slane %v5987_v44, %v3368_v22 }
0x1d1d   :  { %v4365_v10 = vpop.f32.mrf.mxu0 }
0x1d1f   :  { %v3184_v46 = vpop.f32.mrf.mxu0 }
0x1d21   :  { %v4368_v56 = vpop.f32.mrf.mxu0 }
0x1d22   :  { %3227 = vrot.lane.b32.xlu1 %v4368_v56, %s4826_s24 }
0x1d23   :  { %v3194_v58 = vpop.f32.mrf.mxu0 }
0x1d24   :  { %3225 = vrot.lane.b32.xlu0 %v3194_v58, %s4826_s24 }
0x1d25   :  { %v4371_v1 = vpop.f32.mrf.mxu0 }
0x1d26   :  { %3235 = vrot.lane.b32.xlu1 %v4371_v1, %s4839_s26 }
0x1d27   :  { %v3204_v49 = vpop.f32.mrf.mxu0 }
0x1d28   :  { %3233 = vrot.lane.b32.xlu0 %v3204_v49, %s4839_s26 }
0x1d29   :  { %v4374_v27 = vpop.f32.mrf.mxu0 }
0x1d2a   :  { %3243 = vrot.lane.b32.xlu1 %v4374_v27, %s4844_s30  ;;  %v3794_v27 = vld [vmem:[%s6048_s18 + $0x50] sm:$0xff] }
0x1d2b   :  { %v3214_v21 = vpop.f32.mrf.mxu0  ;;  %4407 = vmatprep.subr.mxu1 %v3794_v27 }
0x1d2c   :  { %3241 = vrot.lane.b32.xlu0 %v3214_v21, %s4844_s30  ;;  %4408 = vmatpush3.msra.mxu1 %v3794_v27  ;;  %v3793_v21 = vld [vmem:[%s6048_s18 + $0x48] sm:$0xff] }
0x1d2d   :  { %4409 = vmatprep.subr.mxu1 %v3793_v21 }
0x1d2e   :  { %4410 = vmatpush3.msra.mxu1 %v3793_v21 }
0x1d94   :  { %v3228_v6 = vpop.permute.xlu1 %3227 }
0x1d95   :  { %v3248_v38 = vsel %vm207_vm1, %v4365_v10, %v3228_v6  ;;  %v3792_v6 = vld [vmem:[%s6048_s18 + $0x40] sm:$0xff] }
0x1d96   :  { %v3226_v23 = vpop.permute.xlu0 %3225  ;;  %4411 = vmatprep.subr.mxu1 %v3792_v6 }
0x1d97   :  { %v3247_v20 = vsel %vm207_vm1, %v3184_v46, %v3226_v23  ;;  %4412 = vmatpush3.msra.mxu1 %v3792_v6  ;;  %v4609_v23 = vld [vmem:[#allocation12] sm:$0x3] }
0x1d98   :  { %v3236_v14 = vpop.permute.xlu1 %3235 }
0x1d99   :  { %v3250_v50 = vsel %vm215_vm2, %v3248_v38, %v3236_v14  ;;  %v3386_v14 = vrot.slane %v4609_v23, %v5315_v60 }
0x1d9a   :  { %v3234_v28 = vpop.permute.xlu0 %3233 }
0x1d9b   :  { %v3249_v16 = vsel %vm215_vm2, %v3247_v20, %v3234_v28 }
0x1d9c   :  { %v3244_v29 = vpop.permute.xlu1 %3243 }
0x1d9d   :  { %v3252_v19 = vsel %vm865_vm6, %v3250_v50, %v3244_v29  ;;  %v4610_v50 = vld [vmem:[#allocation13] sm:$0x3] }
0x1d9e   :  { %v3242_v36 = vpop.permute.xlu0 %3241 }
0x1d9f   :  { %v3251_v26 = vsel %vm865_vm6, %v3249_v16, %v3242_v36 }
0x1da0   :  { %4383 = vmatprep.mubr.msk.f32.mxu0 %vm217_vm0, %v3251_v26  ;;  %v3482_v26 = vrot.slane %v4610_v50, %v5315_v60 }
0x1da1   :  { %4384 = vmatmul.mubr.msk.f32.vlgmr.msra.gmra.mxu0 %vm217_vm0, %v3252_v19 }
0x1e61   :  { %v4385_v33 = vpop.f32.mrf.mxu0 }
0x1e62   :  { %v3335_v34 = vadd.f32 %v4385_v33, %v3256_v32 }
0x1e63   :  { %v3329_v48 = vpop.f32.mrf.mxu0 }
0x1e64   :  { %v3339_v4 = vadd.f32 %v3335_v34, %v5829_v37  ;;  %v3330_v35 = vadd.f32 %v3329_v48, %v3256_v32 }
0x1e66   :  { %v3338_v7 = vadd.f32 %v3330_v35, %v5823_v39  ;;  %v3343_v41 = vsel %vm217_vm0, %v3339_v4, 0.0  ;;  %v3382_v39 = vld [vmem:[#allocation10 + $0x38] sm:$0xff] }
0x1e67   :  { %3344 = vadd.xlane.f32.xlu1 %v3343_v41  ;;  %4386 = vmatprep.subr.mxu0 %v3382_v39 }
0x1e68   :  { %v3340_v2 = vsel %vm217_vm0, %v3338_v7, 0.0  ;;  %4387 = vmatpush3.msra.mxu0 %v3382_v39 }
0x1e69   :  { %3341 = vadd.xlane.f32.xlu0 %v3340_v2  ;;  %4388 = vmatprep.subr.mxu0 %v3381_v8 }
0x1e6a   :  { %4389 = vmatpush3.msra.mxu0 %v3381_v8 }
0x1e6b   :  { %4390 = vmatprep.subr.mxu0 %v3380_v55 }
0x1e6c   :  { %4391 = vmatpush3.msra.mxu0 %v3380_v55  ;;  %v3594_v55 = vsub.s32 6, %v5014_v25 }
0x1e6d   :  { %4392 = vmatprep.subr.mxu0 %v3379_v43 }
0x1e6e   :  { %4393 = vmatpush3.msra.mxu0 %v3379_v43  ;;  %v3595_v43 = vrot.slane %v5987_v44, %v3594_v55  ;;  %v3601_v15 = vrot.slane %v5990_v40, %v3594_v55 }
0x1ef0   :  { %v3345_v53 = vpop.xlane.xlu1 %3344 }
0x1ef1   :  { %v3347_v47 = vmul.f32 0.03125, %v3345_v53 }
0x1ef2   :  { %v3342_v54 = vpop.xlane.xlu0 %3341 }
0x1ef3   :  { %v3346_v52 = vmul.f32 0.03125, %v3342_v54  ;;  %v3349_v57 = vsub.f32 %v3339_v4, %v3347_v47 }
0x1ef5   :  { %v3348_v45 = vsub.f32 %v3338_v7, %v3346_v52  ;;  %v3351_v59 = vmul.f32 %v3349_v57, %v3349_v57 }
0x1ef7   :  { %v3350_v0 = vmul.f32 %v3348_v45, %v3348_v45  ;;  %v3355_v37 = vsel %vm217_vm0, %v3351_v59, 0.0 }
0x1ef9   :  { %v3352_v13 = vsel %vm217_vm0, %v3350_v0, 0.0 }
0x1efa   :  { %3353 = vadd.xlane.f32.xlu0 %v3352_v13 }
0x1efe   :  { %3356 = vadd.xlane.f32.xlu0 %v3355_v37 }
0x1f83   :  { %v3354_v9 = vpop.xlane.xlu0 %3353 }
0x1f84   :  { %v3358_v62 = vmul.f32 0.03125, %v3354_v9 }
0x1f86   :  { %v3360_v63 = vadd.f32 1e-05, %v3358_v62 }
0x1f87   :  { %v3357_v18 = vpop.xlane.xlu0 %3356 }
0x1f88   :  { %4586 = vrsqrt.f32 %v3360_v63  ;;  %v3359_v3 = vmul.f32 0.03125, %v3357_v18 }
0x1f8a   :  { %v3361_v11 = vadd.f32 1e-05, %v3359_v3 }
0x1f8c   :  { %4588 = vrsqrt.f32 %v3361_v11 }
0x1f95   :  { %v4587_v12 = vpop.eup %4586 }
0x1f96   :  { %v3364_v51 = vmul.f32 %v4587_v12, %v3348_v45 }
0x1f98   :  { %v3370_v10 = vmul.f32 %v3369_v30, %v3364_v51 }
0x1f99   :  { %v4589_v46 = vpop.eup %4588 }
0x1f9a   :  { %v3365_v56 = vmul.f32 %v4589_v46, %v3349_v57  ;;  %v3376_v58 = vadd.f32 %v3375_v5, %v3370_v10 }
0x1f9c   :  { %v3371_v1 = vmul.f32 %v3369_v30, %v3365_v56  ;;  %4394 = vmatprep.mubr.msk.f32.mxu0 %vm217_vm0, %v3376_v58 }
0x1f9e   :  { %v3377_v49 = vadd.f32 %v3375_v5, %v3371_v1 }
0x1fa0   :  { %4395 = vmatmul.mubr.msk.f32.vlgmr.msra.gmra.mxu0 %vm217_vm0, %v3377_v49 }
0x2060   :  { %v4396_v28 = vpop.f32.mrf.mxu0 }
0x2061   :  { %v3465_v20 = vadd.f32 %v4396_v28, %v3386_v14  ;;  %v3632_v28 = vsub.s32 7, %v5014_v25 }
0x2062   :  { %v3459_v29 = vpop.f32.mrf.mxu0 }
0x2063   :  { %v3460_v38 = vadd.f32 %v3459_v29, %v3386_v14  ;;  %v3469_v36 = vmax.f32 %v3465_v20, 0.0  ;;  %v3633_v20 = vrot.slane %v5987_v44, %v3632_v28 }
0x2065   :  { %v3468_v16 = vmax.f32 %v3460_v38, 0.0  ;;  %v3639_v38 = vrot.slane %v5990_v40, %v3632_v28 }
0x2067   :  { %4413 = vmatprep.mubr.msk.f32.mxu1 %vm595_vm5, %v3468_v16 }
0x2068   :  { %4414 = vmatmul.mubr.msk.f32.vlgmr.msra.gmra.mxu1 %vm595_vm5, %v3469_v36 }
0x2128   :  { %v4415_v19 = vpop.f32.mrf.mxu1 }
0x2129   :  { %v3561_v31 = vadd.f32 %v4415_v19, %v3482_v26 }
0x212a   :  { %v3555_v32 = vpop.f32.mrf.mxu1 }
0x212b   :  { %v3565_v33 = vadd.f32 %v3561_v31, %v3377_v49  ;;  %v3556_v34 = vadd.f32 %v3555_v32, %v3482_v26 }
0x212d   :  { %v3564_v48 = vadd.f32 %v3556_v34, %v3376_v58  ;;  %v3569_v4 = vsel %vm217_vm0, %v3565_v33, 0.0 }
0x212e   :  { %3570 = vadd.xlane.f32.xlu1 %v3569_v4 }
0x212f   :  { %v3566_v35 = vsel %vm217_vm0, %v3564_v48, 0.0 }
0x2130   :  { %3567 = vadd.xlane.f32.xlu0 %v3566_v35 }
0x21b7   :  { %v3571_v7 = vpop.xlane.xlu1 %3570 }
0x21b8   :  { %v3573_v41 = vmul.f32 0.03125, %v3571_v7 }
0x21b9   :  { %v3568_v2 = vpop.xlane.xlu0 %3567 }
0x21ba   :  { %v3575_v53 = vsub.f32 %v3565_v33, %v3573_v41  ;;  %v3572_v47 = vmul.f32 0.03125, %v3568_v2 }
0x21bc   :  { %v3574_v54 = vsub.f32 %v3564_v48, %v3572_v47  ;;  %v3577_v52 = vmul.f32 %v3575_v53, %v3575_v53 }
0x21be   :  { %v3581_v60 = vsel %vm217_vm0, %v3577_v52, 0.0  ;;  %v3576_v57 = vmul.f32 %v3574_v54, %v3574_v54 }
0x21bf   :  { %3582 = vadd.xlane.f32.xlu1 %v3581_v60 }
0x21c0   :  { %v3578_v45 = vsel %vm217_vm0, %v3576_v57, 0.0 }
0x21c1   :  { %3579 = vadd.xlane.f32.xlu0 %v3578_v45 }
0x2248   :  { %v3583_v0 = vpop.xlane.xlu1 %3582 }
0x2249   :  { %v3585_v13 = vmul.f32 0.03125, %v3583_v0 }
0x224a   :  { %v3580_v59 = vpop.xlane.xlu0 %3579 }
0x224b   :  { %v3587_v37 = vadd.f32 1e-05, %v3585_v13  ;;  %v3584_v39 = vmul.f32 0.03125, %v3580_v59 }
0x224d   :  { %4590 = vrsqrt.f32 %v3587_v37  ;;  %v3586_v8 = vadd.f32 1e-05, %v3584_v39 }
0x224f   :  { %4592 = vrsqrt.f32 %v3586_v8 }
0x225a   :  { %v4591_v61 = vpop.eup %4590 }
0x225b   :  { %v3591_v42 = vmul.f32 %v4591_v61, %v3575_v53 }
0x225c   :  { %v4593_v17 = vpop.eup %4592 }
0x225d   :  { %v3597_v24 = vmul.f32 %v3595_v43, %v3591_v42  ;;  %v3590_v9 = vmul.f32 %v4593_v17, %v3574_v54 }
0x225f   :  { %v3603_v62 = vadd.f32 %v3601_v15, %v3597_v24  ;;  %v3596_v63 = vmul.f32 %v3595_v43, %v3590_v9 }
0x2261   :  { %v3607_v18 = vsel %vm217_vm0, %v3603_v62, 0.0  ;;  %v3602_v3 = vadd.f32 %v3601_v15, %v3596_v63 }
0x2262   :  { %3608 = vadd.xlane.f32.xlu1 %v3607_v18 }
0x2263   :  { %v3604_v11 = vsel %vm217_vm0, %v3602_v3, 0.0 }
0x2264   :  { %3605 = vadd.xlane.f32.xlu0 %v3604_v11 }
0x22eb   :  { %v3609_v22 = vpop.xlane.xlu1 %3608 }
0x22ec   :  { %v3611_v30 = vmul.f32 0.03125, %v3609_v22 }
0x22ed   :  { %v3606_v12 = vpop.xlane.xlu0 %3605 }
0x22ee   :  { %v3613_v51 = vsub.f32 %v3603_v62, %v3611_v30  ;;  %v3610_v5 = vmul.f32 0.03125, %v3606_v12 }
0x22f0   :  { %v3612_v10 = vsub.f32 %v3602_v3, %v3610_v5  ;;  %v3615_v46 = vmul.f32 %v3613_v51, %v3613_v51 }
0x22f2   :  { %v3619_v56 = vsel %vm217_vm0, %v3615_v46, 0.0  ;;  %v3614_v58 = vmul.f32 %v3612_v10, %v3612_v10 }
0x22f3   :  { %3620 = vadd.xlane.f32.xlu1 %v3619_v56 }
0x22f4   :  { %v3616_v1 = vsel %vm217_vm0, %v3614_v58, 0.0 }
0x22f5   :  { %3617 = vadd.xlane.f32.xlu0 %v3616_v1 }
0x237c   :  { %v3621_v49 = vpop.xlane.xlu1 %3620 }
0x237d   :  { %v3623_v27 = vmul.f32 0.03125, %v3621_v49 }
0x237e   :  { %v3618_v21 = vpop.xlane.xlu0 %3617 }
0x237f   :  { %v3625_v6 = vadd.f32 1e-05, %v3623_v27  ;;  %v3622_v23 = vmul.f32 0.03125, %v3618_v21 }
0x2381   :  { %4594 = vrsqrt.f32 %v3625_v6  ;;  %v3624_v14 = vadd.f32 1e-05, %v3622_v23 }
0x2383   :  { %4596 = vrsqrt.f32 %v3624_v14 }
0x238e   :  { %v4595_v29 = vpop.eup %4594 }
0x238f   :  { %v3629_v16 = vmul.f32 %v4595_v29, %v3613_v51 }
0x2390   :  { %v4597_v36 = vpop.eup %4596 }
0x2391   :  { %v3635_v50 = vmul.f32 %v3633_v20, %v3629_v16  ;;  %v3628_v26 = vmul.f32 %v4597_v36, %v3612_v10 }
0x2393   :  { %v3641_v19 = vadd.f32 %v3639_v38, %v3635_v50  ;;  %v3634_v31 = vmul.f32 %v3633_v20, %v3628_v26 }
0x2395   :  { %3643 = vst.msk [vmem:[%s6052_s22 + $0x8] sm:$0xff] %vm217_vm0, %v3641_v19  ;;  %v3640_v32 = vadd.f32 %v3639_v38, %v3634_v31 }
0x2397   :  { %3642 = vst.msk [vmem:[%s6052_s22] sm:$0xff] %vm217_vm0, %v3640_v32 }
0x2398   :  { %3648 = vsyncpa [#allocation3], 1 }
0x2399   :  { %3649 = vsyncpa [#allocation5], 1 }
0x239a   :  { %3650 = vsyncpa [#allocation8], 1 }
0x239b   :  { %3651 = vsyncpa [#allocation11], 1 }
0x239c   :  { %3652 = vsyncpa [#allocation14], 1 }
0x239d   :  { %3653 = vsyncpa [#allocation17], 1 }

</bundles_post_ra>
